<compile_context>
chip_gen: v7x
topology: tpu7x:2x2x1
jax: 0.10.0
libtpu: 0.0.40
codegen_flags: <defaults>
</compile_context>

<pallas_src>
import jax
import jax.numpy as jnp
from jax import lax
from jax.experimental import pallas as pl
from jax.experimental.pallas import tpu as pltpu


_CONV1_CIN = 8  # conv1 input channels zero-padded 3 -> 8 (sublane-aligned K).


# ---------------- Pallas kernels ----------------

def _conv3x3_relu_kernel(x_ref, w_ref, b_ref, o_ref):
    """Valid 3x3 conv + bias + ReLU for one NHWC image resident in VMEM.

    x_ref: (1, H, W, Cin) bf16   w_ref: (3, 3, Cin, Cout) bf16
    b_ref: (1, Cout) f32         o_ref: (1, Ho, Wo, Cout) bf16
    """
    _, n_rows, wo, cout = o_ref.shape
    x_img = x_ref.at[0]                       # (H, W, Cin) view (free)
    o_img = o_ref.at[0]                       # (Ho, Wo, Cout) view
    bias = b_ref[...]                         # (1, Cout) f32

    def row_body(ho, carry):
        acc = jnp.zeros((wo, cout), jnp.float32)
        # 9 taps, statically unrolled: shifted VMEM slices -> MXU, f32 accum.
        for dy in range(3):
            for dx in range(3):
                xs = x_img[ho + dy, pl.ds(dx, wo), :]          # (Wo, Cin) bf16
                acc = acc + jnp.dot(xs, w_ref[dy, dx],
                                    preferred_element_type=jnp.float32)
        acc = jnp.maximum(acc + bias, 0.0)                     # f32 epilogue (VPU)
        o_img[ho] = acc.astype(o_ref.dtype)                    # cast on store only
        return carry

    lax.fori_loop(0, n_rows, row_body, 0)


def conv3x3_relu(x, w, b):
    """x: (N, H, W, Cin) bf16; w: (3, 3, Cin, Cout) bf16; b: (Cout,) f32."""
    n, h, wdt, cin = x.shape
    cout = w.shape[-1]
    ho, wo = h - 2, wdt - 2
    cost = pl.CostEstimate(
        flops=2 * n * ho * wo * 9 * cin * cout,
        transcendentals=0,
        bytes_accessed=(x.size * x.dtype.itemsize
                        + w.size * w.dtype.itemsize
                        + n * ho * wo * cout * 2 + cout * 4),
    )
    return pl.pallas_call(
        _conv3x3_relu_kernel,
        out_shape=jax.ShapeDtypeStruct((n, ho, wo, cout), jnp.bfloat16),
        grid_spec=pltpu.PrefetchScalarGridSpec(
            num_scalar_prefetch=0,
            grid=(n,),
            in_specs=[
                pl.BlockSpec((1, h, wdt, cin), lambda i: (i, 0, 0, 0)),
                pl.BlockSpec((3, 3, cin, cout), lambda i: (0, 0, 0, 0)),
                pl.BlockSpec((1, cout), lambda i: (0, 0)),
            ],
            out_specs=pl.BlockSpec((1, ho, wo, cout), lambda i: (i, 0, 0, 0)),
        ),
        compiler_params=pltpu.CompilerParams(dimension_semantics=("parallel",)),
        cost_estimate=cost,
    )(x, w, b.reshape(1, cout))


def _maxpool2x2_kernel(x_ref, o_ref):
    """2x2/2 max pool, fully in VMEM.

    x_ref: (1, H/2, 2, W/2, 2*C) (row-pair / col-pair grouped view of NHWC)
    o_ref: (1, H/2, W/2, C)
    """
    c = o_ref.shape[-1]
    r_even = x_ref[0, :, 0, :, :]             # (H/2, W/2, 2C) even input rows
    r_odd = x_ref[0, :, 1, :, :]              # odd input rows
    v = jnp.maximum(r_even, r_odd)            # vertical max
    # Horizontal max: lanes [0:C) are even columns, [C:2C) odd columns.
    o_ref[0] = jnp.maximum(v[..., :c], v[..., c:])


def maxpool2x2(x):
    """x: (N, H, W, C) bf16 with even H, W -> (N, H//2, W//2, C) bf16."""
    n, h, wdt, c = x.shape
    h2, w2 = h // 2, wdt // 2
    x5 = x.reshape(n, h2, 2, w2, 2 * c)       # contiguous metadata reshape
    cost = pl.CostEstimate(
        flops=3 * n * h2 * w2 * c,
        transcendentals=0,
        bytes_accessed=(x.size + n * h2 * w2 * c) * x.dtype.itemsize,
    )
    return pl.pallas_call(
        _maxpool2x2_kernel,
        out_shape=jax.ShapeDtypeStruct((n, h2, w2, c), x.dtype),
        grid_spec=pltpu.PrefetchScalarGridSpec(
            num_scalar_prefetch=0,
            grid=(n,),
            in_specs=[pl.BlockSpec((1, h2, 2, w2, 2 * c),
                                   lambda i: (i, 0, 0, 0, 0))],
            out_specs=pl.BlockSpec((1, h2, w2, c), lambda i: (i, 0, 0, 0)),
        ),
        compiler_params=pltpu.CompilerParams(dimension_semantics=("parallel",)),
        cost_estimate=cost,
    )(x5)


def _fc_head_kernel(x_ref, w1_ref, b1_ref, w2_ref, b2_ref, o_ref):
    h = jnp.dot(x_ref[...], w1_ref[...], preferred_element_type=jnp.float32)
    h = jnp.maximum(h + b1_ref[...], 0.0)
    # TODO(synk): dropout3 (p=0.5) is train-time stochastic; eval-mode identity.
    out = jnp.dot(h.astype(w2_ref.dtype), w2_ref[...],
                  preferred_element_type=jnp.float32)
    o_ref[...] = (out + b2_ref[...]).astype(o_ref.dtype)


def _pick_row_tile(m, tm):
    tm = max(1, min(tm, m))
    # v7x megacore: prefer >= 2 row tiles so the "parallel" axis can split
    # across both TensorCores; keep tiles sublane-aligned, skip for tiny M.
    if m >= 16 and pl.cdiv(m, tm) < 2:
        half = (pl.cdiv(m, 2) + 7) // 8 * 8
        tm = min(m, max(8, half))
    return tm


def fc_head(x, w1, b1, w2, b2, tm=512):
    """Fused fc1 + ReLU + fc2; hidden activation stays resident in VMEM."""
    m, k1 = x.shape
    _, hdim = w1.shape
    _, nout = w2.shape
    tm = _pick_row_tile(m, tm)
    cost = pl.CostEstimate(
        flops=2 * m * k1 * hdim + 2 * m * hdim * nout,
        transcendentals=0,
        bytes_accessed=(x.size * x.dtype.itemsize
                        + w1.size * w1.dtype.itemsize
                        + w2.size * w2.dtype.itemsize
                        + m * nout * 4 + (hdim + nout) * 4),
    )
    return pl.pallas_call(
        _fc_head_kernel,
        out_shape=jax.ShapeDtypeStruct((m, nout), jnp.float32),
        grid_spec=pltpu.PrefetchScalarGridSpec(
            num_scalar_prefetch=0,
            grid=(pl.cdiv(m, tm),),
            in_specs=[
                pl.BlockSpec((tm, k1), lambda i: (i, 0)),
                pl.BlockSpec((k1, hdim), lambda i: (0, 0)),
                pl.BlockSpec((1, hdim), lambda i: (0, 0)),
                pl.BlockSpec((hdim, nout), lambda i: (0, 0)),
                pl.BlockSpec((1, nout), lambda i: (0, 0)),
            ],
            out_specs=pl.BlockSpec((tm, nout), lambda i: (i, 0)),
        ),
        compiler_params=pltpu.CompilerParams(dimension_semantics=("parallel",)),
        cost_estimate=cost,
    )(x, w1, b1.reshape(1, hdim), w2, b2.reshape(1, nout))


# ---------------- parameters ----------------

def init_torch_params(key):
    """PyTorch-layout, default-init-style parameters (f32)."""
    def conv_init(k, cout, cin, ksz):
        fan_in = cin * ksz * ksz
        bound = 1.0 / float(fan_in) ** 0.5
        k1, k2 = jax.random.split(k)
        w = jax.random.uniform(k1, (cout, cin, ksz, ksz), jnp.float32, -bound, bound)
        b = jax.random.uniform(k2, (cout,), jnp.float32, -bound, bound)
        return w, b

    def linear_init(k, out_f, in_f):
        bound = 1.0 / float(in_f) ** 0.5
        k1, k2 = jax.random.split(k)
        w = jax.random.uniform(k1, (out_f, in_f), jnp.float32, -bound, bound)
        b = jax.random.uniform(k2, (out_f,), jnp.float32, -bound, bound)
        return w, b

    ks = jax.random.split(key, 6)
    return {
        "conv1": conv_init(ks[0], 32, 3, 3),
        "conv2": conv_init(ks[1], 32, 32, 3),
        "conv3": conv_init(ks[2], 64, 32, 3),
        "conv4": conv_init(ks[3], 64, 64, 3),
        "fc1": linear_init(ks[4], 512, 64 * 5 * 5),
        "fc2": linear_init(ks[5], 10, 512),
    }


def pack_params(tp):
    """Pre-pack PyTorch-layout params for the Pallas forward (done once).

    * conv (Cout, Cin, 3, 3) -> (3, 3, Cin, Cout) bf16; conv1's Cin is
      zero-padded 3 -> 8 to align the per-tap contraction dim.
    * fc1 (512, 1600) expecting torch's (C, H, W) flatten -> (1600, 512) bf16
      with rows permuted to NHWC (H, W, C) flatten order.
    * fc2 (10, 512) -> (512, 10) bf16.  Biases stay f32.
    """
    packed = {}
    for name in ("conv1", "conv2", "conv3", "conv4"):
        w, b = tp[name]
        w = jnp.transpose(w, (2, 3, 1, 0))                      # (3, 3, Cin, Cout)
        if name == "conv1":
            w = jnp.pad(w, ((0, 0), (0, 0), (0, _CONV1_CIN - w.shape[2]), (0, 0)))
        packed[name] = (w.astype(jnp.bfloat16), b.astype(jnp.float32))
    w1, b1 = tp["fc1"]
    out_f = w1.shape[0]
    w1_nhwc = jnp.transpose(w1.reshape(out_f, 64, 5, 5), (0, 2, 3, 1))
    packed["fc1"] = (w1_nhwc.reshape(out_f, -1).T.astype(jnp.bfloat16),
                     b1.astype(jnp.float32))
    w2, b2 = tp["fc2"]
    packed["fc2"] = (w2.T.astype(jnp.bfloat16), b2.astype(jnp.float32))
    return packed


# ---------------- forward pass ----------------

@jax.jit
def image_classifier_forward(params, x_nchw):
    """x_nchw: (N, 3, 32, 32) f32 -> logits (N, 10) f32."""
    x = jnp.transpose(x_nchw, (0, 2, 3, 1))                      # NCHW -> NHWC once
    x = jnp.pad(x, ((0, 0), (0, 0), (0, 0), (0, _CONV1_CIN - x.shape[-1])))
    x = x.astype(jnp.bfloat16)
    x = conv3x3_relu(x, *params["conv1"])                        # (N, 30, 30, 32)
    x = conv3x3_relu(x, *params["conv2"])                        # (N, 28, 28, 32)
    x = maxpool2x2(x)                                            # (N, 14, 14, 32)
    # TODO(synk): dropout1 (p=0.1) train-time stochastic; eval-mode identity.
    x = conv3x3_relu(x, *params["conv3"])                        # (N, 12, 12, 64)
    x = conv3x3_relu(x, *params["conv4"])                        # (N, 10, 10, 64)
    x = maxpool2x2(x)                                            # (N, 5, 5, 64)
    # TODO(synk): dropout2 (p=0.2) eval-mode identity.
    n = x.shape[0]
    feats = x.reshape(n, -1)          # NHWC flatten (bf16); fc1 rows pre-permuted
    w1, b1 = params["fc1"]
    w2, b2 = params["fc2"]
    # Logits; PyTorch forward() does not apply self.softmax.
    return fc_head(feats, w1, b1, w2, b2)


if __name__ == "__main__":
    key = jax.random.PRNGKey(0)
    pkey, xkey = jax.random.split(key)
    params = pack_params(init_torch_params(pkey))
    # Input spatial size must be 32x32 so that fc1 sees 64*5*5 features.
    x = jax.random.normal(xkey, (2, 3, 32, 32), dtype=jnp.float32)
    out = image_classifier_forward(params, x)
    out = jax.block_until_ready(out)
    assert out.shape == (2, 10) and out.dtype == jnp.float32
    print("KERNEL_OK")
</pallas_src>

<mosaic_0001>
module attributes {stable_mosaic.version = 11 : i64} {
  func.func @_conv3x3_relu_kernel(%arg0: i32, %arg1: memref<1x32x32x8xbf16, #tpu.memory_space<vmem>>, %arg2: memref<3x3x8x32xbf16, #tpu.memory_space<vmem>>, %arg3: memref<1x32xf32, #tpu.memory_space<vmem>>, %arg4: memref<1x30x30x32xbf16, #tpu.memory_space<vmem>>) attributes {dimension_semantics = [#tpu.dimension_semantics<parallel>], iteration_bounds = array<i64: 2>, scalar_prefetch = 0 : i64, scratch_operands = 0 : i64, tpu.core_type = #tpu.core_type<tc>, window_params = [{transform_indices = @transform_0, window_bounds = array<i64: 1, 32, 32, 8>}, {pipeline_mode = #tpu.pipeline_mode<synchronous>, transform_indices = @transform_1, window_bounds = array<i64: 3, 3, 8, 32>}, {pipeline_mode = #tpu.pipeline_mode<synchronous>, transform_indices = @transform_2, window_bounds = array<i64: 1, 32>}, {transform_indices = @transform_3, window_bounds = array<i64: 1, 30, 30, 32>}]} {
    %c0 = arith.constant 0 : index
    %c0_0 = arith.constant 0 : index
    %0 = vector.load %arg3[%c0, %c0_0] : memref<1x32xf32, #tpu.memory_space<vmem>>, vector<1x32xf32>
    %c0_i32 = arith.constant 0 : i32
    %c0_i32_1 = arith.constant 0 : i32
    %c0_i32_2 = arith.constant 0 : i32
    %c30_i32 = arith.constant 30 : i32
    %1 = arith.addi %c0_i32_2, %c30_i32 : i32
    %c1_i32 = arith.constant 1 : i32
    scf.for %arg5 = %c0_i32_2 to %1 step %c1_i32  : i32 {
      %cst = arith.constant 0.000000e+00 : f32
      %2 = vector.broadcast %cst : f32 to vector<30x32xf32>
      %c0_i32_4 = arith.constant 0 : i32
      %3 = arith.addi %arg5, %c0_i32_4 : i32
      %c0_i32_5 = arith.constant 0 : i32
      %c0_i32_6 = arith.constant 0 : i32
      %c0_i32_7 = arith.constant 0 : i32
      %4 = tpu.memref_slice %arg1[%c0_i32, %c0_i32_5, %c0_i32_6, %c0_i32_7] : memref<1x32x32x8xbf16, #tpu.memory_space<vmem>> -> memref<1x32x32x8xbf16, #tpu.memory_space<vmem>>
      %5 = tpu.memref_squeeze %4 : memref<1x32x32x8xbf16, #tpu.memory_space<vmem>> -> memref<32x32x8xbf16, #tpu.memory_space<vmem>>
      %6 = arith.index_cast %3 : i32 to index
      %c0_8 = arith.constant 0 : index
      %c0_9 = arith.constant 0 : index
      %7 = vector.load %5[%6, %c0_8, %c0_9] : memref<32x32x8xbf16, #tpu.memory_space<vmem>>, vector<1x30x8xbf16>
      %8 = vector.shape_cast %7 : vector<1x30x8xbf16> to vector<30x8xbf16>
      %c0_10 = arith.constant 0 : index
      %c0_11 = arith.constant 0 : index
      %c0_12 = arith.constant 0 : index
      %c0_13 = arith.constant 0 : index
      %9 = vector.load %arg2[%c0_10, %c0_11, %c0_12, %c0_13] : memref<3x3x8x32xbf16, #tpu.memory_space<vmem>>, vector<1x1x8x32xbf16>
      %10 = vector.shape_cast %9 : vector<1x1x8x32xbf16> to vector<8x32xbf16>
      %cst_14 = arith.constant dense<0.000000e+00> : vector<30x32xf32>
      %11 = tpu.matmul %8, %10, %cst_14 {dimension_numbers = #tpu.dot_dimension_numbers<[1], [0], [0], [1], [0, 0, 1, 1], [], []>} : vector<30x8xbf16>, vector<8x32xbf16>, vector<30x32xf32> -> vector<30x32xf32>
      %12 = arith.addf %2, %11 : vector<30x32xf32>
      %c0_i32_15 = arith.constant 0 : i32
      %13 = arith.addi %arg5, %c0_i32_15 : i32
      %c0_i32_16 = arith.constant 0 : i32
      %c0_i32_17 = arith.constant 0 : i32
      %c0_i32_18 = arith.constant 0 : i32
      %14 = tpu.memref_slice %arg1[%c0_i32, %c0_i32_16, %c0_i32_17, %c0_i32_18] : memref<1x32x32x8xbf16, #tpu.memory_space<vmem>> -> memref<1x32x32x8xbf16, #tpu.memory_space<vmem>>
      %15 = tpu.memref_squeeze %14 : memref<1x32x32x8xbf16, #tpu.memory_space<vmem>> -> memref<32x32x8xbf16, #tpu.memory_space<vmem>>
      %16 = arith.index_cast %13 : i32 to index
      %c1 = arith.constant 1 : index
      %c0_19 = arith.constant 0 : index
      %17 = vector.load %15[%16, %c1, %c0_19] : memref<32x32x8xbf16, #tpu.memory_space<vmem>>, vector<1x30x8xbf16>
      %18 = vector.shape_cast %17 : vector<1x30x8xbf16> to vector<30x8xbf16>
      %c0_20 = arith.constant 0 : index
      %c1_21 = arith.constant 1 : index
      %c0_22 = arith.constant 0 : index
      %c0_23 = arith.constant 0 : index
      %19 = vector.load %arg2[%c0_20, %c1_21, %c0_22, %c0_23] : memref<3x3x8x32xbf16, #tpu.memory_space<vmem>>, vector<1x1x8x32xbf16>
      %20 = vector.shape_cast %19 : vector<1x1x8x32xbf16> to vector<8x32xbf16>
      %cst_24 = arith.constant dense<0.000000e+00> : vector<30x32xf32>
      %21 = tpu.matmul %18, %20, %cst_24 {dimension_numbers = #tpu.dot_dimension_numbers<[1], [0], [0], [1], [0, 0, 1, 1], [], []>} : vector<30x8xbf16>, vector<8x32xbf16>, vector<30x32xf32> -> vector<30x32xf32>
      %22 = arith.addf %12, %21 : vector<30x32xf32>
      %c0_i32_25 = arith.constant 0 : i32
      %23 = arith.addi %arg5, %c0_i32_25 : i32
      %c0_i32_26 = arith.constant 0 : i32
      %c0_i32_27 = arith.constant 0 : i32
      %c0_i32_28 = arith.constant 0 : i32
      %24 = tpu.memref_slice %arg1[%c0_i32, %c0_i32_26, %c0_i32_27, %c0_i32_28] : memref<1x32x32x8xbf16, #tpu.memory_space<vmem>> -> memref<1x32x32x8xbf16, #tpu.memory_space<vmem>>
      %25 = tpu.memref_squeeze %24 : memref<1x32x32x8xbf16, #tpu.memory_space<vmem>> -> memref<32x32x8xbf16, #tpu.memory_space<vmem>>
      %26 = arith.index_cast %23 : i32 to index
      %c2 = arith.constant 2 : index
      %c0_29 = arith.constant 0 : index
      %27 = vector.load %25[%26, %c2, %c0_29] : memref<32x32x8xbf16, #tpu.memory_space<vmem>>, vector<1x30x8xbf16>
      %28 = vector.shape_cast %27 : vector<1x30x8xbf16> to vector<30x8xbf16>
      %c0_30 = arith.constant 0 : index
      %c2_31 = arith.constant 2 : index
      %c0_32 = arith.constant 0 : index
      %c0_33 = arith.constant 0 : index
      %29 = vector.load %arg2[%c0_30, %c2_31, %c0_32, %c0_33] : memref<3x3x8x32xbf16, #tpu.memory_space<vmem>>, vector<1x1x8x32xbf16>
      %30 = vector.shape_cast %29 : vector<1x1x8x32xbf16> to vector<8x32xbf16>
      %cst_34 = arith.constant dense<0.000000e+00> : vector<30x32xf32>
      %31 = tpu.matmul %28, %30, %cst_34 {dimension_numbers = #tpu.dot_dimension_numbers<[1], [0], [0], [1], [0, 0, 1, 1], [], []>} : vector<30x8xbf16>, vector<8x32xbf16>, vector<30x32xf32> -> vector<30x32xf32>
      %32 = arith.addf %22, %31 : vector<30x32xf32>
      %c1_i32_35 = arith.constant 1 : i32
      %33 = arith.addi %arg5, %c1_i32_35 : i32
      %c0_i32_36 = arith.constant 0 : i32
      %c0_i32_37 = arith.constant 0 : i32
      %c0_i32_38 = arith.constant 0 : i32
      %34 = tpu.memref_slice %arg1[%c0_i32, %c0_i32_36, %c0_i32_37, %c0_i32_38] : memref<1x32x32x8xbf16, #tpu.memory_space<vmem>> -> memref<1x32x32x8xbf16, #tpu.memory_space<vmem>>
      %35 = tpu.memref_squeeze %34 : memref<1x32x32x8xbf16, #tpu.memory_space<vmem>> -> memref<32x32x8xbf16, #tpu.memory_space<vmem>>
      %36 = arith.index_cast %33 : i32 to index
      %c0_39 = arith.constant 0 : index
      %c0_40 = arith.constant 0 : index
      %37 = vector.load %35[%36, %c0_39, %c0_40] : memref<32x32x8xbf16, #tpu.memory_space<vmem>>, vector<1x30x8xbf16>
      %38 = vector.shape_cast %37 : vector<1x30x8xbf16> to vector<30x8xbf16>
      %c1_41 = arith.constant 1 : index
      %c0_42 = arith.constant 0 : index
      %c0_43 = arith.constant 0 : index
      %c0_44 = arith.constant 0 : index
      %39 = vector.load %arg2[%c1_41, %c0_42, %c0_43, %c0_44] : memref<3x3x8x32xbf16, #tpu.memory_space<vmem>>, vector<1x1x8x32xbf16>
      %40 = vector.shape_cast %39 : vector<1x1x8x32xbf16> to vector<8x32xbf16>
      %cst_45 = arith.constant dense<0.000000e+00> : vector<30x32xf32>
      %41 = tpu.matmul %38, %40, %cst_45 {dimension_numbers = #tpu.dot_dimension_numbers<[1], [0], [0], [1], [0, 0, 1, 1], [], []>} : vector<30x8xbf16>, vector<8x32xbf16>, vector<30x32xf32> -> vector<30x32xf32>
      %42 = arith.addf %32, %41 : vector<30x32xf32>
      %c1_i32_46 = arith.constant 1 : i32
      %43 = arith.addi %arg5, %c1_i32_46 : i32
      %c0_i32_47 = arith.constant 0 : i32
      %c0_i32_48 = arith.constant 0 : i32
      %c0_i32_49 = arith.constant 0 : i32
      %44 = tpu.memref_slice %arg1[%c0_i32, %c0_i32_47, %c0_i32_48, %c0_i32_49] : memref<1x32x32x8xbf16, #tpu.memory_space<vmem>> -> memref<1x32x32x8xbf16, #tpu.memory_space<vmem>>
      %45 = tpu.memref_squeeze %44 : memref<1x32x32x8xbf16, #tpu.memory_space<vmem>> -> memref<32x32x8xbf16, #tpu.memory_space<vmem>>
      %46 = arith.index_cast %43 : i32 to index
      %c1_50 = arith.constant 1 : index
      %c0_51 = arith.constant 0 : index
      %47 = vector.load %45[%46, %c1_50, %c0_51] : memref<32x32x8xbf16, #tpu.memory_space<vmem>>, vector<1x30x8xbf16>
      %48 = vector.shape_cast %47 : vector<1x30x8xbf16> to vector<30x8xbf16>
      %c1_52 = arith.constant 1 : index
      %c1_53 = arith.constant 1 : index
      %c0_54 = arith.constant 0 : index
      %c0_55 = arith.constant 0 : index
      %49 = vector.load %arg2[%c1_52, %c1_53, %c0_54, %c0_55] : memref<3x3x8x32xbf16, #tpu.memory_space<vmem>>, vector<1x1x8x32xbf16>
      %50 = vector.shape_cast %49 : vector<1x1x8x32xbf16> to vector<8x32xbf16>
      %cst_56 = arith.constant dense<0.000000e+00> : vector<30x32xf32>
      %51 = tpu.matmul %48, %50, %cst_56 {dimension_numbers = #tpu.dot_dimension_numbers<[1], [0], [0], [1], [0, 0, 1, 1], [], []>} : vector<30x8xbf16>, vector<8x32xbf16>, vector<30x32xf32> -> vector<30x32xf32>
      %52 = arith.addf %42, %51 : vector<30x32xf32>
      %c1_i32_57 = arith.constant 1 : i32
      %53 = arith.addi %arg5, %c1_i32_57 : i32
      %c0_i32_58 = arith.constant 0 : i32
      %c0_i32_59 = arith.constant 0 : i32
      %c0_i32_60 = arith.constant 0 : i32
      %54 = tpu.memref_slice %arg1[%c0_i32, %c0_i32_58, %c0_i32_59, %c0_i32_60] : memref<1x32x32x8xbf16, #tpu.memory_space<vmem>> -> memref<1x32x32x8xbf16, #tpu.memory_space<vmem>>
      %55 = tpu.memref_squeeze %54 : memref<1x32x32x8xbf16, #tpu.memory_space<vmem>> -> memref<32x32x8xbf16, #tpu.memory_space<vmem>>
      %56 = arith.index_cast %53 : i32 to index
      %c2_61 = arith.constant 2 : index
      %c0_62 = arith.constant 0 : index
      %57 = vector.load %55[%56, %c2_61, %c0_62] : memref<32x32x8xbf16, #tpu.memory_space<vmem>>, vector<1x30x8xbf16>
      %58 = vector.shape_cast %57 : vector<1x30x8xbf16> to vector<30x8xbf16>
      %c1_63 = arith.constant 1 : index
      %c2_64 = arith.constant 2 : index
      %c0_65 = arith.constant 0 : index
      %c0_66 = arith.constant 0 : index
      %59 = vector.load %arg2[%c1_63, %c2_64, %c0_65, %c0_66] : memref<3x3x8x32xbf16, #tpu.memory_space<vmem>>, vector<1x1x8x32xbf16>
      %60 = vector.shape_cast %59 : vector<1x1x8x32xbf16> to vector<8x32xbf16>
      %cst_67 = arith.constant dense<0.000000e+00> : vector<30x32xf32>
      %61 = tpu.matmul %58, %60, %cst_67 {dimension_numbers = #tpu.dot_dimension_numbers<[1], [0], [0], [1], [0, 0, 1, 1], [], []>} : vector<30x8xbf16>, vector<8x32xbf16>, vector<30x32xf32> -> vector<30x32xf32>
      %62 = arith.addf %52, %61 : vector<30x32xf32>
      %c2_i32 = arith.constant 2 : i32
      %63 = arith.addi %arg5, %c2_i32 : i32
      %c0_i32_68 = arith.constant 0 : i32
      %c0_i32_69 = arith.constant 0 : i32
      %c0_i32_70 = arith.constant 0 : i32
      %64 = tpu.memref_slice %arg1[%c0_i32, %c0_i32_68, %c0_i32_69, %c0_i32_70] : memref<1x32x32x8xbf16, #tpu.memory_space<vmem>> -> memref<1x32x32x8xbf16, #tpu.memory_space<vmem>>
      %65 = tpu.memref_squeeze %64 : memref<1x32x32x8xbf16, #tpu.memory_space<vmem>> -> memref<32x32x8xbf16, #tpu.memory_space<vmem>>
      %66 = arith.index_cast %63 : i32 to index
      %c0_71 = arith.constant 0 : index
      %c0_72 = arith.constant 0 : index
      %67 = vector.load %65[%66, %c0_71, %c0_72] : memref<32x32x8xbf16, #tpu.memory_space<vmem>>, vector<1x30x8xbf16>
      %68 = vector.shape_cast %67 : vector<1x30x8xbf16> to vector<30x8xbf16>
      %c2_73 = arith.constant 2 : index
      %c0_74 = arith.constant 0 : index
      %c0_75 = arith.constant 0 : index
      %c0_76 = arith.constant 0 : index
      %69 = vector.load %arg2[%c2_73, %c0_74, %c0_75, %c0_76] : memref<3x3x8x32xbf16, #tpu.memory_space<vmem>>, vector<1x1x8x32xbf16>
      %70 = vector.shape_cast %69 : vector<1x1x8x32xbf16> to vector<8x32xbf16>
      %cst_77 = arith.constant dense<0.000000e+00> : vector<30x32xf32>
      %71 = tpu.matmul %68, %70, %cst_77 {dimension_numbers = #tpu.dot_dimension_numbers<[1], [0], [0], [1], [0, 0, 1, 1], [], []>} : vector<30x8xbf16>, vector<8x32xbf16>, vector<30x32xf32> -> vector<30x32xf32>
      %72 = arith.addf %62, %71 : vector<30x32xf32>
      %c2_i32_78 = arith.constant 2 : i32
      %73 = arith.addi %arg5, %c2_i32_78 : i32
      %c0_i32_79 = arith.constant 0 : i32
      %c0_i32_80 = arith.constant 0 : i32
      %c0_i32_81 = arith.constant 0 : i32
      %74 = tpu.memref_slice %arg1[%c0_i32, %c0_i32_79, %c0_i32_80, %c0_i32_81] : memref<1x32x32x8xbf16, #tpu.memory_space<vmem>> -> memref<1x32x32x8xbf16, #tpu.memory_space<vmem>>
      %75 = tpu.memref_squeeze %74 : memref<1x32x32x8xbf16, #tpu.memory_space<vmem>> -> memref<32x32x8xbf16, #tpu.memory_space<vmem>>
      %76 = arith.index_cast %73 : i32 to index
      %c1_82 = arith.constant 1 : index
      %c0_83 = arith.constant 0 : index
      %77 = vector.load %75[%76, %c1_82, %c0_83] : memref<32x32x8xbf16, #tpu.memory_space<vmem>>, vector<1x30x8xbf16>
      %78 = vector.shape_cast %77 : vector<1x30x8xbf16> to vector<30x8xbf16>
      %c2_84 = arith.constant 2 : index
      %c1_85 = arith.constant 1 : index
      %c0_86 = arith.constant 0 : index
      %c0_87 = arith.constant 0 : index
      %79 = vector.load %arg2[%c2_84, %c1_85, %c0_86, %c0_87] : memref<3x3x8x32xbf16, #tpu.memory_space<vmem>>, vector<1x1x8x32xbf16>
      %80 = vector.shape_cast %79 : vector<1x1x8x32xbf16> to vector<8x32xbf16>
      %cst_88 = arith.constant dense<0.000000e+00> : vector<30x32xf32>
      %81 = tpu.matmul %78, %80, %cst_88 {dimension_numbers = #tpu.dot_dimension_numbers<[1], [0], [0], [1], [0, 0, 1, 1], [], []>} : vector<30x8xbf16>, vector<8x32xbf16>, vector<30x32xf32> -> vector<30x32xf32>
      %82 = arith.addf %72, %81 : vector<30x32xf32>
      %c2_i32_89 = arith.constant 2 : i32
      %83 = arith.addi %arg5, %c2_i32_89 : i32
      %c0_i32_90 = arith.constant 0 : i32
      %c0_i32_91 = arith.constant 0 : i32
      %c0_i32_92 = arith.constant 0 : i32
      %84 = tpu.memref_slice %arg1[%c0_i32, %c0_i32_90, %c0_i32_91, %c0_i32_92] : memref<1x32x32x8xbf16, #tpu.memory_space<vmem>> -> memref<1x32x32x8xbf16, #tpu.memory_space<vmem>>
      %85 = tpu.memref_squeeze %84 : memref<1x32x32x8xbf16, #tpu.memory_space<vmem>> -> memref<32x32x8xbf16, #tpu.memory_space<vmem>>
      %86 = arith.index_cast %83 : i32 to index
      %c2_93 = arith.constant 2 : index
      %c0_94 = arith.constant 0 : index
      %87 = vector.load %85[%86, %c2_93, %c0_94] : memref<32x32x8xbf16, #tpu.memory_space<vmem>>, vector<1x30x8xbf16>
      %88 = vector.shape_cast %87 : vector<1x30x8xbf16> to vector<30x8xbf16>
      %c2_95 = arith.constant 2 : index
      %c2_96 = arith.constant 2 : index
      %c0_97 = arith.constant 0 : index
      %c0_98 = arith.constant 0 : index
      %89 = vector.load %arg2[%c2_95, %c2_96, %c0_97, %c0_98] : memref<3x3x8x32xbf16, #tpu.memory_space<vmem>>, vector<1x1x8x32xbf16>
      %90 = vector.shape_cast %89 : vector<1x1x8x32xbf16> to vector<8x32xbf16>
      %cst_99 = arith.constant dense<0.000000e+00> : vector<30x32xf32>
      %91 = tpu.matmul %88, %90, %cst_99 {dimension_numbers = #tpu.dot_dimension_numbers<[1], [0], [0], [1], [0, 0, 1, 1], [], []>} : vector<30x8xbf16>, vector<8x32xbf16>, vector<30x32xf32> -> vector<30x32xf32>
      %92 = arith.addf %82, %91 : vector<30x32xf32>
      %93 = vector.broadcast %0 : vector<1x32xf32> to vector<30x32xf32>
      %94 = arith.addf %92, %93 : vector<30x32xf32>
      %cst_100 = arith.constant 0.000000e+00 : f32
      %95 = vector.broadcast %cst_100 : f32 to vector<30x32xf32>
      %96 = arith.maximumf %94, %95 : vector<30x32xf32>
      %97 = arith.truncf %96 : vector<30x32xf32> to vector<30x32xbf16>
      %c0_i32_101 = arith.constant 0 : i32
      %c0_i32_102 = arith.constant 0 : i32
      %c0_i32_103 = arith.constant 0 : i32
      %98 = tpu.memref_slice %arg4[%c0_i32_1, %c0_i32_101, %c0_i32_102, %c0_i32_103] : memref<1x30x30x32xbf16, #tpu.memory_space<vmem>> -> memref<1x30x30x32xbf16, #tpu.memory_space<vmem>>
      %99 = tpu.memref_squeeze %98 : memref<1x30x30x32xbf16, #tpu.memory_space<vmem>> -> memref<30x30x32xbf16, #tpu.memory_space<vmem>>
      %100 = arith.index_cast %arg5 : i32 to index
      %c0_104 = arith.constant 0 : index
      %c0_105 = arith.constant 0 : index
      %101 = vector.load %99[%100, %c0_104, %c0_105] : memref<30x30x32xbf16, #tpu.memory_space<vmem>>, vector<1x30x32xbf16>
      %102 = vector.shape_cast %101 : vector<1x30x32xbf16> to vector<30x32xbf16>
      %103 = vector.shape_cast %97 : vector<30x32xbf16> to vector<1x30x32xbf16>
      tpu.vector_store %99[%100, %c0_104, %c0_105], %103 {strides = array<i32>} : memref<30x30x32xbf16, #tpu.memory_space<vmem>>, vector<1x30x32xbf16>,
    }
    %c30_i32_3 = arith.constant 30 : i32
    return
  }
  func.func @transform_0(%arg0: i32) -> (i32, i32, i32, i32) {
    %c0_i32 = arith.constant 0 : i32
    %c0_i32_0 = arith.constant 0 : i32
    %c0_i32_1 = arith.constant 0 : i32
    %c0_i32_2 = arith.constant 0 : i32
    return %arg0, %c0_i32, %c0_i32_0, %c0_i32_1 : i32, i32, i32, i32
  }
  func.func @transform_1(%arg0: i32) -> (i32, i32, i32, i32) {
    %c0_i32 = arith.constant 0 : i32
    %c0_i32_0 = arith.constant 0 : i32
    %c0_i32_1 = arith.constant 0 : i32
    %c0_i32_2 = arith.constant 0 : i32
    %c0_i32_3 = arith.constant 0 : i32
    return %c0_i32, %c0_i32_0, %c0_i32_1, %c0_i32_2 : i32, i32, i32, i32
  }
  func.func @transform_2(%arg0: i32) -> (i32, i32) {
    %c0_i32 = arith.constant 0 : i32
    %c0_i32_0 = arith.constant 0 : i32
    %c0_i32_1 = arith.constant 0 : i32
    return %c0_i32, %c0_i32_0 : i32, i32
  }
  func.func @transform_3(%arg0: i32) -> (i32, i32, i32, i32) {
    %c0_i32 = arith.constant 0 : i32
    %c0_i32_0 = arith.constant 0 : i32
    %c0_i32_1 = arith.constant 0 : i32
    %c0_i32_2 = arith.constant 0 : i32
    return %arg0, %c0_i32, %c0_i32_0, %c0_i32_1 : i32, i32, i32, i32
  }
}

module attributes {stable_mosaic.version = 11 : i64} {
  func.func @_conv3x3_relu_kernel(%arg0: i32, %arg1: memref<1x30x30x32xbf16, #tpu.memory_space<vmem>>, %arg2: memref<3x3x32x32xbf16, #tpu.memory_space<vmem>>, %arg3: memref<1x32xf32, #tpu.memory_space<vmem>>, %arg4: memref<1x28x28x32xbf16, #tpu.memory_space<vmem>>) attributes {dimension_semantics = [#tpu.dimension_semantics<parallel>], iteration_bounds = array<i64: 2>, scalar_prefetch = 0 : i64, scratch_operands = 0 : i64, tpu.core_type = #tpu.core_type<tc>, window_params = [{transform_indices = @transform_0, window_bounds = array<i64: 1, 30, 30, 32>}, {pipeline_mode = #tpu.pipeline_mode<synchronous>, transform_indices = @transform_1, window_bounds = array<i64: 3, 3, 32, 32>}, {pipeline_mode = #tpu.pipeline_mode<synchronous>, transform_indices = @transform_2, window_bounds = array<i64: 1, 32>}, {transform_indices = @transform_3, window_bounds = array<i64: 1, 28, 28, 32>}]} {
    %c0 = arith.constant 0 : index
    %c0_0 = arith.constant 0 : index
    %0 = vector.load %arg3[%c0, %c0_0] : memref<1x32xf32, #tpu.memory_space<vmem>>, vector<1x32xf32>
    %c0_i32 = arith.constant 0 : i32
    %c0_i32_1 = arith.constant 0 : i32
    %c0_i32_2 = arith.constant 0 : i32
    %c28_i32 = arith.constant 28 : i32
    %1 = arith.addi %c0_i32_2, %c28_i32 : i32
    %c1_i32 = arith.constant 1 : i32
    scf.for %arg5 = %c0_i32_2 to %1 step %c1_i32  : i32 {
      %cst = arith.constant 0.000000e+00 : f32
      %2 = vector.broadcast %cst : f32 to vector<28x32xf32>
      %c0_i32_4 = arith.constant 0 : i32
      %3 = arith.addi %arg5, %c0_i32_4 : i32
      %c0_i32_5 = arith.constant 0 : i32
      %c0_i32_6 = arith.constant 0 : i32
      %c0_i32_7 = arith.constant 0 : i32
      %4 = tpu.memref_slice %arg1[%c0_i32, %c0_i32_5, %c0_i32_6, %c0_i32_7] : memref<1x30x30x32xbf16, #tpu.memory_space<vmem>> -> memref<1x30x30x32xbf16, #tpu.memory_space<vmem>>
      %5 = tpu.memref_squeeze %4 : memref<1x30x30x32xbf16, #tpu.memory_space<vmem>> -> memref<30x30x32xbf16, #tpu.memory_space<vmem>>
      %6 = arith.index_cast %3 : i32 to index
      %c0_8 = arith.constant 0 : index
      %c0_9 = arith.constant 0 : index
      %7 = vector.load %5[%6, %c0_8, %c0_9] : memref<30x30x32xbf16, #tpu.memory_space<vmem>>, vector<1x28x32xbf16>
      %8 = vector.shape_cast %7 : vector<1x28x32xbf16> to vector<28x32xbf16>
      %c0_10 = arith.constant 0 : index
      %c0_11 = arith.constant 0 : index
      %c0_12 = arith.constant 0 : index
      %c0_13 = arith.constant 0 : index
      %9 = vector.load %arg2[%c0_10, %c0_11, %c0_12, %c0_13] : memref<3x3x32x32xbf16, #tpu.memory_space<vmem>>, vector<1x1x32x32xbf16>
      %10 = vector.shape_cast %9 : vector<1x1x32x32xbf16> to vector<32x32xbf16>
      %cst_14 = arith.constant dense<0.000000e+00> : vector<28x32xf32>
      %11 = tpu.matmul %8, %10, %cst_14 {dimension_numbers = #tpu.dot_dimension_numbers<[1], [0], [0], [1], [0, 0, 1, 1], [], []>} : vector<28x32xbf16>, vector<32x32xbf16>, vector<28x32xf32> -> vector<28x32xf32>
      %12 = arith.addf %2, %11 : vector<28x32xf32>
      %c0_i32_15 = arith.constant 0 : i32
      %13 = arith.addi %arg5, %c0_i32_15 : i32
      %c0_i32_16 = arith.constant 0 : i32
      %c0_i32_17 = arith.constant 0 : i32
      %c0_i32_18 = arith.constant 0 : i32
      %14 = tpu.memref_slice %arg1[%c0_i32, %c0_i32_16, %c0_i32_17, %c0_i32_18] : memref<1x30x30x32xbf16, #tpu.memory_space<vmem>> -> memref<1x30x30x32xbf16, #tpu.memory_space<vmem>>
      %15 = tpu.memref_squeeze %14 : memref<1x30x30x32xbf16, #tpu.memory_space<vmem>> -> memref<30x30x32xbf16, #tpu.memory_space<vmem>>
      %16 = arith.index_cast %13 : i32 to index
      %c1 = arith.constant 1 : index
      %c0_19 = arith.constant 0 : index
      %17 = vector.load %15[%16, %c1, %c0_19] : memref<30x30x32xbf16, #tpu.memory_space<vmem>>, vector<1x28x32xbf16>
      %18 = vector.shape_cast %17 : vector<1x28x32xbf16> to vector<28x32xbf16>
      %c0_20 = arith.constant 0 : index
      %c1_21 = arith.constant 1 : index
      %c0_22 = arith.constant 0 : index
      %c0_23 = arith.constant 0 : index
      %19 = vector.load %arg2[%c0_20, %c1_21, %c0_22, %c0_23] : memref<3x3x32x32xbf16, #tpu.memory_space<vmem>>, vector<1x1x32x32xbf16>
      %20 = vector.shape_cast %19 : vector<1x1x32x32xbf16> to vector<32x32xbf16>
      %cst_24 = arith.constant dense<0.000000e+00> : vector<28x32xf32>
      %21 = tpu.matmul %18, %20, %cst_24 {dimension_numbers = #tpu.dot_dimension_numbers<[1], [0], [0], [1], [0, 0, 1, 1], [], []>} : vector<28x32xbf16>, vector<32x32xbf16>, vector<28x32xf32> -> vector<28x32xf32>
      %22 = arith.addf %12, %21 : vector<28x32xf32>
      %c0_i32_25 = arith.constant 0 : i32
      %23 = arith.addi %arg5, %c0_i32_25 : i32
      %c0_i32_26 = arith.constant 0 : i32
      %c0_i32_27 = arith.constant 0 : i32
      %c0_i32_28 = arith.constant 0 : i32
      %24 = tpu.memref_slice %arg1[%c0_i32, %c0_i32_26, %c0_i32_27, %c0_i32_28] : memref<1x30x30x32xbf16, #tpu.memory_space<vmem>> -> memref<1x30x30x32xbf16, #tpu.memory_space<vmem>>
      %25 = tpu.memref_squeeze %24 : memref<1x30x30x32xbf16, #tpu.memory_space<vmem>> -> memref<30x30x32xbf16, #tpu.memory_space<vmem>>
      %26 = arith.index_cast %23 : i32 to index
      %c2 = arith.constant 2 : index
      %c0_29 = arith.constant 0 : index
      %27 = vector.load %25[%26, %c2, %c0_29] : memref<30x30x32xbf16, #tpu.memory_space<vmem>>, vector<1x28x32xbf16>
      %28 = vector.shape_cast %27 : vector<1x28x32xbf16> to vector<28x32xbf16>
      %c0_30 = arith.constant 0 : index
      %c2_31 = arith.constant 2 : index
      %c0_32 = arith.constant 0 : index
      %c0_33 = arith.constant 0 : index
      %29 = vector.load %arg2[%c0_30, %c2_31, %c0_32, %c0_33] : memref<3x3x32x32xbf16, #tpu.memory_space<vmem>>, vector<1x1x32x32xbf16>
      %30 = vector.shape_cast %29 : vector<1x1x32x32xbf16> to vector<32x32xbf16>
      %cst_34 = arith.constant dense<0.000000e+00> : vector<28x32xf32>
      %31 = tpu.matmul %28, %30, %cst_34 {dimension_numbers = #tpu.dot_dimension_numbers<[1], [0], [0], [1], [0, 0, 1, 1], [], []>} : vector<28x32xbf16>, vector<32x32xbf16>, vector<28x32xf32> -> vector<28x32xf32>
      %32 = arith.addf %22, %31 : vector<28x32xf32>
      %c1_i32_35 = arith.constant 1 : i32
      %33 = arith.addi %arg5, %c1_i32_35 : i32
      %c0_i32_36 = arith.constant 0 : i32
      %c0_i32_37 = arith.constant 0 : i32
      %c0_i32_38 = arith.constant 0 : i32
      %34 = tpu.memref_slice %arg1[%c0_i32, %c0_i32_36, %c0_i32_37, %c0_i32_38] : memref<1x30x30x32xbf16, #tpu.memory_space<vmem>> -> memref<1x30x30x32xbf16, #tpu.memory_space<vmem>>
      %35 = tpu.memref_squeeze %34 : memref<1x30x30x32xbf16, #tpu.memory_space<vmem>> -> memref<30x30x32xbf16, #tpu.memory_space<vmem>>
      %36 = arith.index_cast %33 : i32 to index
      %c0_39 = arith.constant 0 : index
      %c0_40 = arith.constant 0 : index
      %37 = vector.load %35[%36, %c0_39, %c0_40] : memref<30x30x32xbf16, #tpu.memory_space<vmem>>, vector<1x28x32xbf16>
      %38 = vector.shape_cast %37 : vector<1x28x32xbf16> to vector<28x32xbf16>
      %c1_41 = arith.constant 1 : index
      %c0_42 = arith.constant 0 : index
      %c0_43 = arith.constant 0 : index
      %c0_44 = arith.constant 0 : index
      %39 = vector.load %arg2[%c1_41, %c0_42, %c0_43, %c0_44] : memref<3x3x32x32xbf16, #tpu.memory_space<vmem>>, vector<1x1x32x32xbf16>
      %40 = vector.shape_cast %39 : vector<1x1x32x32xbf16> to vector<32x32xbf16>
      %cst_45 = arith.constant dense<0.000000e+00> : vector<28x32xf32>
      %41 = tpu.matmul %38, %40, %cst_45 {dimension_numbers = #tpu.dot_dimension_numbers<[1], [0], [0], [1], [0, 0, 1, 1], [], []>} : vector<28x32xbf16>, vector<32x32xbf16>, vector<28x32xf32> -> vector<28x32xf32>
      %42 = arith.addf %32, %41 : vector<28x32xf32>
      %c1_i32_46 = arith.constant 1 : i32
      %43 = arith.addi %arg5, %c1_i32_46 : i32
      %c0_i32_47 = arith.constant 0 : i32
      %c0_i32_48 = arith.constant 0 : i32
      %c0_i32_49 = arith.constant 0 : i32
      %44 = tpu.memref_slice %arg1[%c0_i32, %c0_i32_47, %c0_i32_48, %c0_i32_49] : memref<1x30x30x32xbf16, #tpu.memory_space<vmem>> -> memref<1x30x30x32xbf16, #tpu.memory_space<vmem>>
      %45 = tpu.memref_squeeze %44 : memref<1x30x30x32xbf16, #tpu.memory_space<vmem>> -> memref<30x30x32xbf16, #tpu.memory_space<vmem>>
      %46 = arith.index_cast %43 : i32 to index
      %c1_50 = arith.constant 1 : index
      %c0_51 = arith.constant 0 : index
      %47 = vector.load %45[%46, %c1_50, %c0_51] : memref<30x30x32xbf16, #tpu.memory_space<vmem>>, vector<1x28x32xbf16>
      %48 = vector.shape_cast %47 : vector<1x28x32xbf16> to vector<28x32xbf16>
      %c1_52 = arith.constant 1 : index
      %c1_53 = arith.constant 1 : index
      %c0_54 = arith.constant 0 : index
      %c0_55 = arith.constant 0 : index
      %49 = vector.load %arg2[%c1_52, %c1_53, %c0_54, %c0_55] : memref<3x3x32x32xbf16, #tpu.memory_space<vmem>>, vector<1x1x32x32xbf16>
      %50 = vector.shape_cast %49 : vector<1x1x32x32xbf16> to vector<32x32xbf16>
      %cst_56 = arith.constant dense<0.000000e+00> : vector<28x32xf32>
      %51 = tpu.matmul %48, %50, %cst_56 {dimension_numbers = #tpu.dot_dimension_numbers<[1], [0], [0], [1], [0, 0, 1, 1], [], []>} : vector<28x32xbf16>, vector<32x32xbf16>, vector<28x32xf32> -> vector<28x32xf32>
      %52 = arith.addf %42, %51 : vector<28x32xf32>
      %c1_i32_57 = arith.constant 1 : i32
      %53 = arith.addi %arg5, %c1_i32_57 : i32
      %c0_i32_58 = arith.constant 0 : i32
      %c0_i32_59 = arith.constant 0 : i32
      %c0_i32_60 = arith.constant 0 : i32
      %54 = tpu.memref_slice %arg1[%c0_i32, %c0_i32_58, %c0_i32_59, %c0_i32_60] : memref<1x30x30x32xbf16, #tpu.memory_space<vmem>> -> memref<1x30x30x32xbf16, #tpu.memory_space<vmem>>
      %55 = tpu.memref_squeeze %54 : memref<1x30x30x32xbf16, #tpu.memory_space<vmem>> -> memref<30x30x32xbf16, #tpu.memory_space<vmem>>
      %56 = arith.index_cast %53 : i32 to index
      %c2_61 = arith.constant 2 : index
      %c0_62 = arith.constant 0 : index
      %57 = vector.load %55[%56, %c2_61, %c0_62] : memref<30x30x32xbf16, #tpu.memory_space<vmem>>, vector<1x28x32xbf16>
      %58 = vector.shape_cast %57 : vector<1x28x32xbf16> to vector<28x32xbf16>
      %c1_63 = arith.constant 1 : index
      %c2_64 = arith.constant 2 : index
      %c0_65 = arith.constant 0 : index
      %c0_66 = arith.constant 0 : index
      %59 = vector.load %arg2[%c1_63, %c2_64, %c0_65, %c0_66] : memref<3x3x32x32xbf16, #tpu.memory_space<vmem>>, vector<1x1x32x32xbf16>
      %60 = vector.shape_cast %59 : vector<1x1x32x32xbf16> to vector<32x32xbf16>
      %cst_67 = arith.constant dense<0.000000e+00> : vector<28x32xf32>
      %61 = tpu.matmul %58, %60, %cst_67 {dimension_numbers = #tpu.dot_dimension_numbers<[1], [0], [0], [1], [0, 0, 1, 1], [], []>} : vector<28x32xbf16>, vector<32x32xbf16>, vector<28x32xf32> -> vector<28x32xf32>
      %62 = arith.addf %52, %61 : vector<28x32xf32>
      %c2_i32 = arith.constant 2 : i32
      %63 = arith.addi %arg5, %c2_i32 : i32
      %c0_i32_68 = arith.constant 0 : i32
      %c0_i32_69 = arith.constant 0 : i32
      %c0_i32_70 = arith.constant 0 : i32
      %64 = tpu.memref_slice %arg1[%c0_i32, %c0_i32_68, %c0_i32_69, %c0_i32_70] : memref<1x30x30x32xbf16, #tpu.memory_space<vmem>> -> memref<1x30x30x32xbf16, #tpu.memory_space<vmem>>
      %65 = tpu.memref_squeeze %64 : memref<1x30x30x32xbf16, #tpu.memory_space<vmem>> -> memref<30x30x32xbf16, #tpu.memory_space<vmem>>
      %66 = arith.index_cast %63 : i32 to index
      %c0_71 = arith.constant 0 : index
      %c0_72 = arith.constant 0 : index
      %67 = vector.load %65[%66, %c0_71, %c0_72] : memref<30x30x32xbf16, #tpu.memory_space<vmem>>, vector<1x28x32xbf16>
      %68 = vector.shape_cast %67 : vector<1x28x32xbf16> to vector<28x32xbf16>
      %c2_73 = arith.constant 2 : index
      %c0_74 = arith.constant 0 : index
      %c0_75 = arith.constant 0 : index
      %c0_76 = arith.constant 0 : index
      %69 = vector.load %arg2[%c2_73, %c0_74, %c0_75, %c0_76] : memref<3x3x32x32xbf16, #tpu.memory_space<vmem>>, vector<1x1x32x32xbf16>
      %70 = vector.shape_cast %69 : vector<1x1x32x32xbf16> to vector<32x32xbf16>
      %cst_77 = arith.constant dense<0.000000e+00> : vector<28x32xf32>
      %71 = tpu.matmul %68, %70, %cst_77 {dimension_numbers = #tpu.dot_dimension_numbers<[1], [0], [0], [1], [0, 0, 1, 1], [], []>} : vector<28x32xbf16>, vector<32x32xbf16>, vector<28x32xf32> -> vector<28x32xf32>
      %72 = arith.addf %62, %71 : vector<28x32xf32>
      %c2_i32_78 = arith.constant 2 : i32
      %73 = arith.addi %arg5, %c2_i32_78 : i32
      %c0_i32_79 = arith.constant 0 : i32
      %c0_i32_80 = arith.constant 0 : i32
      %c0_i32_81 = arith.constant 0 : i32
      %74 = tpu.memref_slice %arg1[%c0_i32, %c0_i32_79, %c0_i32_80, %c0_i32_81] : memref<1x30x30x32xbf16, #tpu.memory_space<vmem>> -> memref<1x30x30x32xbf16, #tpu.memory_space<vmem>>
      %75 = tpu.memref_squeeze %74 : memref<1x30x30x32xbf16, #tpu.memory_space<vmem>> -> memref<30x30x32xbf16, #tpu.memory_space<vmem>>
      %76 = arith.index_cast %73 : i32 to index
      %c1_82 = arith.constant 1 : index
      %c0_83 = arith.constant 0 : index
      %77 = vector.load %75[%76, %c1_82, %c0_83] : memref<30x30x32xbf16, #tpu.memory_space<vmem>>, vector<1x28x32xbf16>
      %78 = vector.shape_cast %77 : vector<1x28x32xbf16> to vector<28x32xbf16>
      %c2_84 = arith.constant 2 : index
      %c1_85 = arith.constant 1 : index
      %c0_86 = arith.constant 0 : index
      %c0_87 = arith.constant 0 : index
      %79 = vector.load %arg2[%c2_84, %c1_85, %c0_86, %c0_87] : memref<3x3x32x32xbf16, #tpu.memory_space<vmem>>, vector<1x1x32x32xbf16>
      %80 = vector.shape_cast %79 : vector<1x1x32x32xbf16> to vector<32x32xbf16>
      %cst_88 = arith.constant dense<0.000000e+00> : vector<28x32xf32>
      %81 = tpu.matmul %78, %80, %cst_88 {dimension_numbers = #tpu.dot_dimension_numbers<[1], [0], [0], [1], [0, 0, 1, 1], [], []>} : vector<28x32xbf16>, vector<32x32xbf16>, vector<28x32xf32> -> vector<28x32xf32>
      %82 = arith.addf %72, %81 : vector<28x32xf32>
      %c2_i32_89 = arith.constant 2 : i32
      %83 = arith.addi %arg5, %c2_i32_89 : i32
      %c0_i32_90 = arith.constant 0 : i32
      %c0_i32_91 = arith.constant 0 : i32
      %c0_i32_92 = arith.constant 0 : i32
      %84 = tpu.memref_slice %arg1[%c0_i32, %c0_i32_90, %c0_i32_91, %c0_i32_92] : memref<1x30x30x32xbf16, #tpu.memory_space<vmem>> -> memref<1x30x30x32xbf16, #tpu.memory_space<vmem>>
      %85 = tpu.memref_squeeze %84 : memref<1x30x30x32xbf16, #tpu.memory_space<vmem>> -> memref<30x30x32xbf16, #tpu.memory_space<vmem>>
      %86 = arith.index_cast %83 : i32 to index
      %c2_93 = arith.constant 2 : index
      %c0_94 = arith.constant 0 : index
      %87 = vector.load %85[%86, %c2_93, %c0_94] : memref<30x30x32xbf16, #tpu.memory_space<vmem>>, vector<1x28x32xbf16>
      %88 = vector.shape_cast %87 : vector<1x28x32xbf16> to vector<28x32xbf16>
      %c2_95 = arith.constant 2 : index
      %c2_96 = arith.constant 2 : index
      %c0_97 = arith.constant 0 : index
      %c0_98 = arith.constant 0 : index
      %89 = vector.load %arg2[%c2_95, %c2_96, %c0_97, %c0_98] : memref<3x3x32x32xbf16, #tpu.memory_space<vmem>>, vector<1x1x32x32xbf16>
      %90 = vector.shape_cast %89 : vector<1x1x32x32xbf16> to vector<32x32xbf16>
      %cst_99 = arith.constant dense<0.000000e+00> : vector<28x32xf32>
      %91 = tpu.matmul %88, %90, %cst_99 {dimension_numbers = #tpu.dot_dimension_numbers<[1], [0], [0], [1], [0, 0, 1, 1], [], []>} : vector<28x32xbf16>, vector<32x32xbf16>, vector<28x32xf32> -> vector<28x32xf32>
      %92 = arith.addf %82, %91 : vector<28x32xf32>
      %93 = vector.broadcast %0 : vector<1x32xf32> to vector<28x32xf32>
      %94 = arith.addf %92, %93 : vector<28x32xf32>
      %cst_100 = arith.constant 0.000000e+00 : f32
      %95 = vector.broadcast %cst_100 : f32 to vector<28x32xf32>
      %96 = arith.maximumf %94, %95 : vector<28x32xf32>
      %97 = arith.truncf %96 : vector<28x32xf32> to vector<28x32xbf16>
      %c0_i32_101 = arith.constant 0 : i32
      %c0_i32_102 = arith.constant 0 : i32
      %c0_i32_103 = arith.constant 0 : i32
      %98 = tpu.memref_slice %arg4[%c0_i32_1, %c0_i32_101, %c0_i32_102, %c0_i32_103] : memref<1x28x28x32xbf16, #tpu.memory_space<vmem>> -> memref<1x28x28x32xbf16, #tpu.memory_space<vmem>>
      %99 = tpu.memref_squeeze %98 : memref<1x28x28x32xbf16, #tpu.memory_space<vmem>> -> memref<28x28x32xbf16, #tpu.memory_space<vmem>>
      %100 = arith.index_cast %arg5 : i32 to index
      %c0_104 = arith.constant 0 : index
      %c0_105 = arith.constant 0 : index
      %101 = vector.load %99[%100, %c0_104, %c0_105] : memref<28x28x32xbf16, #tpu.memory_space<vmem>>, vector<1x28x32xbf16>
      %102 = vector.shape_cast %101 : vector<1x28x32xbf16> to vector<28x32xbf16>
      %103 = vector.shape_cast %97 : vector<28x32xbf16> to vector<1x28x32xbf16>
      tpu.vector_store %99[%100, %c0_104, %c0_105], %103 {strides = array<i32>} : memref<28x28x32xbf16, #tpu.memory_space<vmem>>, vector<1x28x32xbf16>,
    }
    %c28_i32_3 = arith.constant 28 : i32
    return
  }
  func.func @transform_0(%arg0: i32) -> (i32, i32, i32, i32) {
    %c0_i32 = arith.constant 0 : i32
    %c0_i32_0 = arith.constant 0 : i32
    %c0_i32_1 = arith.constant 0 : i32
    %c0_i32_2 = arith.constant 0 : i32
    return %arg0, %c0_i32, %c0_i32_0, %c0_i32_1 : i32, i32, i32, i32
  }
  func.func @transform_1(%arg0: i32) -> (i32, i32, i32, i32) {
    %c0_i32 = arith.constant 0 : i32
    %c0_i32_0 = arith.constant 0 : i32
    %c0_i32_1 = arith.constant 0 : i32
    %c0_i32_2 = arith.constant 0 : i32
    %c0_i32_3 = arith.constant 0 : i32
    return %c0_i32, %c0_i32_0, %c0_i32_1, %c0_i32_2 : i32, i32, i32, i32
  }
  func.func @transform_2(%arg0: i32) -> (i32, i32) {
    %c0_i32 = arith.constant 0 : i32
    %c0_i32_0 = arith.constant 0 : i32
    %c0_i32_1 = arith.constant 0 : i32
    return %c0_i32, %c0_i32_0 : i32, i32
  }
  func.func @transform_3(%arg0: i32) -> (i32, i32, i32, i32) {
    %c0_i32 = arith.constant 0 : i32
    %c0_i32_0 = arith.constant 0 : i32
    %c0_i32_1 = arith.constant 0 : i32
    %c0_i32_2 = arith.constant 0 : i32
    return %arg0, %c0_i32, %c0_i32_0, %c0_i32_1 : i32, i32, i32, i32
  }
}

module attributes {stable_mosaic.version = 11 : i64} {
  func.func @_maxpool2x2_kernel(%arg0: i32, %arg1: memref<1x14x2x14x64xbf16, #tpu.memory_space<vmem>>, %arg2: memref<1x14x14x32xbf16, #tpu.memory_space<vmem>>) attributes {dimension_semantics = [#tpu.dimension_semantics<parallel>], iteration_bounds = array<i64: 2>, scalar_prefetch = 0 : i64, scratch_operands = 0 : i64, tpu.core_type = #tpu.core_type<tc>, window_params = [{transform_indices = @transform_0, window_bounds = array<i64: 1, 14, 2, 14, 64>}, {transform_indices = @transform_1, window_bounds = array<i64: 1, 14, 14, 32>}]} {
    %c0 = arith.constant 0 : index
    %c0_0 = arith.constant 0 : index
    %c0_1 = arith.constant 0 : index
    %c0_2 = arith.constant 0 : index
    %c0_3 = arith.constant 0 : index
    %0 = vector.load %arg1[%c0, %c0_0, %c0_1, %c0_2, %c0_3] : memref<1x14x2x14x64xbf16, #tpu.memory_space<vmem>>, vector<1x14x1x14x64xbf16>
    %1 = vector.shape_cast %0 : vector<1x14x1x14x64xbf16> to vector<14x14x64xbf16>
    %c0_4 = arith.constant 0 : index
    %c0_5 = arith.constant 0 : index
    %c1 = arith.constant 1 : index
    %c0_6 = arith.constant 0 : index
    %c0_7 = arith.constant 0 : index
    %2 = vector.load %arg1[%c0_4, %c0_5, %c1, %c0_6, %c0_7] : memref<1x14x2x14x64xbf16, #tpu.memory_space<vmem>>, vector<1x14x1x14x64xbf16>
    %3 = vector.shape_cast %2 : vector<1x14x1x14x64xbf16> to vector<14x14x64xbf16>
    %4 = arith.maximumf %1, %3 : vector<14x14x64xbf16>
    %5 = vector.extract_strided_slice %4 {offsets = [0, 0, 0], sizes = [14, 14, 32], strides = [1, 1, 1]} : vector<14x14x64xbf16> to vector<14x14x32xbf16>
    %6 = vector.extract_strided_slice %4 {offsets = [0, 0, 32], sizes = [14, 14, 32], strides = [1, 1, 1]} : vector<14x14x64xbf16> to vector<14x14x32xbf16>
    %7 = arith.maximumf %5, %6 : vector<14x14x32xbf16>
    %c0_8 = arith.constant 0 : index
    %c0_9 = arith.constant 0 : index
    %c0_10 = arith.constant 0 : index
    %c0_11 = arith.constant 0 : index
    %8 = vector.load %arg2[%c0_8, %c0_9, %c0_10, %c0_11] : memref<1x14x14x32xbf16, #tpu.memory_space<vmem>>, vector<1x14x14x32xbf16>
    %9 = vector.shape_cast %8 : vector<1x14x14x32xbf16> to vector<14x14x32xbf16>
    %10 = vector.shape_cast %7 : vector<14x14x32xbf16> to vector<1x14x14x32xbf16>
    tpu.vector_store %arg2[%c0_8, %c0_9, %c0_10, %c0_11], %10 {strides = array<i32>} : memref<1x14x14x32xbf16, #tpu.memory_space<vmem>>, vector<1x14x14x32xbf16>,
    return
  }
  func.func @transform_0(%arg0: i32) -> (i32, i32, i32, i32, i32) {
    %c0_i32 = arith.constant 0 : i32
    %c0_i32_0 = arith.constant 0 : i32
    %c0_i32_1 = arith.constant 0 : i32
    %c0_i32_2 = arith.constant 0 : i32
    %c0_i32_3 = arith.constant 0 : i32
    return %arg0, %c0_i32, %c0_i32_0, %c0_i32_1, %c0_i32_2 : i32, i32, i32, i32, i32
  }
  func.func @transform_1(%arg0: i32) -> (i32, i32, i32, i32) {
    %c0_i32 = arith.constant 0 : i32
    %c0_i32_0 = arith.constant 0 : i32
    %c0_i32_1 = arith.constant 0 : i32
    %c0_i32_2 = arith.constant 0 : i32
    return %arg0, %c0_i32, %c0_i32_0, %c0_i32_1 : i32, i32, i32, i32
  }
}

module attributes {stable_mosaic.version = 11 : i64} {
  func.func @_conv3x3_relu_kernel(%arg0: i32, %arg1: memref<1x14x14x32xbf16, #tpu.memory_space<vmem>>, %arg2: memref<3x3x32x64xbf16, #tpu.memory_space<vmem>>, %arg3: memref<1x64xf32, #tpu.memory_space<vmem>>, %arg4: memref<1x12x12x64xbf16, #tpu.memory_space<vmem>>) attributes {dimension_semantics = [#tpu.dimension_semantics<parallel>], iteration_bounds = array<i64: 2>, scalar_prefetch = 0 : i64, scratch_operands = 0 : i64, tpu.core_type = #tpu.core_type<tc>, window_params = [{transform_indices = @transform_0, window_bounds = array<i64: 1, 14, 14, 32>}, {pipeline_mode = #tpu.pipeline_mode<synchronous>, transform_indices = @transform_1, window_bounds = array<i64: 3, 3, 32, 64>}, {pipeline_mode = #tpu.pipeline_mode<synchronous>, transform_indices = @transform_2, window_bounds = array<i64: 1, 64>}, {transform_indices = @transform_3, window_bounds = array<i64: 1, 12, 12, 64>}]} {
    %c0 = arith.constant 0 : index
    %c0_0 = arith.constant 0 : index
    %0 = vector.load %arg3[%c0, %c0_0] : memref<1x64xf32, #tpu.memory_space<vmem>>, vector<1x64xf32>
    %c0_i32 = arith.constant 0 : i32
    %c0_i32_1 = arith.constant 0 : i32
    %c0_i32_2 = arith.constant 0 : i32
    %c12_i32 = arith.constant 12 : i32
    %1 = arith.addi %c0_i32_2, %c12_i32 : i32
    %c1_i32 = arith.constant 1 : i32
    scf.for %arg5 = %c0_i32_2 to %1 step %c1_i32  : i32 {
      %cst = arith.constant 0.000000e+00 : f32
      %2 = vector.broadcast %cst : f32 to vector<12x64xf32>
      %c0_i32_4 = arith.constant 0 : i32
      %3 = arith.addi %arg5, %c0_i32_4 : i32
      %c0_i32_5 = arith.constant 0 : i32
      %c0_i32_6 = arith.constant 0 : i32
      %c0_i32_7 = arith.constant 0 : i32
      %4 = tpu.memref_slice %arg1[%c0_i32, %c0_i32_5, %c0_i32_6, %c0_i32_7] : memref<1x14x14x32xbf16, #tpu.memory_space<vmem>> -> memref<1x14x14x32xbf16, #tpu.memory_space<vmem>>
      %5 = tpu.memref_squeeze %4 : memref<1x14x14x32xbf16, #tpu.memory_space<vmem>> -> memref<14x14x32xbf16, #tpu.memory_space<vmem>>
      %6 = arith.index_cast %3 : i32 to index
      %c0_8 = arith.constant 0 : index
      %c0_9 = arith.constant 0 : index
      %7 = vector.load %5[%6, %c0_8, %c0_9] : memref<14x14x32xbf16, #tpu.memory_space<vmem>>, vector<1x12x32xbf16>
      %8 = vector.shape_cast %7 : vector<1x12x32xbf16> to vector<12x32xbf16>
      %c0_10 = arith.constant 0 : index
      %c0_11 = arith.constant 0 : index
      %c0_12 = arith.constant 0 : index
      %c0_13 = arith.constant 0 : index
      %9 = vector.load %arg2[%c0_10, %c0_11, %c0_12, %c0_13] : memref<3x3x32x64xbf16, #tpu.memory_space<vmem>>, vector<1x1x32x64xbf16>
      %10 = vector.shape_cast %9 : vector<1x1x32x64xbf16> to vector<32x64xbf16>
      %cst_14 = arith.constant dense<0.000000e+00> : vector<12x64xf32>
      %11 = tpu.matmul %8, %10, %cst_14 {dimension_numbers = #tpu.dot_dimension_numbers<[1], [0], [0], [1], [0, 0, 1, 1], [], []>} : vector<12x32xbf16>, vector<32x64xbf16>, vector<12x64xf32> -> vector<12x64xf32>
      %12 = arith.addf %2, %11 : vector<12x64xf32>
      %c0_i32_15 = arith.constant 0 : i32
      %13 = arith.addi %arg5, %c0_i32_15 : i32
      %c0_i32_16 = arith.constant 0 : i32
      %c0_i32_17 = arith.constant 0 : i32
      %c0_i32_18 = arith.constant 0 : i32
      %14 = tpu.memref_slice %arg1[%c0_i32, %c0_i32_16, %c0_i32_17, %c0_i32_18] : memref<1x14x14x32xbf16, #tpu.memory_space<vmem>> -> memref<1x14x14x32xbf16, #tpu.memory_space<vmem>>
      %15 = tpu.memref_squeeze %14 : memref<1x14x14x32xbf16, #tpu.memory_space<vmem>> -> memref<14x14x32xbf16, #tpu.memory_space<vmem>>
      %16 = arith.index_cast %13 : i32 to index
      %c1 = arith.constant 1 : index
      %c0_19 = arith.constant 0 : index
      %17 = vector.load %15[%16, %c1, %c0_19] : memref<14x14x32xbf16, #tpu.memory_space<vmem>>, vector<1x12x32xbf16>
      %18 = vector.shape_cast %17 : vector<1x12x32xbf16> to vector<12x32xbf16>
      %c0_20 = arith.constant 0 : index
      %c1_21 = arith.constant 1 : index
      %c0_22 = arith.constant 0 : index
      %c0_23 = arith.constant 0 : index
      %19 = vector.load %arg2[%c0_20, %c1_21, %c0_22, %c0_23] : memref<3x3x32x64xbf16, #tpu.memory_space<vmem>>, vector<1x1x32x64xbf16>
      %20 = vector.shape_cast %19 : vector<1x1x32x64xbf16> to vector<32x64xbf16>
      %cst_24 = arith.constant dense<0.000000e+00> : vector<12x64xf32>
      %21 = tpu.matmul %18, %20, %cst_24 {dimension_numbers = #tpu.dot_dimension_numbers<[1], [0], [0], [1], [0, 0, 1, 1], [], []>} : vector<12x32xbf16>, vector<32x64xbf16>, vector<12x64xf32> -> vector<12x64xf32>
      %22 = arith.addf %12, %21 : vector<12x64xf32>
      %c0_i32_25 = arith.constant 0 : i32
      %23 = arith.addi %arg5, %c0_i32_25 : i32
      %c0_i32_26 = arith.constant 0 : i32
      %c0_i32_27 = arith.constant 0 : i32
      %c0_i32_28 = arith.constant 0 : i32
      %24 = tpu.memref_slice %arg1[%c0_i32, %c0_i32_26, %c0_i32_27, %c0_i32_28] : memref<1x14x14x32xbf16, #tpu.memory_space<vmem>> -> memref<1x14x14x32xbf16, #tpu.memory_space<vmem>>
      %25 = tpu.memref_squeeze %24 : memref<1x14x14x32xbf16, #tpu.memory_space<vmem>> -> memref<14x14x32xbf16, #tpu.memory_space<vmem>>
      %26 = arith.index_cast %23 : i32 to index
      %c2 = arith.constant 2 : index
      %c0_29 = arith.constant 0 : index
      %27 = vector.load %25[%26, %c2, %c0_29] : memref<14x14x32xbf16, #tpu.memory_space<vmem>>, vector<1x12x32xbf16>
      %28 = vector.shape_cast %27 : vector<1x12x32xbf16> to vector<12x32xbf16>
      %c0_30 = arith.constant 0 : index
      %c2_31 = arith.constant 2 : index
      %c0_32 = arith.constant 0 : index
      %c0_33 = arith.constant 0 : index
      %29 = vector.load %arg2[%c0_30, %c2_31, %c0_32, %c0_33] : memref<3x3x32x64xbf16, #tpu.memory_space<vmem>>, vector<1x1x32x64xbf16>
      %30 = vector.shape_cast %29 : vector<1x1x32x64xbf16> to vector<32x64xbf16>
      %cst_34 = arith.constant dense<0.000000e+00> : vector<12x64xf32>
      %31 = tpu.matmul %28, %30, %cst_34 {dimension_numbers = #tpu.dot_dimension_numbers<[1], [0], [0], [1], [0, 0, 1, 1], [], []>} : vector<12x32xbf16>, vector<32x64xbf16>, vector<12x64xf32> -> vector<12x64xf32>
      %32 = arith.addf %22, %31 : vector<12x64xf32>
      %c1_i32_35 = arith.constant 1 : i32
      %33 = arith.addi %arg5, %c1_i32_35 : i32
      %c0_i32_36 = arith.constant 0 : i32
      %c0_i32_37 = arith.constant 0 : i32
      %c0_i32_38 = arith.constant 0 : i32
      %34 = tpu.memref_slice %arg1[%c0_i32, %c0_i32_36, %c0_i32_37, %c0_i32_38] : memref<1x14x14x32xbf16, #tpu.memory_space<vmem>> -> memref<1x14x14x32xbf16, #tpu.memory_space<vmem>>
      %35 = tpu.memref_squeeze %34 : memref<1x14x14x32xbf16, #tpu.memory_space<vmem>> -> memref<14x14x32xbf16, #tpu.memory_space<vmem>>
      %36 = arith.index_cast %33 : i32 to index
      %c0_39 = arith.constant 0 : index
      %c0_40 = arith.constant 0 : index
      %37 = vector.load %35[%36, %c0_39, %c0_40] : memref<14x14x32xbf16, #tpu.memory_space<vmem>>, vector<1x12x32xbf16>
      %38 = vector.shape_cast %37 : vector<1x12x32xbf16> to vector<12x32xbf16>
      %c1_41 = arith.constant 1 : index
      %c0_42 = arith.constant 0 : index
      %c0_43 = arith.constant 0 : index
      %c0_44 = arith.constant 0 : index
      %39 = vector.load %arg2[%c1_41, %c0_42, %c0_43, %c0_44] : memref<3x3x32x64xbf16, #tpu.memory_space<vmem>>, vector<1x1x32x64xbf16>
      %40 = vector.shape_cast %39 : vector<1x1x32x64xbf16> to vector<32x64xbf16>
      %cst_45 = arith.constant dense<0.000000e+00> : vector<12x64xf32>
      %41 = tpu.matmul %38, %40, %cst_45 {dimension_numbers = #tpu.dot_dimension_numbers<[1], [0], [0], [1], [0, 0, 1, 1], [], []>} : vector<12x32xbf16>, vector<32x64xbf16>, vector<12x64xf32> -> vector<12x64xf32>
      %42 = arith.addf %32, %41 : vector<12x64xf32>
      %c1_i32_46 = arith.constant 1 : i32
      %43 = arith.addi %arg5, %c1_i32_46 : i32
      %c0_i32_47 = arith.constant 0 : i32
      %c0_i32_48 = arith.constant 0 : i32
      %c0_i32_49 = arith.constant 0 : i32
      %44 = tpu.memref_slice %arg1[%c0_i32, %c0_i32_47, %c0_i32_48, %c0_i32_49] : memref<1x14x14x32xbf16, #tpu.memory_space<vmem>> -> memref<1x14x14x32xbf16, #tpu.memory_space<vmem>>
      %45 = tpu.memref_squeeze %44 : memref<1x14x14x32xbf16, #tpu.memory_space<vmem>> -> memref<14x14x32xbf16, #tpu.memory_space<vmem>>
      %46 = arith.index_cast %43 : i32 to index
      %c1_50 = arith.constant 1 : index
      %c0_51 = arith.constant 0 : index
      %47 = vector.load %45[%46, %c1_50, %c0_51] : memref<14x14x32xbf16, #tpu.memory_space<vmem>>, vector<1x12x32xbf16>
      %48 = vector.shape_cast %47 : vector<1x12x32xbf16> to vector<12x32xbf16>
      %c1_52 = arith.constant 1 : index
      %c1_53 = arith.constant 1 : index
      %c0_54 = arith.constant 0 : index
      %c0_55 = arith.constant 0 : index
      %49 = vector.load %arg2[%c1_52, %c1_53, %c0_54, %c0_55] : memref<3x3x32x64xbf16, #tpu.memory_space<vmem>>, vector<1x1x32x64xbf16>
      %50 = vector.shape_cast %49 : vector<1x1x32x64xbf16> to vector<32x64xbf16>
      %cst_56 = arith.constant dense<0.000000e+00> : vector<12x64xf32>
      %51 = tpu.matmul %48, %50, %cst_56 {dimension_numbers = #tpu.dot_dimension_numbers<[1], [0], [0], [1], [0, 0, 1, 1], [], []>} : vector<12x32xbf16>, vector<32x64xbf16>, vector<12x64xf32> -> vector<12x64xf32>
      %52 = arith.addf %42, %51 : vector<12x64xf32>
      %c1_i32_57 = arith.constant 1 : i32
      %53 = arith.addi %arg5, %c1_i32_57 : i32
      %c0_i32_58 = arith.constant 0 : i32
      %c0_i32_59 = arith.constant 0 : i32
      %c0_i32_60 = arith.constant 0 : i32
      %54 = tpu.memref_slice %arg1[%c0_i32, %c0_i32_58, %c0_i32_59, %c0_i32_60] : memref<1x14x14x32xbf16, #tpu.memory_space<vmem>> -> memref<1x14x14x32xbf16, #tpu.memory_space<vmem>>
      %55 = tpu.memref_squeeze %54 : memref<1x14x14x32xbf16, #tpu.memory_space<vmem>> -> memref<14x14x32xbf16, #tpu.memory_space<vmem>>
      %56 = arith.index_cast %53 : i32 to index
      %c2_61 = arith.constant 2 : index
      %c0_62 = arith.constant 0 : index
      %57 = vector.load %55[%56, %c2_61, %c0_62] : memref<14x14x32xbf16, #tpu.memory_space<vmem>>, vector<1x12x32xbf16>
      %58 = vector.shape_cast %57 : vector<1x12x32xbf16> to vector<12x32xbf16>
      %c1_63 = arith.constant 1 : index
      %c2_64 = arith.constant 2 : index
      %c0_65 = arith.constant 0 : index
      %c0_66 = arith.constant 0 : index
      %59 = vector.load %arg2[%c1_63, %c2_64, %c0_65, %c0_66] : memref<3x3x32x64xbf16, #tpu.memory_space<vmem>>, vector<1x1x32x64xbf16>
      %60 = vector.shape_cast %59 : vector<1x1x32x64xbf16> to vector<32x64xbf16>
      %cst_67 = arith.constant dense<0.000000e+00> : vector<12x64xf32>
      %61 = tpu.matmul %58, %60, %cst_67 {dimension_numbers = #tpu.dot_dimension_numbers<[1], [0], [0], [1], [0, 0, 1, 1], [], []>} : vector<12x32xbf16>, vector<32x64xbf16>, vector<12x64xf32> -> vector<12x64xf32>
      %62 = arith.addf %52, %61 : vector<12x64xf32>
      %c2_i32 = arith.constant 2 : i32
      %63 = arith.addi %arg5, %c2_i32 : i32
      %c0_i32_68 = arith.constant 0 : i32
      %c0_i32_69 = arith.constant 0 : i32
      %c0_i32_70 = arith.constant 0 : i32
      %64 = tpu.memref_slice %arg1[%c0_i32, %c0_i32_68, %c0_i32_69, %c0_i32_70] : memref<1x14x14x32xbf16, #tpu.memory_space<vmem>> -> memref<1x14x14x32xbf16, #tpu.memory_space<vmem>>
      %65 = tpu.memref_squeeze %64 : memref<1x14x14x32xbf16, #tpu.memory_space<vmem>> -> memref<14x14x32xbf16, #tpu.memory_space<vmem>>
      %66 = arith.index_cast %63 : i32 to index
      %c0_71 = arith.constant 0 : index
      %c0_72 = arith.constant 0 : index
      %67 = vector.load %65[%66, %c0_71, %c0_72] : memref<14x14x32xbf16, #tpu.memory_space<vmem>>, vector<1x12x32xbf16>
      %68 = vector.shape_cast %67 : vector<1x12x32xbf16> to vector<12x32xbf16>
      %c2_73 = arith.constant 2 : index
      %c0_74 = arith.constant 0 : index
      %c0_75 = arith.constant 0 : index
      %c0_76 = arith.constant 0 : index
      %69 = vector.load %arg2[%c2_73, %c0_74, %c0_75, %c0_76] : memref<3x3x32x64xbf16, #tpu.memory_space<vmem>>, vector<1x1x32x64xbf16>
      %70 = vector.shape_cast %69 : vector<1x1x32x64xbf16> to vector<32x64xbf16>
      %cst_77 = arith.constant dense<0.000000e+00> : vector<12x64xf32>
      %71 = tpu.matmul %68, %70, %cst_77 {dimension_numbers = #tpu.dot_dimension_numbers<[1], [0], [0], [1], [0, 0, 1, 1], [], []>} : vector<12x32xbf16>, vector<32x64xbf16>, vector<12x64xf32> -> vector<12x64xf32>
      %72 = arith.addf %62, %71 : vector<12x64xf32>
      %c2_i32_78 = arith.constant 2 : i32
      %73 = arith.addi %arg5, %c2_i32_78 : i32
      %c0_i32_79 = arith.constant 0 : i32
      %c0_i32_80 = arith.constant 0 : i32
      %c0_i32_81 = arith.constant 0 : i32
      %74 = tpu.memref_slice %arg1[%c0_i32, %c0_i32_79, %c0_i32_80, %c0_i32_81] : memref<1x14x14x32xbf16, #tpu.memory_space<vmem>> -> memref<1x14x14x32xbf16, #tpu.memory_space<vmem>>
      %75 = tpu.memref_squeeze %74 : memref<1x14x14x32xbf16, #tpu.memory_space<vmem>> -> memref<14x14x32xbf16, #tpu.memory_space<vmem>>
      %76 = arith.index_cast %73 : i32 to index
      %c1_82 = arith.constant 1 : index
      %c0_83 = arith.constant 0 : index
      %77 = vector.load %75[%76, %c1_82, %c0_83] : memref<14x14x32xbf16, #tpu.memory_space<vmem>>, vector<1x12x32xbf16>
      %78 = vector.shape_cast %77 : vector<1x12x32xbf16> to vector<12x32xbf16>
      %c2_84 = arith.constant 2 : index
      %c1_85 = arith.constant 1 : index
      %c0_86 = arith.constant 0 : index
      %c0_87 = arith.constant 0 : index
      %79 = vector.load %arg2[%c2_84, %c1_85, %c0_86, %c0_87] : memref<3x3x32x64xbf16, #tpu.memory_space<vmem>>, vector<1x1x32x64xbf16>
      %80 = vector.shape_cast %79 : vector<1x1x32x64xbf16> to vector<32x64xbf16>
      %cst_88 = arith.constant dense<0.000000e+00> : vector<12x64xf32>
      %81 = tpu.matmul %78, %80, %cst_88 {dimension_numbers = #tpu.dot_dimension_numbers<[1], [0], [0], [1], [0, 0, 1, 1], [], []>} : vector<12x32xbf16>, vector<32x64xbf16>, vector<12x64xf32> -> vector<12x64xf32>
      %82 = arith.addf %72, %81 : vector<12x64xf32>
      %c2_i32_89 = arith.constant 2 : i32
      %83 = arith.addi %arg5, %c2_i32_89 : i32
      %c0_i32_90 = arith.constant 0 : i32
      %c0_i32_91 = arith.constant 0 : i32
      %c0_i32_92 = arith.constant 0 : i32
      %84 = tpu.memref_slice %arg1[%c0_i32, %c0_i32_90, %c0_i32_91, %c0_i32_92] : memref<1x14x14x32xbf16, #tpu.memory_space<vmem>> -> memref<1x14x14x32xbf16, #tpu.memory_space<vmem>>
      %85 = tpu.memref_squeeze %84 : memref<1x14x14x32xbf16, #tpu.memory_space<vmem>> -> memref<14x14x32xbf16, #tpu.memory_space<vmem>>
      %86 = arith.index_cast %83 : i32 to index
      %c2_93 = arith.constant 2 : index
      %c0_94 = arith.constant 0 : index
      %87 = vector.load %85[%86, %c2_93, %c0_94] : memref<14x14x32xbf16, #tpu.memory_space<vmem>>, vector<1x12x32xbf16>
      %88 = vector.shape_cast %87 : vector<1x12x32xbf16> to vector<12x32xbf16>
      %c2_95 = arith.constant 2 : index
      %c2_96 = arith.constant 2 : index
      %c0_97 = arith.constant 0 : index
      %c0_98 = arith.constant 0 : index
      %89 = vector.load %arg2[%c2_95, %c2_96, %c0_97, %c0_98] : memref<3x3x32x64xbf16, #tpu.memory_space<vmem>>, vector<1x1x32x64xbf16>
      %90 = vector.shape_cast %89 : vector<1x1x32x64xbf16> to vector<32x64xbf16>
      %cst_99 = arith.constant dense<0.000000e+00> : vector<12x64xf32>
      %91 = tpu.matmul %88, %90, %cst_99 {dimension_numbers = #tpu.dot_dimension_numbers<[1], [0], [0], [1], [0, 0, 1, 1], [], []>} : vector<12x32xbf16>, vector<32x64xbf16>, vector<12x64xf32> -> vector<12x64xf32>
      %92 = arith.addf %82, %91 : vector<12x64xf32>
      %93 = vector.broadcast %0 : vector<1x64xf32> to vector<12x64xf32>
      %94 = arith.addf %92, %93 : vector<12x64xf32>
      %cst_100 = arith.constant 0.000000e+00 : f32
      %95 = vector.broadcast %cst_100 : f32 to vector<12x64xf32>
      %96 = arith.maximumf %94, %95 : vector<12x64xf32>
      %97 = arith.truncf %96 : vector<12x64xf32> to vector<12x64xbf16>
      %c0_i32_101 = arith.constant 0 : i32
      %c0_i32_102 = arith.constant 0 : i32
      %c0_i32_103 = arith.constant 0 : i32
      %98 = tpu.memref_slice %arg4[%c0_i32_1, %c0_i32_101, %c0_i32_102, %c0_i32_103] : memref<1x12x12x64xbf16, #tpu.memory_space<vmem>> -> memref<1x12x12x64xbf16, #tpu.memory_space<vmem>>
      %99 = tpu.memref_squeeze %98 : memref<1x12x12x64xbf16, #tpu.memory_space<vmem>> -> memref<12x12x64xbf16, #tpu.memory_space<vmem>>
      %100 = arith.index_cast %arg5 : i32 to index
      %c0_104 = arith.constant 0 : index
      %c0_105 = arith.constant 0 : index
      %101 = vector.load %99[%100, %c0_104, %c0_105] : memref<12x12x64xbf16, #tpu.memory_space<vmem>>, vector<1x12x64xbf16>
      %102 = vector.shape_cast %101 : vector<1x12x64xbf16> to vector<12x64xbf16>
      %103 = vector.shape_cast %97 : vector<12x64xbf16> to vector<1x12x64xbf16>
      tpu.vector_store %99[%100, %c0_104, %c0_105], %103 {strides = array<i32>} : memref<12x12x64xbf16, #tpu.memory_space<vmem>>, vector<1x12x64xbf16>,
    }
    %c12_i32_3 = arith.constant 12 : i32
    return
  }
  func.func @transform_0(%arg0: i32) -> (i32, i32, i32, i32) {
    %c0_i32 = arith.constant 0 : i32
    %c0_i32_0 = arith.constant 0 : i32
    %c0_i32_1 = arith.constant 0 : i32
    %c0_i32_2 = arith.constant 0 : i32
    return %arg0, %c0_i32, %c0_i32_0, %c0_i32_1 : i32, i32, i32, i32
  }
  func.func @transform_1(%arg0: i32) -> (i32, i32, i32, i32) {
    %c0_i32 = arith.constant 0 : i32
    %c0_i32_0 = arith.constant 0 : i32
    %c0_i32_1 = arith.constant 0 : i32
    %c0_i32_2 = arith.constant 0 : i32
    %c0_i32_3 = arith.constant 0 : i32
    return %c0_i32, %c0_i32_0, %c0_i32_1, %c0_i32_2 : i32, i32, i32, i32
  }
  func.func @transform_2(%arg0: i32) -> (i32, i32) {
    %c0_i32 = arith.constant 0 : i32
    %c0_i32_0 = arith.constant 0 : i32
    %c0_i32_1 = arith.constant 0 : i32
    return %c0_i32, %c0_i32_0 : i32, i32
  }
  func.func @transform_3(%arg0: i32) -> (i32, i32, i32, i32) {
    %c0_i32 = arith.constant 0 : i32
    %c0_i32_0 = arith.constant 0 : i32
    %c0_i32_1 = arith.constant 0 : i32
    %c0_i32_2 = arith.constant 0 : i32
    return %arg0, %c0_i32, %c0_i32_0, %c0_i32_1 : i32, i32, i32, i32
  }
}

module attributes {stable_mosaic.version = 11 : i64} {
  func.func @_conv3x3_relu_kernel(%arg0: i32, %arg1: memref<1x12x12x64xbf16, #tpu.memory_space<vmem>>, %arg2: memref<3x3x64x64xbf16, #tpu.memory_space<vmem>>, %arg3: memref<1x64xf32, #tpu.memory_space<vmem>>, %arg4: memref<1x10x10x64xbf16, #tpu.memory_space<vmem>>) attributes {dimension_semantics = [#tpu.dimension_semantics<parallel>], iteration_bounds = array<i64: 2>, scalar_prefetch = 0 : i64, scratch_operands = 0 : i64, tpu.core_type = #tpu.core_type<tc>, window_params = [{transform_indices = @transform_0, window_bounds = array<i64: 1, 12, 12, 64>}, {pipeline_mode = #tpu.pipeline_mode<synchronous>, transform_indices = @transform_1, window_bounds = array<i64: 3, 3, 64, 64>}, {pipeline_mode = #tpu.pipeline_mode<synchronous>, transform_indices = @transform_2, window_bounds = array<i64: 1, 64>}, {transform_indices = @transform_3, window_bounds = array<i64: 1, 10, 10, 64>}]} {
    %c0 = arith.constant 0 : index
    %c0_0 = arith.constant 0 : index
    %0 = vector.load %arg3[%c0, %c0_0] : memref<1x64xf32, #tpu.memory_space<vmem>>, vector<1x64xf32>
    %c0_i32 = arith.constant 0 : i32
    %c0_i32_1 = arith.constant 0 : i32
    %c0_i32_2 = arith.constant 0 : i32
    %c10_i32 = arith.constant 10 : i32
    %1 = arith.addi %c0_i32_2, %c10_i32 : i32
    %c1_i32 = arith.constant 1 : i32
    scf.for %arg5 = %c0_i32_2 to %1 step %c1_i32  : i32 {
      %cst = arith.constant 0.000000e+00 : f32
      %2 = vector.broadcast %cst : f32 to vector<10x64xf32>
      %c0_i32_4 = arith.constant 0 : i32
      %3 = arith.addi %arg5, %c0_i32_4 : i32
      %c0_i32_5 = arith.constant 0 : i32
      %c0_i32_6 = arith.constant 0 : i32
      %c0_i32_7 = arith.constant 0 : i32
      %4 = tpu.memref_slice %arg1[%c0_i32, %c0_i32_5, %c0_i32_6, %c0_i32_7] : memref<1x12x12x64xbf16, #tpu.memory_space<vmem>> -> memref<1x12x12x64xbf16, #tpu.memory_space<vmem>>
      %5 = tpu.memref_squeeze %4 : memref<1x12x12x64xbf16, #tpu.memory_space<vmem>> -> memref<12x12x64xbf16, #tpu.memory_space<vmem>>
      %6 = arith.index_cast %3 : i32 to index
      %c0_8 = arith.constant 0 : index
      %c0_9 = arith.constant 0 : index
      %7 = vector.load %5[%6, %c0_8, %c0_9] : memref<12x12x64xbf16, #tpu.memory_space<vmem>>, vector<1x10x64xbf16>
      %8 = vector.shape_cast %7 : vector<1x10x64xbf16> to vector<10x64xbf16>
      %c0_10 = arith.constant 0 : index
      %c0_11 = arith.constant 0 : index
      %c0_12 = arith.constant 0 : index
      %c0_13 = arith.constant 0 : index
      %9 = vector.load %arg2[%c0_10, %c0_11, %c0_12, %c0_13] : memref<3x3x64x64xbf16, #tpu.memory_space<vmem>>, vector<1x1x64x64xbf16>
      %10 = vector.shape_cast %9 : vector<1x1x64x64xbf16> to vector<64x64xbf16>
      %cst_14 = arith.constant dense<0.000000e+00> : vector<10x64xf32>
      %11 = tpu.matmul %8, %10, %cst_14 {dimension_numbers = #tpu.dot_dimension_numbers<[1], [0], [0], [1], [0, 0, 1, 1], [], []>} : vector<10x64xbf16>, vector<64x64xbf16>, vector<10x64xf32> -> vector<10x64xf32>
      %12 = arith.addf %2, %11 : vector<10x64xf32>
      %c0_i32_15 = arith.constant 0 : i32
      %13 = arith.addi %arg5, %c0_i32_15 : i32
      %c0_i32_16 = arith.constant 0 : i32
      %c0_i32_17 = arith.constant 0 : i32
      %c0_i32_18 = arith.constant 0 : i32
      %14 = tpu.memref_slice %arg1[%c0_i32, %c0_i32_16, %c0_i32_17, %c0_i32_18] : memref<1x12x12x64xbf16, #tpu.memory_space<vmem>> -> memref<1x12x12x64xbf16, #tpu.memory_space<vmem>>
      %15 = tpu.memref_squeeze %14 : memref<1x12x12x64xbf16, #tpu.memory_space<vmem>> -> memref<12x12x64xbf16, #tpu.memory_space<vmem>>
      %16 = arith.index_cast %13 : i32 to index
      %c1 = arith.constant 1 : index
      %c0_19 = arith.constant 0 : index
      %17 = vector.load %15[%16, %c1, %c0_19] : memref<12x12x64xbf16, #tpu.memory_space<vmem>>, vector<1x10x64xbf16>
      %18 = vector.shape_cast %17 : vector<1x10x64xbf16> to vector<10x64xbf16>
      %c0_20 = arith.constant 0 : index
      %c1_21 = arith.constant 1 : index
      %c0_22 = arith.constant 0 : index
      %c0_23 = arith.constant 0 : index
      %19 = vector.load %arg2[%c0_20, %c1_21, %c0_22, %c0_23] : memref<3x3x64x64xbf16, #tpu.memory_space<vmem>>, vector<1x1x64x64xbf16>
      %20 = vector.shape_cast %19 : vector<1x1x64x64xbf16> to vector<64x64xbf16>
      %cst_24 = arith.constant dense<0.000000e+00> : vector<10x64xf32>
      %21 = tpu.matmul %18, %20, %cst_24 {dimension_numbers = #tpu.dot_dimension_numbers<[1], [0], [0], [1], [0, 0, 1, 1], [], []>} : vector<10x64xbf16>, vector<64x64xbf16>, vector<10x64xf32> -> vector<10x64xf32>
      %22 = arith.addf %12, %21 : vector<10x64xf32>
      %c0_i32_25 = arith.constant 0 : i32
      %23 = arith.addi %arg5, %c0_i32_25 : i32
      %c0_i32_26 = arith.constant 0 : i32
      %c0_i32_27 = arith.constant 0 : i32
      %c0_i32_28 = arith.constant 0 : i32
      %24 = tpu.memref_slice %arg1[%c0_i32, %c0_i32_26, %c0_i32_27, %c0_i32_28] : memref<1x12x12x64xbf16, #tpu.memory_space<vmem>> -> memref<1x12x12x64xbf16, #tpu.memory_space<vmem>>
      %25 = tpu.memref_squeeze %24 : memref<1x12x12x64xbf16, #tpu.memory_space<vmem>> -> memref<12x12x64xbf16, #tpu.memory_space<vmem>>
      %26 = arith.index_cast %23 : i32 to index
      %c2 = arith.constant 2 : index
      %c0_29 = arith.constant 0 : index
      %27 = vector.load %25[%26, %c2, %c0_29] : memref<12x12x64xbf16, #tpu.memory_space<vmem>>, vector<1x10x64xbf16>
      %28 = vector.shape_cast %27 : vector<1x10x64xbf16> to vector<10x64xbf16>
      %c0_30 = arith.constant 0 : index
      %c2_31 = arith.constant 2 : index
      %c0_32 = arith.constant 0 : index
      %c0_33 = arith.constant 0 : index
      %29 = vector.load %arg2[%c0_30, %c2_31, %c0_32, %c0_33] : memref<3x3x64x64xbf16, #tpu.memory_space<vmem>>, vector<1x1x64x64xbf16>
      %30 = vector.shape_cast %29 : vector<1x1x64x64xbf16> to vector<64x64xbf16>
      %cst_34 = arith.constant dense<0.000000e+00> : vector<10x64xf32>
      %31 = tpu.matmul %28, %30, %cst_34 {dimension_numbers = #tpu.dot_dimension_numbers<[1], [0], [0], [1], [0, 0, 1, 1], [], []>} : vector<10x64xbf16>, vector<64x64xbf16>, vector<10x64xf32> -> vector<10x64xf32>
      %32 = arith.addf %22, %31 : vector<10x64xf32>
      %c1_i32_35 = arith.constant 1 : i32
      %33 = arith.addi %arg5, %c1_i32_35 : i32
      %c0_i32_36 = arith.constant 0 : i32
      %c0_i32_37 = arith.constant 0 : i32
      %c0_i32_38 = arith.constant 0 : i32
      %34 = tpu.memref_slice %arg1[%c0_i32, %c0_i32_36, %c0_i32_37, %c0_i32_38] : memref<1x12x12x64xbf16, #tpu.memory_space<vmem>> -> memref<1x12x12x64xbf16, #tpu.memory_space<vmem>>
      %35 = tpu.memref_squeeze %34 : memref<1x12x12x64xbf16, #tpu.memory_space<vmem>> -> memref<12x12x64xbf16, #tpu.memory_space<vmem>>
      %36 = arith.index_cast %33 : i32 to index
      %c0_39 = arith.constant 0 : index
      %c0_40 = arith.constant 0 : index
      %37 = vector.load %35[%36, %c0_39, %c0_40] : memref<12x12x64xbf16, #tpu.memory_space<vmem>>, vector<1x10x64xbf16>
      %38 = vector.shape_cast %37 : vector<1x10x64xbf16> to vector<10x64xbf16>
      %c1_41 = arith.constant 1 : index
      %c0_42 = arith.constant 0 : index
      %c0_43 = arith.constant 0 : index
      %c0_44 = arith.constant 0 : index
      %39 = vector.load %arg2[%c1_41, %c0_42, %c0_43, %c0_44] : memref<3x3x64x64xbf16, #tpu.memory_space<vmem>>, vector<1x1x64x64xbf16>
      %40 = vector.shape_cast %39 : vector<1x1x64x64xbf16> to vector<64x64xbf16>
      %cst_45 = arith.constant dense<0.000000e+00> : vector<10x64xf32>
      %41 = tpu.matmul %38, %40, %cst_45 {dimension_numbers = #tpu.dot_dimension_numbers<[1], [0], [0], [1], [0, 0, 1, 1], [], []>} : vector<10x64xbf16>, vector<64x64xbf16>, vector<10x64xf32> -> vector<10x64xf32>
      %42 = arith.addf %32, %41 : vector<10x64xf32>
      %c1_i32_46 = arith.constant 1 : i32
      %43 = arith.addi %arg5, %c1_i32_46 : i32
      %c0_i32_47 = arith.constant 0 : i32
      %c0_i32_48 = arith.constant 0 : i32
      %c0_i32_49 = arith.constant 0 : i32
      %44 = tpu.memref_slice %arg1[%c0_i32, %c0_i32_47, %c0_i32_48, %c0_i32_49] : memref<1x12x12x64xbf16, #tpu.memory_space<vmem>> -> memref<1x12x12x64xbf16, #tpu.memory_space<vmem>>
      %45 = tpu.memref_squeeze %44 : memref<1x12x12x64xbf16, #tpu.memory_space<vmem>> -> memref<12x12x64xbf16, #tpu.memory_space<vmem>>
      %46 = arith.index_cast %43 : i32 to index
      %c1_50 = arith.constant 1 : index
      %c0_51 = arith.constant 0 : index
      %47 = vector.load %45[%46, %c1_50, %c0_51] : memref<12x12x64xbf16, #tpu.memory_space<vmem>>, vector<1x10x64xbf16>
      %48 = vector.shape_cast %47 : vector<1x10x64xbf16> to vector<10x64xbf16>
      %c1_52 = arith.constant 1 : index
      %c1_53 = arith.constant 1 : index
      %c0_54 = arith.constant 0 : index
      %c0_55 = arith.constant 0 : index
      %49 = vector.load %arg2[%c1_52, %c1_53, %c0_54, %c0_55] : memref<3x3x64x64xbf16, #tpu.memory_space<vmem>>, vector<1x1x64x64xbf16>
      %50 = vector.shape_cast %49 : vector<1x1x64x64xbf16> to vector<64x64xbf16>
      %cst_56 = arith.constant dense<0.000000e+00> : vector<10x64xf32>
      %51 = tpu.matmul %48, %50, %cst_56 {dimension_numbers = #tpu.dot_dimension_numbers<[1], [0], [0], [1], [0, 0, 1, 1], [], []>} : vector<10x64xbf16>, vector<64x64xbf16>, vector<10x64xf32> -> vector<10x64xf32>
      %52 = arith.addf %42, %51 : vector<10x64xf32>
      %c1_i32_57 = arith.constant 1 : i32
      %53 = arith.addi %arg5, %c1_i32_57 : i32
      %c0_i32_58 = arith.constant 0 : i32
      %c0_i32_59 = arith.constant 0 : i32
      %c0_i32_60 = arith.constant 0 : i32
      %54 = tpu.memref_slice %arg1[%c0_i32, %c0_i32_58, %c0_i32_59, %c0_i32_60] : memref<1x12x12x64xbf16, #tpu.memory_space<vmem>> -> memref<1x12x12x64xbf16, #tpu.memory_space<vmem>>
      %55 = tpu.memref_squeeze %54 : memref<1x12x12x64xbf16, #tpu.memory_space<vmem>> -> memref<12x12x64xbf16, #tpu.memory_space<vmem>>
      %56 = arith.index_cast %53 : i32 to index
      %c2_61 = arith.constant 2 : index
      %c0_62 = arith.constant 0 : index
      %57 = vector.load %55[%56, %c2_61, %c0_62] : memref<12x12x64xbf16, #tpu.memory_space<vmem>>, vector<1x10x64xbf16>
      %58 = vector.shape_cast %57 : vector<1x10x64xbf16> to vector<10x64xbf16>
      %c1_63 = arith.constant 1 : index
      %c2_64 = arith.constant 2 : index
      %c0_65 = arith.constant 0 : index
      %c0_66 = arith.constant 0 : index
      %59 = vector.load %arg2[%c1_63, %c2_64, %c0_65, %c0_66] : memref<3x3x64x64xbf16, #tpu.memory_space<vmem>>, vector<1x1x64x64xbf16>
      %60 = vector.shape_cast %59 : vector<1x1x64x64xbf16> to vector<64x64xbf16>
      %cst_67 = arith.constant dense<0.000000e+00> : vector<10x64xf32>
      %61 = tpu.matmul %58, %60, %cst_67 {dimension_numbers = #tpu.dot_dimension_numbers<[1], [0], [0], [1], [0, 0, 1, 1], [], []>} : vector<10x64xbf16>, vector<64x64xbf16>, vector<10x64xf32> -> vector<10x64xf32>
      %62 = arith.addf %52, %61 : vector<10x64xf32>
      %c2_i32 = arith.constant 2 : i32
      %63 = arith.addi %arg5, %c2_i32 : i32
      %c0_i32_68 = arith.constant 0 : i32
      %c0_i32_69 = arith.constant 0 : i32
      %c0_i32_70 = arith.constant 0 : i32
      %64 = tpu.memref_slice %arg1[%c0_i32, %c0_i32_68, %c0_i32_69, %c0_i32_70] : memref<1x12x12x64xbf16, #tpu.memory_space<vmem>> -> memref<1x12x12x64xbf16, #tpu.memory_space<vmem>>
      %65 = tpu.memref_squeeze %64 : memref<1x12x12x64xbf16, #tpu.memory_space<vmem>> -> memref<12x12x64xbf16, #tpu.memory_space<vmem>>
      %66 = arith.index_cast %63 : i32 to index
      %c0_71 = arith.constant 0 : index
      %c0_72 = arith.constant 0 : index
      %67 = vector.load %65[%66, %c0_71, %c0_72] : memref<12x12x64xbf16, #tpu.memory_space<vmem>>, vector<1x10x64xbf16>
      %68 = vector.shape_cast %67 : vector<1x10x64xbf16> to vector<10x64xbf16>
      %c2_73 = arith.constant 2 : index
      %c0_74 = arith.constant 0 : index
      %c0_75 = arith.constant 0 : index
      %c0_76 = arith.constant 0 : index
      %69 = vector.load %arg2[%c2_73, %c0_74, %c0_75, %c0_76] : memref<3x3x64x64xbf16, #tpu.memory_space<vmem>>, vector<1x1x64x64xbf16>
      %70 = vector.shape_cast %69 : vector<1x1x64x64xbf16> to vector<64x64xbf16>
      %cst_77 = arith.constant dense<0.000000e+00> : vector<10x64xf32>
      %71 = tpu.matmul %68, %70, %cst_77 {dimension_numbers = #tpu.dot_dimension_numbers<[1], [0], [0], [1], [0, 0, 1, 1], [], []>} : vector<10x64xbf16>, vector<64x64xbf16>, vector<10x64xf32> -> vector<10x64xf32>
      %72 = arith.addf %62, %71 : vector<10x64xf32>
      %c2_i32_78 = arith.constant 2 : i32
      %73 = arith.addi %arg5, %c2_i32_78 : i32
      %c0_i32_79 = arith.constant 0 : i32
      %c0_i32_80 = arith.constant 0 : i32
      %c0_i32_81 = arith.constant 0 : i32
      %74 = tpu.memref_slice %arg1[%c0_i32, %c0_i32_79, %c0_i32_80, %c0_i32_81] : memref<1x12x12x64xbf16, #tpu.memory_space<vmem>> -> memref<1x12x12x64xbf16, #tpu.memory_space<vmem>>
      %75 = tpu.memref_squeeze %74 : memref<1x12x12x64xbf16, #tpu.memory_space<vmem>> -> memref<12x12x64xbf16, #tpu.memory_space<vmem>>
      %76 = arith.index_cast %73 : i32 to index
      %c1_82 = arith.constant 1 : index
      %c0_83 = arith.constant 0 : index
      %77 = vector.load %75[%76, %c1_82, %c0_83] : memref<12x12x64xbf16, #tpu.memory_space<vmem>>, vector<1x10x64xbf16>
      %78 = vector.shape_cast %77 : vector<1x10x64xbf16> to vector<10x64xbf16>
      %c2_84 = arith.constant 2 : index
      %c1_85 = arith.constant 1 : index
      %c0_86 = arith.constant 0 : index
      %c0_87 = arith.constant 0 : index
      %79 = vector.load %arg2[%c2_84, %c1_85, %c0_86, %c0_87] : memref<3x3x64x64xbf16, #tpu.memory_space<vmem>>, vector<1x1x64x64xbf16>
      %80 = vector.shape_cast %79 : vector<1x1x64x64xbf16> to vector<64x64xbf16>
      %cst_88 = arith.constant dense<0.000000e+00> : vector<10x64xf32>
      %81 = tpu.matmul %78, %80, %cst_88 {dimension_numbers = #tpu.dot_dimension_numbers<[1], [0], [0], [1], [0, 0, 1, 1], [], []>} : vector<10x64xbf16>, vector<64x64xbf16>, vector<10x64xf32> -> vector<10x64xf32>
      %82 = arith.addf %72, %81 : vector<10x64xf32>
      %c2_i32_89 = arith.constant 2 : i32
      %83 = arith.addi %arg5, %c2_i32_89 : i32
      %c0_i32_90 = arith.constant 0 : i32
      %c0_i32_91 = arith.constant 0 : i32
      %c0_i32_92 = arith.constant 0 : i32
      %84 = tpu.memref_slice %arg1[%c0_i32, %c0_i32_90, %c0_i32_91, %c0_i32_92] : memref<1x12x12x64xbf16, #tpu.memory_space<vmem>> -> memref<1x12x12x64xbf16, #tpu.memory_space<vmem>>
      %85 = tpu.memref_squeeze %84 : memref<1x12x12x64xbf16, #tpu.memory_space<vmem>> -> memref<12x12x64xbf16, #tpu.memory_space<vmem>>
      %86 = arith.index_cast %83 : i32 to index
      %c2_93 = arith.constant 2 : index
      %c0_94 = arith.constant 0 : index
      %87 = vector.load %85[%86, %c2_93, %c0_94] : memref<12x12x64xbf16, #tpu.memory_space<vmem>>, vector<1x10x64xbf16>
      %88 = vector.shape_cast %87 : vector<1x10x64xbf16> to vector<10x64xbf16>
      %c2_95 = arith.constant 2 : index
      %c2_96 = arith.constant 2 : index
      %c0_97 = arith.constant 0 : index
      %c0_98 = arith.constant 0 : index
      %89 = vector.load %arg2[%c2_95, %c2_96, %c0_97, %c0_98] : memref<3x3x64x64xbf16, #tpu.memory_space<vmem>>, vector<1x1x64x64xbf16>
      %90 = vector.shape_cast %89 : vector<1x1x64x64xbf16> to vector<64x64xbf16>
      %cst_99 = arith.constant dense<0.000000e+00> : vector<10x64xf32>
      %91 = tpu.matmul %88, %90, %cst_99 {dimension_numbers = #tpu.dot_dimension_numbers<[1], [0], [0], [1], [0, 0, 1, 1], [], []>} : vector<10x64xbf16>, vector<64x64xbf16>, vector<10x64xf32> -> vector<10x64xf32>
      %92 = arith.addf %82, %91 : vector<10x64xf32>
      %93 = vector.broadcast %0 : vector<1x64xf32> to vector<10x64xf32>
      %94 = arith.addf %92, %93 : vector<10x64xf32>
      %cst_100 = arith.constant 0.000000e+00 : f32
      %95 = vector.broadcast %cst_100 : f32 to vector<10x64xf32>
      %96 = arith.maximumf %94, %95 : vector<10x64xf32>
      %97 = arith.truncf %96 : vector<10x64xf32> to vector<10x64xbf16>
      %c0_i32_101 = arith.constant 0 : i32
      %c0_i32_102 = arith.constant 0 : i32
      %c0_i32_103 = arith.constant 0 : i32
      %98 = tpu.memref_slice %arg4[%c0_i32_1, %c0_i32_101, %c0_i32_102, %c0_i32_103] : memref<1x10x10x64xbf16, #tpu.memory_space<vmem>> -> memref<1x10x10x64xbf16, #tpu.memory_space<vmem>>
      %99 = tpu.memref_squeeze %98 : memref<1x10x10x64xbf16, #tpu.memory_space<vmem>> -> memref<10x10x64xbf16, #tpu.memory_space<vmem>>
      %100 = arith.index_cast %arg5 : i32 to index
      %c0_104 = arith.constant 0 : index
      %c0_105 = arith.constant 0 : index
      %101 = vector.load %99[%100, %c0_104, %c0_105] : memref<10x10x64xbf16, #tpu.memory_space<vmem>>, vector<1x10x64xbf16>
      %102 = vector.shape_cast %101 : vector<1x10x64xbf16> to vector<10x64xbf16>
      %103 = vector.shape_cast %97 : vector<10x64xbf16> to vector<1x10x64xbf16>
      tpu.vector_store %99[%100, %c0_104, %c0_105], %103 {strides = array<i32>} : memref<10x10x64xbf16, #tpu.memory_space<vmem>>, vector<1x10x64xbf16>,
    }
    %c10_i32_3 = arith.constant 10 : i32
    return
  }
  func.func @transform_0(%arg0: i32) -> (i32, i32, i32, i32) {
    %c0_i32 = arith.constant 0 : i32
    %c0_i32_0 = arith.constant 0 : i32
    %c0_i32_1 = arith.constant 0 : i32
    %c0_i32_2 = arith.constant 0 : i32
    return %arg0, %c0_i32, %c0_i32_0, %c0_i32_1 : i32, i32, i32, i32
  }
  func.func @transform_1(%arg0: i32) -> (i32, i32, i32, i32) {
    %c0_i32 = arith.constant 0 : i32
    %c0_i32_0 = arith.constant 0 : i32
    %c0_i32_1 = arith.constant 0 : i32
    %c0_i32_2 = arith.constant 0 : i32
    %c0_i32_3 = arith.constant 0 : i32
    return %c0_i32, %c0_i32_0, %c0_i32_1, %c0_i32_2 : i32, i32, i32, i32
  }
  func.func @transform_2(%arg0: i32) -> (i32, i32) {
    %c0_i32 = arith.constant 0 : i32
    %c0_i32_0 = arith.constant 0 : i32
    %c0_i32_1 = arith.constant 0 : i32
    return %c0_i32, %c0_i32_0 : i32, i32
  }
  func.func @transform_3(%arg0: i32) -> (i32, i32, i32, i32) {
    %c0_i32 = arith.constant 0 : i32
    %c0_i32_0 = arith.constant 0 : i32
    %c0_i32_1 = arith.constant 0 : i32
    %c0_i32_2 = arith.constant 0 : i32
    return %arg0, %c0_i32, %c0_i32_0, %c0_i32_1 : i32, i32, i32, i32
  }
}

module attributes {stable_mosaic.version = 11 : i64} {
  func.func @_maxpool2x2_kernel(%arg0: i32, %arg1: memref<1x5x2x5x128xbf16, #tpu.memory_space<vmem>>, %arg2: memref<1x5x5x64xbf16, #tpu.memory_space<vmem>>) attributes {dimension_semantics = [#tpu.dimension_semantics<parallel>], iteration_bounds = array<i64: 2>, scalar_prefetch = 0 : i64, scratch_operands = 0 : i64, tpu.core_type = #tpu.core_type<tc>, window_params = [{transform_indices = @transform_0, window_bounds = array<i64: 1, 5, 2, 5, 128>}, {transform_indices = @transform_1, window_bounds = array<i64: 1, 5, 5, 64>}]} {
    %c0 = arith.constant 0 : index
    %c0_0 = arith.constant 0 : index
    %c0_1 = arith.constant 0 : index
    %c0_2 = arith.constant 0 : index
    %c0_3 = arith.constant 0 : index
    %0 = vector.load %arg1[%c0, %c0_0, %c0_1, %c0_2, %c0_3] : memref<1x5x2x5x128xbf16, #tpu.memory_space<vmem>>, vector<1x5x1x5x128xbf16>
    %1 = vector.shape_cast %0 : vector<1x5x1x5x128xbf16> to vector<5x5x128xbf16>
    %c0_4 = arith.constant 0 : index
    %c0_5 = arith.constant 0 : index
    %c1 = arith.constant 1 : index
    %c0_6 = arith.constant 0 : index
    %c0_7 = arith.constant 0 : index
    %2 = vector.load %arg1[%c0_4, %c0_5, %c1, %c0_6, %c0_7] : memref<1x5x2x5x128xbf16, #tpu.memory_space<vmem>>, vector<1x5x1x5x128xbf16>
    %3 = vector.shape_cast %2 : vector<1x5x1x5x128xbf16> to vector<5x5x128xbf16>
    %4 = arith.maximumf %1, %3 : vector<5x5x128xbf16>
    %5 = vector.extract_strided_slice %4 {offsets = [0, 0, 0], sizes = [5, 5, 64], strides = [1, 1, 1]} : vector<5x5x128xbf16> to vector<5x5x64xbf16>
    %6 = vector.extract_strided_slice %4 {offsets = [0, 0, 64], sizes = [5, 5, 64], strides = [1, 1, 1]} : vector<5x5x128xbf16> to vector<5x5x64xbf16>
    %7 = arith.maximumf %5, %6 : vector<5x5x64xbf16>
    %c0_8 = arith.constant 0 : index
    %c0_9 = arith.constant 0 : index
    %c0_10 = arith.constant 0 : index
    %c0_11 = arith.constant 0 : index
    %8 = vector.load %arg2[%c0_8, %c0_9, %c0_10, %c0_11] : memref<1x5x5x64xbf16, #tpu.memory_space<vmem>>, vector<1x5x5x64xbf16>
    %9 = vector.shape_cast %8 : vector<1x5x5x64xbf16> to vector<5x5x64xbf16>
    %10 = vector.shape_cast %7 : vector<5x5x64xbf16> to vector<1x5x5x64xbf16>
    tpu.vector_store %arg2[%c0_8, %c0_9, %c0_10, %c0_11], %10 {strides = array<i32>} : memref<1x5x5x64xbf16, #tpu.memory_space<vmem>>, vector<1x5x5x64xbf16>,
    return
  }
  func.func @transform_0(%arg0: i32) -> (i32, i32, i32, i32, i32) {
    %c0_i32 = arith.constant 0 : i32
    %c0_i32_0 = arith.constant 0 : i32
    %c0_i32_1 = arith.constant 0 : i32
    %c0_i32_2 = arith.constant 0 : i32
    %c0_i32_3 = arith.constant 0 : i32
    return %arg0, %c0_i32, %c0_i32_0, %c0_i32_1, %c0_i32_2 : i32, i32, i32, i32, i32
  }
  func.func @transform_1(%arg0: i32) -> (i32, i32, i32, i32) {
    %c0_i32 = arith.constant 0 : i32
    %c0_i32_0 = arith.constant 0 : i32
    %c0_i32_1 = arith.constant 0 : i32
    %c0_i32_2 = arith.constant 0 : i32
    return %arg0, %c0_i32, %c0_i32_0, %c0_i32_1 : i32, i32, i32, i32
  }
}

module attributes {stable_mosaic.version = 11 : i64} {
  func.func @_fc_head_kernel(%arg0: i32, %arg1: memref<2x1600xbf16, #tpu.memory_space<vmem>>, %arg2: memref<1600x512xbf16, #tpu.memory_space<vmem>>, %arg3: memref<1x512xf32, #tpu.memory_space<vmem>>, %arg4: memref<512x10xbf16, #tpu.memory_space<vmem>>, %arg5: memref<1x10xf32, #tpu.memory_space<vmem>>, %arg6: memref<2x10xf32, #tpu.memory_space<vmem>>) attributes {dimension_semantics = [#tpu.dimension_semantics<parallel>], iteration_bounds = array<i64: 1>, scalar_prefetch = 0 : i64, scratch_operands = 0 : i64, tpu.core_type = #tpu.core_type<tc>, window_params = [{transform_indices = @transform_0, window_bounds = array<i64: 2, 1600>}, {pipeline_mode = #tpu.pipeline_mode<synchronous>, transform_indices = @transform_1, window_bounds = array<i64: 1600, 512>}, {pipeline_mode = #tpu.pipeline_mode<synchronous>, transform_indices = @transform_2, window_bounds = array<i64: 1, 512>}, {pipeline_mode = #tpu.pipeline_mode<synchronous>, transform_indices = @transform_3, window_bounds = array<i64: 512, 10>}, {pipeline_mode = #tpu.pipeline_mode<synchronous>, transform_indices = @transform_4, window_bounds = array<i64: 1, 10>}, {transform_indices = @transform_5, window_bounds = array<i64: 2, 10>}]} {
    %c0 = arith.constant 0 : index
    %c0_0 = arith.constant 0 : index
    %0 = vector.load %arg1[%c0, %c0_0] : memref<2x1600xbf16, #tpu.memory_space<vmem>>, vector<2x1600xbf16>
    %c0_1 = arith.constant 0 : index
    %c0_2 = arith.constant 0 : index
    %1 = vector.load %arg2[%c0_1, %c0_2] : memref<1600x512xbf16, #tpu.memory_space<vmem>>, vector<1600x512xbf16>
    %cst = arith.constant dense<0.000000e+00> : vector<2x512xf32>
    %2 = tpu.matmul %0, %1, %cst {dimension_numbers = #tpu.dot_dimension_numbers<[1], [0], [0], [1], [0, 0, 1, 1], [], []>} : vector<2x1600xbf16>, vector<1600x512xbf16>, vector<2x512xf32> -> vector<2x512xf32>
    %c0_3 = arith.constant 0 : index
    %c0_4 = arith.constant 0 : index
    %3 = vector.load %arg3[%c0_3, %c0_4] : memref<1x512xf32, #tpu.memory_space<vmem>>, vector<1x512xf32>
    %4 = vector.broadcast %3 : vector<1x512xf32> to vector<2x512xf32>
    %5 = arith.addf %2, %4 : vector<2x512xf32>
    %cst_5 = arith.constant 0.000000e+00 : f32
    %6 = vector.broadcast %cst_5 : f32 to vector<2x512xf32>
    %7 = arith.maximumf %5, %6 : vector<2x512xf32>
    %8 = arith.truncf %7 : vector<2x512xf32> to vector<2x512xbf16>
    %c0_6 = arith.constant 0 : index
    %c0_7 = arith.constant 0 : index
    %9 = vector.load %arg4[%c0_6, %c0_7] : memref<512x10xbf16, #tpu.memory_space<vmem>>, vector<512x10xbf16>
    %cst_8 = arith.constant dense<0.000000e+00> : vector<2x10xf32>
    %10 = tpu.matmul %8, %9, %cst_8 {dimension_numbers = #tpu.dot_dimension_numbers<[1], [0], [0], [1], [0, 0, 1, 1], [], []>} : vector<2x512xbf16>, vector<512x10xbf16>, vector<2x10xf32> -> vector<2x10xf32>
    %c0_9 = arith.constant 0 : index
    %c0_10 = arith.constant 0 : index
    %11 = vector.load %arg5[%c0_9, %c0_10] : memref<1x10xf32, #tpu.memory_space<vmem>>, vector<1x10xf32>
    %12 = vector.broadcast %11 : vector<1x10xf32> to vector<2x10xf32>
    %13 = arith.addf %10, %12 : vector<2x10xf32>
    %c0_11 = arith.constant 0 : index
    %c0_12 = arith.constant 0 : index
    %14 = vector.load %arg6[%c0_11, %c0_12] : memref<2x10xf32, #tpu.memory_space<vmem>>, vector<2x10xf32>
    tpu.vector_store %arg6[%c0_11, %c0_12], %13 {strides = array<i32>} : memref<2x10xf32, #tpu.memory_space<vmem>>, vector<2x10xf32>,
    return
  }
  func.func @transform_0(%arg0: i32) -> (i32, i32) {
    %c0_i32 = arith.constant 0 : i32
    %c0_i32_0 = arith.constant 0 : i32
    return %arg0, %c0_i32 : i32, i32
  }
  func.func @transform_1(%arg0: i32) -> (i32, i32) {
    %c0_i32 = arith.constant 0 : i32
    %c0_i32_0 = arith.constant 0 : i32
    %c0_i32_1 = arith.constant 0 : i32
    return %c0_i32, %c0_i32_0 : i32, i32
  }
  func.func @transform_2(%arg0: i32) -> (i32, i32) {
    %c0_i32 = arith.constant 0 : i32
    %c0_i32_0 = arith.constant 0 : i32
    %c0_i32_1 = arith.constant 0 : i32
    return %c0_i32, %c0_i32_0 : i32, i32
  }
  func.func @transform_3(%arg0: i32) -> (i32, i32) {
    %c0_i32 = arith.constant 0 : i32
    %c0_i32_0 = arith.constant 0 : i32
    %c0_i32_1 = arith.constant 0 : i32
    return %c0_i32, %c0_i32_0 : i32, i32
  }
  func.func @transform_4(%arg0: i32) -> (i32, i32) {
    %c0_i32 = arith.constant 0 : i32
    %c0_i32_0 = arith.constant 0 : i32
    %c0_i32_1 = arith.constant 0 : i32
    return %c0_i32, %c0_i32_0 : i32, i32
  }
  func.func @transform_5(%arg0: i32) -> (i32, i32) {
    %c0_i32 = arith.constant 0 : i32
    %c0_i32_0 = arith.constant 0 : i32
    return %arg0, %c0_i32 : i32, i32
  }
}

</mosaic_0001>

<bundles_post_ra>
// kernel: image_classifier_forward.7
= control target key start
LH: loop header
LB: loop body
LE: loop exit
PB: predicated region body
PF: predicated region fallthrough
CT: control target
= control target key end

     0   :  { %s1250_s12 = smov 0   ;;  %s1402_s0 = inlined_call_operand.vmem [shape: bf16[2,32,32,8], index: 0, kind: input, shape index: {}]   ;;  %s1403_s1 = inlined_call_operand.vmem [shape: bf16[3,3,8,32], index: 1, kind: input, shape index: {}]   ;;  %s1404_s2 = inlined_call_operand.vmem [shape: f32[1,32], index: 2, kind: input, shape index: {}]   ;;  %s1405_s3 = inlined_call_operand.vmem [shape: bf16[2,30,30,32], index: 3, kind: output, shape index: {}]  }
   0x1 LB: > { %s986_s13 = sadd.s32 4294967295, %s1224_s12   ;;  %p990_p0 = scmp.ge.s32.totalorder %s1224_s12, 1  ;;  %s1224_s12 = sphi %s1250_s12, %s13_s12  }
   0x2   : > { %p137_p1 = scmp.lt.s32.totalorder %s1224_s12, 3 }
   0x4   : > { %p138_p2 = pnand %p990_p0, %p137_p1 }
   0x5   : > { %p161_p3 = scmp.lt.s32.totalorder (!%p138_p2), %s986_s13, 1  ;;  %v1261_v0 = vld [vmem:[%s1404_s2] ss:$0 sm:$0xff] (!%p138_p2)  ;;  %s1273_s24 = smov (!%p138_p2), 0  }
   0x6   : > { %141 = sbr.rel (%p138_p2) target bundleno = 303 (0x12f), region = 32 }
   0xd   : > { %s1407_s13 = smov (!%p161_p3, %s986_s13), 1 }
   0xe   : > { %s1056_s16 = sshll.u32 %s1407_s13, 9  ;;  %s1185_s17 = smul.u32 480, %s1407_s13 }
   0xf   : > { %s1266_s20 = scalar_lea.vmem %s1402_s0, %s1056_s16 }
  0x10   : > { %s1271_s23 = scalar_lea.vmem %s1405_s3, %s1185_s17 }
  0x11 LB: >> { %vm223_vm0 = vcmask 1043456   ;;  %v1019_v1 = vld [vmem:[%s1403_s1 + $0x10] sm:$0xf]  ;;  %v996_v2 = vld [vmem:[%s1403_s1 + $0x4] sm:$0xf]  ;;  %s1057_s4 = sshll.u32 %s1228_s24, 4  ;;  %s1228_s24 = sphi %s1273_s24, %s178_s24  }
  0x12   : >> { %1180 = vmatprep.subr.msk.bf16.mxu0 %vm223_vm0, %v1019_v1  ;;  %1176 = vmatprep.subr.msk.bf16.mxu1 %vm223_vm0, %v996_v2  ;;  %v517_v3 = vsel %vm223_vm0, %v1019_v1, 0  ;;  %v225_v4 = vsel %vm223_vm0, %v996_v2, 0  ;;  %v1024_v5 = vld [vmem:[%s1403_s1 + $0x14] sm:$0xf]  ;;  %v186_v6 = vld [vmem:[%s1403_s1] sm:$0xf]  ;;  %s1298_s7 = scalar_lea.vmem %s1266_s20, %s1057_s4  ;;  %s909_s19 = scalar_lea.vmem %s1271_s23, %s1057_s4 }
  0x13   : >> { %1115 = vmatpush3.bf16.msra.mxu0 %v517_v3  ;;  %1091 = vmatpush3.bf16.msra.mxu1 %v225_v4  ;;  %v182_v7 = vld [vmem:[%s1298_s7] sm:$0xf]  ;;  %v183_v8 = vld [vmem:[%s1298_s7 + $0x4] sm:$0xf]  ;;  %v1305_v9 = vld [vmem:[%s1298_s7 + $0x8] sm:$0xf] }
  0x14   : >> { %1181 = vmatprep.subr.msk.bf16.mxu0 %vm223_vm0, %v1024_v5  ;;  %1177 = vmatprep.subr.msk.bf16.mxu1 %vm223_vm0, %v186_v6  ;;  %v187_v10 = vld [vmem:[%s1298_s7 + $0xc] sm:$0xf]  ;;  %v997_v11 = vcombine.low %v182_v7, %v183_v8  ;;  %v1009_v12 = vld [vmem:[%s1298_s7 + $0x10] sm:$0xf]  ;;  %v1010_v13 = vld [vmem:[%s1298_s7 + $0x14] sm:$0xf] }
  0x15   : >> { %v1311_v14 = vcombine.low %v1305_v9, %v187_v10  ;;  %v1314_v15 = vld [vmem:[%s1298_s7 + $0x18] sm:$0xf]  ;;  %v1316_v16 = vcombine.low %v1009_v12, %v1010_v13  ;;  %v1018_v17 = vld [vmem:[%s1298_s7 + $0x1c] sm:$0xf]  ;;  %v1023_v18 = vld [vmem:[%s1298_s7 + $0x10] sm:$0xe] }
  0x16   : >> { %v202_v19 = vshrl.u32 %v997_v11, 16  ;;  %v204_v20 = vshll.u32 %v997_v11, 16  ;;  %v1020_v21 = vcombine.low %v1314_v15, %v1018_v17  ;;  %v1025_v22 = vcombine.low %v1023_v18, %v1010_v13  ;;  %v1033_v44 = vld [vmem:[%s1403_s1 + $0x18] sm:$0xf]  ;;  %v336_v45 = vld [vmem:[%s1298_s7] sm:$0xe] }
  0x17   : >> { %v209_v23 = vshll.u32 %v1311_v14, 16  ;;  %v213_v24 = vshrl.u32 %v1311_v14, 16  ;;  %v496_v25 = vshrl.u32 %v1316_v16, 16  ;;  %v498_v26 = vshll.u32 %v1316_v16, 16  ;;  %v1004_v46 = vld [vmem:[%s1403_s1 + $0x8] sm:$0xf] }
  0x18   : >> { %v206_v27 = vrot.slane %v204_v20, 1  ;;  %v503_v28 = vshll.u32 %v1020_v21, 16  ;;  %v507_v29 = vshrl.u32 %v1020_v21, 16  ;;  %vm200_vm1 = vsmask.f32 7424  ;;  %s178_s24 = sadd.s32 1, %s1228_s24  }
  0x19   : >> { %v211_v30 = vrot.slane %v209_v23, 1  ;;  %vm216_vm2 = vcmask 64512   ;;  %v500_v31 = vrot.slane %v498_v26, 1  ;;  %v578_v34 = vrot.slane %v1025_v22, 1  ;;  %v185_v48 = vld [vmem:[%s1298_s7 + $0xc] sm:$0x7] }
  0x1a   : >> { %v207_v32 = vor.u32 %v206_v27, %v202_v19  ;;  %v505_v33 = vrot.slane %v503_v28, 1  ;;  %v579_v35 = vrot.slane %v1020_v21, 1  ;;  %vm342_vm3 = vcmask 1046528   ;;  %v1029_v51 = vld [vmem:[%s1298_s7 + $0x20] sm:$0xf]  ;;  %p175_p4 = scmp.ge.s32.totalorder %s178_s24, 30  }
  0x1b   : >> { %v215_v36 = vor.u32 %v213_v24, %v211_v30  ;;  %v501_v37 = vor.u32 %v500_v31, %v496_v25  ;;  %v285_v40 = vsel %vm223_vm0, %v186_v6, 0  ;;  %v588_v42 = vsel %vm223_vm0, %v1024_v5, 0  ;;  %v1030_v52 = vld [vmem:[%s1298_s7 + $0x24] sm:$0xf]  ;;  %v1038_v54 = vld [vmem:[%s1298_s7 + $0x2c] sm:$0xf] }
  0x1c   : >> { %v212_v38 = vsel %vm200_vm1, %v207_v32, %v211_v30  ;;  %v509_v39 = vor.u32 %v507_v29, %v505_v33  ;;  %v580_v43 = vsel %vm342_vm3, %v578_v34, %v579_v35  ;;  %v1005_v47 = vcombine.low %v336_v45, %v183_v8  ;;  %v1031_v59 = vld [vmem:[%s1298_s7 + $0x28] sm:$0xf]  ;;  %v1039_v60 = vld [vmem:[%s1403_s1 + $0x1c] sm:$0xf]  ;;  %v1013_v63 = vld [vmem:[%s1403_s1 + $0xc] sm:$0xf] }
  0x1d   : >> { %1092 = vmatprep.mubr.msk.bf16.mxu1 %vm216_vm2, %v212_v38  ;;  %v506_v41 = vsel %vm200_vm1, %v501_v37, %v505_v33  ;;  %v344_v50 = vrot.slane %v1311_v14, 1  ;;  %v1001_v53 = vcombine.low %v1305_v9, %v185_v48  ;;  %v353_v55 = vsel %vm223_vm0, %v1004_v46, 0  ;;  %v1032_v4 = vld [vmem:[%s1298_s7 + $0x2c] sm:$0x7]  ;;  %v1043_v12 = vld [vmem:[%s1298_s7 + $0x20] sm:$0xe] }
  0x1e   : >> { %1116 = vmatprep.mubr.msk.bf16.mxu0 %vm216_vm2, %v506_v41  ;;  %1093 = vmatmul.mubr.msk.bf16.vlgmr.msra.gmra.mrb[0].mxu1 %vm216_vm2, %v215_v36  ;;  %v343_v49 = vrot.slane %v1005_v47, 1  ;;  %v1034_v56 = vcombine.low %v1029_v51, %v1030_v52  ;;  %v670_v57 = vsel %vm223_vm0, %v1033_v44, 0  ;;  %v1040_v61 = vcombine.low %v1031_v59, %v1038_v54  ;;  %v1012_v17 = vld [vmem:[%s1298_s7 + $0x1c] sm:$0x7] }
  0x1f   : >> { %1117 = vmatmul.mubr.msk.bf16.vlgmr.msra.gmra.mrb[0].mxu0 %vm216_vm2, %v509_v39  ;;  %1097 = vmatpush3.bf16.msra.mxu1 %v285_v40  ;;  %v1035_v7 = vcombine.low %v1031_v59, %v1032_v4  ;;  %v435_v8 = vsel %vm223_vm0, %v1013_v63, 0  ;;  %v752_v9 = vsel %vm223_vm0, %v1039_v60, 0  ;;  %v1045_v13 = vcombine.low %v1043_v12, %v1030_v52 }
  0x20   : >> { %1121 = vmatpush3.bf16.msra.mxu0 %v588_v42  ;;  %1098 = vmatprep.mubr.msk.bf16.mxu1 %vm216_vm2, %v997_v11  ;;  %v345_v58 = vsel %vm342_vm3, %v343_v49, %v344_v50  ;;  %v733_v62 = vshll.u32 %v1034_v56, 16  ;;  %v731_v1 = vshrl.u32 %v1034_v56, 16  ;;  %v738_v3 = vshll.u32 %v1040_v61, 16  ;;  %v1044_v11 = vld [vmem:[%s1403_s1 + $0x20] sm:$0xf] }
  0x21   : >> { %1122 = vmatprep.mubr.msk.bf16.mxu0 %vm216_vm2, %v580_v43  ;;  %1182 = vmatprep.subr.msk.bf16.mxu0 %vm223_vm0, %v1033_v44  ;;  %v742_v14 = vshrl.u32 %v1040_v61, 16  ;;  %v813_v18 = vrot.slane %v1045_v13, 1  ;;  %v814_v19 = vrot.slane %v1040_v61, 1  ;;  %v1015_v20 = vcombine.low %v1314_v15, %v1012_v17 }
  0x22   : >> { %1178 = vmatprep.subr.msk.bf16.mxu1 %vm223_vm0, %v1004_v46  ;;  %v735_v2 = vrot.slane %v733_v62, 1  ;;  %v740_v6 = vrot.slane %v738_v3, 1  ;;  %v823_v22 = vsel %vm223_vm0, %v1044_v11, 0  ;;  %vm910_vm4 = vcmask 257024  }
  0x23   : >> { %v815_v23 = vsel %vm342_vm3, %v813_v18, %v814_v19  ;;  %vm914_vm5 = vcmask 256000  }
  0x24   : >> { %v736_v5 = vor.u32 %v735_v2, %v731_v1  ;;  %v744_v21 = vor.u32 %v742_v14, %v740_v6 }
  0x26   : >> { %v741_v10 = vsel %vm200_vm1, %v736_v5, %v740_v6 }
  0x2a   : >> { %1099 = vmatmul.mubr.msk.bf16.vlgmr.msra.gmra.mrb[0].mxu1 %vm216_vm2, %v1001_v53 }
  0x2b   : >> { %1123 = vmatmul.mubr.msk.bf16.vlgmr.msra.gmra.mrb[0].mxu0 %vm216_vm2, %v579_v35  ;;  %1103 = vmatpush3.bf16.msra.mxu1 %v353_v55 }
  0x2c   : >> { %1127 = vmatpush3.bf16.msra.mxu0 %v670_v57  ;;  %1104 = vmatprep.mubr.msk.bf16.mxu1 %vm216_vm2, %v345_v58 }
  0x2d   : >> { %1128 = vmatprep.mubr.msk.bf16.mxu0 %vm216_vm2, %v1034_v56  ;;  %1183 = vmatprep.subr.msk.bf16.mxu0 %vm223_vm0, %v1039_v60 }
  0x2e   : >> { %1179 = vmatprep.subr.msk.bf16.mxu1 %vm223_vm0, %v1013_v63 }
  0x36   : >> { %1105 = vmatmul.mubr.msk.bf16.vlgmr.msra.gmra.mrb[0].mxu1 %vm216_vm2, %v344_v50 }
  0x37   : >> { %1129 = vmatmul.mubr.msk.bf16.vlgmr.msra.gmra.mrb[0].mxu0 %vm216_vm2, %v1035_v7  ;;  %1109 = vmatpush3.bf16.msra.mxu1 %v435_v8 }
  0x38   : >> { %1133 = vmatpush3.bf16.msra.mxu0 %v752_v9  ;;  %1110 = vmatprep.mubr.msk.bf16.mxu1 %vm216_vm2, %v1316_v16 }
  0x39   : >> { %1134 = vmatprep.mubr.msk.bf16.mxu0 %vm216_vm2, %v741_v10  ;;  %1184 = vmatprep.subr.msk.bf16.mxu0 %vm223_vm0, %v1044_v11 }
  0x42   : >> { %1111 = vmatmul.mubr.msk.bf16.vlgmr.msra.gmra.mrb[0].mxu1 %vm216_vm2, %v1015_v20 }
  0x43   : >> { %1135 = vmatmul.mubr.msk.bf16.vlgmr.msra.gmra.mrb[0].mxu0 %vm216_vm2, %v744_v21 }
  0x44   : >> { %1139 = vmatpush3.bf16.msra.mxu0 %v823_v22  ;;  %1140 = vmatprep.mubr.msk.bf16.mxu0 %vm216_vm2, %v815_v23 }
  0x4f   : >> { %1141 = vmatmul.mubr.msk.bf16.vlgmr.msra.gmra.mrb[0].mxu0 %vm216_vm2, %v814_v19 }
 0x115   : >> { %v1112_v16 = vpop.f32.mrb[0].mxu1 }
 0x116   : >> { %v471_v24 = vpop.f32.mrb[1].mxu1 }
 0x117   : >> { %v1113_v25 = vpop.f32.mrb[2].mxu1 }
 0x118   : >> { %v474_v15 = vpop.f32.mrb[3].mxu1 }
 0x122   : >> { %v1142_v26 = vpop.f32.mrb[0].mxu0 }
 0x123   : >> { %v1144_v27 = vadd.f32 %v1142_v26, %v1112_v16  ;;  %v859_v28 = vpop.f32.mrb[1].mxu0 }
 0x124   : >> { %v1145_v29 = vadd.f32 %v859_v28, %v471_v24  ;;  %v1143_v30 = vpop.f32.mrb[2].mxu0 }
 0x125   : >> { %v886_v31 = vadd.f32 %v1144_v27, %v1261_v0  ;;  %v1146_v32 = vadd.f32 %v1143_v30, %v1113_v25  ;;  %v862_v33 = vpop.f32.mrb[3].mxu0 }
 0x126   : >> { %v884_v34 = vadd.f32 %v1145_v29, %v1261_v0  ;;  %v1147_v35 = vadd.f32 %v862_v33, %v474_v15 }
 0x127   : >> { %v890_v36 = vmax.f32 %v886_v31, 0.0  ;;  %v887_v37 = vadd.f32 %v1146_v32, %v1261_v0 }
 0x128   : >> { %v888_v38 = vmax.f32 %v884_v34, 0.0  ;;  %v885_v39 = vadd.f32 %v1147_v35, %v1261_v0  ;;  %177 = sbr.rel (!%p175_p4) target bundleno = 17 (0x11), region = 81 }
 0x129   : >> { %v1060_v40 = vpack.c.bf16 %v890_v36, %v890_v36  ;;  %v891_v41 = vmax.f32 %v887_v37, 0.0 }
 0x12a   : >> { %v1058_v42 = vpack.c.bf16 %v888_v38, %v888_v38  ;;  %v889_v43 = vmax.f32 %v885_v39, 0.0 }
 0x12b   : >> { %913 = vst.msk [vmem:[%s909_s19 + $0x8] sm:$0xf] %vm910_vm4, %v1060_v40  ;;  %v1061_v44 = vpack.c.bf16 %v891_v41, %v891_v41 }
 0x12c   : >> { %911 = vst.msk [vmem:[%s909_s19] sm:$0xf] %vm910_vm4, %v1058_v42  ;;  %v1059_v45 = vpack.c.bf16 %v889_v43, %v889_v43 }
 0x12d   : >> { %915 = vst.msk [vmem:[%s909_s19 + $0xc] sm:$0x7] %vm914_vm5, %v1061_v44 }
 0x12e   : >> { %912 = vst.msk [vmem:[%s909_s19 + $0x4] sm:$0xf] %vm910_vm4, %v1059_v45 }
 0x12f PF: > { %s13_s12 = sadd.s32 1, %s1224_s12  }
 0x130   : > { %p10_p5 = scmp.ge.s32.totalorder %s13_s12, 4  }
 0x132   :  { %12 = sbr.rel (!%p10_p5) target bundleno = 1 (0x1), region = 92 }

// kernel: image_classifier_forward.8
= control target key start
LH: loop header
LB: loop body
LE: loop exit
PB: predicated region body
PF: predicated region fallthrough
CT: control target
= control target key end

     0   :  { %s1434_s12 = smov 0   ;;  %s1604_s0 = inlined_call_operand.vmem [shape: bf16[2,30,30,32], index: 0, kind: input, shape index: {}]   ;;  %s1605_s1 = inlined_call_operand.vmem [shape: bf16[3,3,32,32], index: 1, kind: input, shape index: {}]   ;;  %s1606_s2 = inlined_call_operand.vmem [shape: f32[1,32], index: 2, kind: input, shape index: {}]   ;;  %s1607_s3 = inlined_call_operand.vmem [shape: bf16[2,28,28,32], index: 3, kind: output, shape index: {}]  }
   0x1 LB: > { %s1093_s13 = sadd.s32 4294967295, %s1408_s12   ;;  %p1097_p0 = scmp.ge.s32.totalorder %s1408_s12, 1  ;;  %s1408_s12 = sphi %s1434_s12, %s13_s12  }
   0x2   : > { %p137_p1 = scmp.lt.s32.totalorder %s1408_s12, 3 }
   0x4   : > { %p138_p2 = pnand %p1097_p0, %p137_p1 }
   0x5   : > { %p161_p3 = scmp.lt.s32.totalorder (!%p138_p2), %s1093_s13, 1  ;;  %v1445_v0 = vld [vmem:[%s1606_s2] ss:$0 sm:$0xff] (!%p138_p2)  ;;  %s1457_s24 = smov (!%p138_p2), 0  }
   0x6   : > { %141 = sbr.rel (%p138_p2) target bundleno = 305 (0x131), region = 32 }
   0xd   : > { %s1609_s13 = smov (!%p161_p3, %s1093_s13), 1 }
   0xe   : > { %s1350_s16 = smul.u32 480, %s1609_s13 }
   0xf   : > { %s1351_s17 = smul.u32 448, %s1609_s13 }
  0x10   : > { %s1450_s20 = scalar_lea.vmem %s1604_s0, %s1350_s16 }
  0x11   : > { %s1455_s23 = scalar_lea.vmem %s1607_s3, %s1351_s17 }
  0x12 LB: >> { %v1368_v1 = vld [vmem:[%s1605_s1 + $0x40] sm:$0xff]   ;;  %v1369_v2 = vld [vmem:[%s1605_s1 + $0x10] sm:$0xff]   ;;  %v1370_v3 = vld [vmem:[%s1605_s1 + $0x48] sm:$0xff]   ;;  %s1204_s4 = sshll.u32 %s1412_s24, 4  ;;  %vm206_vm0 = vsmask.f32 7424  ;;  %s1412_s24 = sphi %s1457_s24, %s178_s24  }
  0x13   : >> { %1278 = vmatprep.subr.bf16.mxu0 %v1368_v1  ;;  %1246 = vmatprep.subr.bf16.mxu1 %v1369_v2  ;;  %v1371_v4 = vld [vmem:[%s1605_s1 + $0x18] sm:$0xff]   ;;  %s1478_s7 = scalar_lea.vmem %s1450_s20, %s1204_s4  ;;  %v1376_v21 = vld [vmem:[%s1605_s1 + $0x50] sm:$0xff]   ;;  %v1377_v22 = vld [vmem:[%s1605_s1] sm:$0xff]   ;;  %vm234_vm1 = vcmask 261120   ;;  %vm368_vm2 = vcmask 1046528   ;;  %vm1017_vm3 = vcmask 257024  }
  0x14   : >> { %1279 = vmatpush3.bf16.msra.mxu0 %v1368_v1  ;;  %1247 = vmatpush3.bf16.msra.mxu1 %v1369_v2  ;;  %v182_v5 = vld [vmem:[%s1478_s7] sm:$0xf]  ;;  %v1482_v6 = vld [vmem:[%s1478_s7 + $0x4] sm:$0xf]  ;;  %v1485_v7 = vld [vmem:[%s1478_s7 + $0x8] sm:$0xf] }
  0x15   : >> { %1280 = vmatprep.subr.bf16.mxu0 %v1370_v3  ;;  %1248 = vmatprep.subr.bf16.mxu1 %v1371_v4  ;;  %v190_v8 = vld [vmem:[%s1478_s7 + $0xc] sm:$0x7]  ;;  %v1106_v9 = vcombine.low %v182_v5, %v1482_v6  ;;  %v1127_v10 = vld [vmem:[%s1478_s7 + $0x10] sm:$0xf]  ;;  %v1128_v12 = vld [vmem:[%s1478_s7 + $0x14] sm:$0xf] }
  0x16   : >> { %v1491_v11 = vcombine.low %v1485_v7, %v190_v8  ;;  %v1495_v13 = vld [vmem:[%s1478_s7 + $0x18] sm:$0xf]  ;;  %v1141_v14 = vld [vmem:[%s1478_s7 + $0x1c] sm:$0x7]  ;;  %v1498_v17 = vcombine.low %v1127_v10, %v1128_v12  ;;  %v1151_v33 = vld [vmem:[%s1478_s7 + $0x10] sm:$0xe] }
  0x17   : >> { %v208_v15 = vshrl.u32 %v1106_v9, 16  ;;  %v210_v16 = vshll.u32 %v1106_v9, 16  ;;  %v1501_v18 = vcombine.low %v1495_v13, %v1141_v14  ;;  %v1379_v38 = vld [vmem:[%s1605_s1 + $0x8] sm:$0xff]   ;;  %v1156_v39 = vcombine.low %v1151_v33, %v1128_v12  ;;  %v1378_v41 = vld [vmem:[%s1605_s1 + $0x58] sm:$0xff]   ;;  %v1383_v44 = vld [vmem:[%s1605_s1 + $0x20] sm:$0xff]   ;;  %s178_s24 = sadd.s32 1, %s1412_s24  }
  0x18   : >> { %1281 = vmatpush3.bf16.msra.mxu0 %v1370_v3  ;;  %1249 = vmatpush3.bf16.msra.mxu1 %v1371_v4  ;;  %v215_v19 = vshll.u32 %v1491_v11, 16  ;;  %v219_v20 = vshrl.u32 %v1491_v11, 16  ;;  %v546_v24 = vshrl.u32 %v1498_v17, 16  ;;  %v548_v25 = vshll.u32 %v1498_v17, 16  ;;  %v359_v45 = vld [vmem:[%s1478_s7] sm:$0xe] }
  0x19   : >> { %v212_v23 = vrot.slane %v210_v16, 1  ;;  %v553_v26 = vshll.u32 %v1501_v18, 16  ;;  %v557_v28 = vshrl.u32 %v1501_v18, 16  ;;  %1286 = vmatprep.subr.bf16.mxu0 %v1376_v21  ;;  %1254 = vmatprep.subr.bf16.mxu1 %v1377_v22  ;;  %v641_v34 = vrot.slane %v1501_v18, 1  ;;  %v1381_v47 = vld [vmem:[%s1605_s1 + $0x60] sm:$0xff]   ;;  %v1385_v55 = vld [vmem:[%s1605_s1 + $0x28] sm:$0xff]  }
  0x1a   : >> { %v217_v27 = vrot.slane %v215_v19, 1  ;;  %v550_v30 = vrot.slane %v548_v25, 1  ;;  %v640_v42 = vrot.slane %v1156_v39, 1  ;;  %v1121_v46 = vcombine.low %v359_v45, %v1482_v6  ;;  %v185_v48 = vld [vmem:[%s1478_s7 + $0xc] sm:$0x3]  ;;  %v1390_v62 = vld [vmem:[%s1605_s1 + $0x30] sm:$0xff]  }
  0x1b   : >> { %v213_v29 = vor.u32 %v212_v23, %v208_v15  ;;  %v555_v31 = vrot.slane %v553_v26, 1  ;;  %v370_v50 = vrot.slane %v1491_v11, 1  ;;  %v1162_v51 = vld [vmem:[%s1478_s7 + $0x20] sm:$0xf]  ;;  %v1163_v52 = vld [vmem:[%s1478_s7 + $0x24] sm:$0xf]  ;;  %v1112_v53 = vcombine.low %v1485_v7, %v185_v48 }
  0x1c   : >> { %v221_v32 = vor.u32 %v219_v20, %v217_v27  ;;  %v551_v36 = vor.u32 %v550_v30, %v546_v24  ;;  %v642_v43 = vsel %vm368_vm2, %v640_v42, %v641_v34  ;;  %v369_v49 = vrot.slane %v1121_v46, 1  ;;  %v1176_v54 = vld [vmem:[%s1478_s7 + $0x2c] sm:$0x7]  ;;  %v1164_v58 = vld [vmem:[%s1478_s7 + $0x28] sm:$0xf]  ;;  %v1388_v63 = vld [vmem:[%s1605_s1 + $0x70] sm:$0xff]  }
  0x1d   : >> { %v218_v35 = vsel %vm206_vm0, %v213_v29, %v217_v27  ;;  %v559_v37 = vor.u32 %v557_v28, %v555_v31  ;;  %v1170_v57 = vcombine.low %v1162_v51, %v1163_v52  ;;  %v1384_v59 = vld [vmem:[%s1605_s1 + $0x68] sm:$0xff]   ;;  %v1181_v60 = vcombine.low %v1164_v58, %v1176_v54  ;;  %v1392_v8 = vld [vmem:[%s1605_s1 + $0x38] sm:$0xff]   ;;  %v1186_v11 = vld [vmem:[%s1478_s7 + $0x20] sm:$0xe]  ;;  %p175_p4 = scmp.ge.s32.totalorder %s178_s24, 28  }
  0x1e   : >> { %1250 = vmatprep.mubr.msk.bf16.mxu1 %vm234_vm1, %v218_v35  ;;  %v556_v40 = vsel %vm206_vm0, %v551_v36, %v555_v31  ;;  %v371_v56 = vsel %vm368_vm2, %v369_v49, %v370_v50  ;;  %v1165_v4 = vld [vmem:[%s1478_s7 + $0x2c] sm:$0x3]  ;;  %v1394_v12 = vld [vmem:[%s1605_s1 + $0x80] sm:$0xff]   ;;  %v1191_v14 = vcombine.low %v1186_v11, %v1163_v52  ;;  %v1130_v15 = vld [vmem:[%s1478_s7 + $0x1c] sm:$0x3]  ;;  %s1016_s7 = scalar_lea.vmem %s1455_s23, %s1204_s4  ;;  %vm1021_vm4 = vcmask 254976  }
  0x1f   : >> { %1251 = vmatmul.mubr.msk.bf16.vlgmr.msra.gmra.mrb[0].mxu1 %vm234_vm1, %v221_v32  ;;  %1282 = vmatprep.mubr.msk.bf16.mxu0 %vm234_vm1, %v556_v40  ;;  %v819_v61 = vshll.u32 %v1170_v57, 16  ;;  %v817_v1 = vshrl.u32 %v1170_v57, 16  ;;  %v824_v3 = vshll.u32 %v1181_v60, 16  ;;  %v1171_v7 = vcombine.low %v1164_v58, %v1165_v4 }
  0x20   : >> { %1255 = vmatpush3.bf16.msra.mxu1 %v1377_v22  ;;  %1283 = vmatmul.mubr.msk.bf16.vlgmr.msra.gmra.mrb[0].mxu0 %vm234_vm1, %v559_v37  ;;  %v828_v16 = vshrl.u32 %v1181_v60, 16  ;;  %v911_v18 = vrot.slane %v1191_v14, 1  ;;  %v912_v19 = vrot.slane %v1181_v60, 1 }
  0x21   : >> { %1256 = vmatprep.subr.bf16.mxu1 %v1379_v38  ;;  %1287 = vmatpush3.bf16.msra.mxu0 %v1376_v21  ;;  %v821_v2 = vrot.slane %v819_v61, 1  ;;  %v826_v6 = vrot.slane %v824_v3, 1  ;;  %v1396_v21 = vld [vmem:[%s1605_s1 + $0x88] sm:$0xff]  }
  0x22   : >> { %1258 = vmatprep.mubr.msk.bf16.mxu1 %vm234_vm1, %v1106_v9  ;;  %1288 = vmatprep.subr.bf16.mxu0 %v1378_v41  ;;  %v1391_v9 = vld [vmem:[%s1605_s1 + $0x78] sm:$0xff]   ;;  %v913_v22 = vsel %vm368_vm2, %v911_v18, %v912_v19 }
  0x23   : >> { %1290 = vmatprep.mubr.msk.bf16.mxu0 %vm234_vm1, %v642_v43  ;;  %v822_v5 = vor.u32 %v821_v2, %v817_v1  ;;  %v830_v20 = vor.u32 %v828_v16, %v826_v6 }
  0x24   : >> { %1257 = vmatpush3.bf16.msra.mxu1 %v1379_v38 }
  0x25   : >> { %1262 = vmatprep.subr.bf16.mxu1 %v1383_v44  ;;  %1289 = vmatpush3.bf16.msra.mxu0 %v1378_v41  ;;  %v827_v10 = vsel %vm206_vm0, %v822_v5, %v826_v6 }
  0x26   : >> { %1294 = vmatprep.subr.bf16.mxu0 %v1381_v47 }
  0x2b   : >> { %1259 = vmatmul.mubr.msk.bf16.vlgmr.msra.gmra.mrb[0].mxu1 %vm234_vm1, %v1112_v53 }
  0x2c   : >> { %1263 = vmatpush3.bf16.msra.mxu1 %v1383_v44  ;;  %1266 = vmatprep.mubr.msk.bf16.mxu1 %vm234_vm1, %v371_v56 }
  0x2d   : >> { %1291 = vmatmul.mubr.msk.bf16.vlgmr.msra.gmra.mrb[0].mxu0 %vm234_vm1, %v641_v34  ;;  %1264 = vmatprep.subr.bf16.mxu1 %v1385_v55 }
  0x2e   : >> { %1295 = vmatpush3.bf16.msra.mxu0 %v1381_v47  ;;  %1298 = vmatprep.mubr.msk.bf16.mxu0 %vm234_vm1, %v1170_v57 }
  0x2f   : >> { %1296 = vmatprep.subr.bf16.mxu0 %v1384_v59 }
  0x30   : >> { %1265 = vmatpush3.bf16.msra.mxu1 %v1385_v55 }
  0x31   : >> { %1270 = vmatprep.subr.bf16.mxu1 %v1390_v62 }
  0x32   : >> { %1297 = vmatpush3.bf16.msra.mxu0 %v1384_v59 }
  0x33   : >> { %1302 = vmatprep.subr.bf16.mxu0 %v1388_v63 }
  0x37   : >> { %1267 = vmatmul.mubr.msk.bf16.vlgmr.msra.gmra.mrb[0].mxu1 %vm234_vm1, %v370_v50 }
  0x38   : >> { %1271 = vmatpush3.bf16.msra.mxu1 %v1390_v62  ;;  %1274 = vmatprep.mubr.msk.bf16.mxu1 %vm234_vm1, %v1498_v17  ;;  %v1136_v17 = vcombine.low %v1495_v13, %v1130_v15 }
  0x39   : >> { %1299 = vmatmul.mubr.msk.bf16.vlgmr.msra.gmra.mrb[0].mxu0 %vm234_vm1, %v1171_v7  ;;  %1272 = vmatprep.subr.bf16.mxu1 %v1392_v8 }
  0x3a   : >> { %1303 = vmatpush3.bf16.msra.mxu0 %v1388_v63  ;;  %1306 = vmatprep.mubr.msk.bf16.mxu0 %vm234_vm1, %v827_v10 }
  0x3b   : >> { %1304 = vmatprep.subr.bf16.mxu0 %v1391_v9 }
  0x3c   : >> { %1273 = vmatpush3.bf16.msra.mxu1 %v1392_v8 }
  0x3e   : >> { %1305 = vmatpush3.bf16.msra.mxu0 %v1391_v9 }
  0x3f   : >> { %1310 = vmatprep.subr.bf16.mxu0 %v1394_v12 }
  0x43   : >> { %1275 = vmatmul.mubr.msk.bf16.vlgmr.msra.gmra.mrb[0].mxu1 %vm234_vm1, %v1136_v17 }
  0x45   : >> { %1307 = vmatmul.mubr.msk.bf16.vlgmr.msra.gmra.mrb[0].mxu0 %vm234_vm1, %v830_v20 }
  0x46   : >> { %1311 = vmatpush3.bf16.msra.mxu0 %v1394_v12  ;;  %1314 = vmatprep.mubr.msk.bf16.mxu0 %vm234_vm1, %v913_v22 }
  0x47   : >> { %1312 = vmatprep.subr.bf16.mxu0 %v1396_v21 }
  0x4a   : >> { %1313 = vmatpush3.bf16.msra.mxu0 %v1396_v21 }
  0x51   : >> { %1315 = vmatmul.mubr.msk.bf16.vlgmr.msra.gmra.mrb[0].mxu0 %vm234_vm1, %v912_v19 }
 0x116   : >> { %v1276_v13 = vpop.f32.mrb[0].mxu1 }
 0x117   : >> { %v518_v23 = vpop.f32.mrb[1].mxu1 }
 0x118   : >> { %v1277_v24 = vpop.f32.mrb[2].mxu1 }
 0x119   : >> { %v521_v25 = vpop.f32.mrb[3].mxu1 }
 0x124   : >> { %v1316_v26 = vpop.f32.mrb[0].mxu0 }
 0x125   : >> { %v1318_v27 = vadd.f32 %v1316_v26, %v1276_v13  ;;  %v966_v28 = vpop.f32.mrb[1].mxu0 }
 0x126   : >> { %v1319_v29 = vadd.f32 %v966_v28, %v518_v23  ;;  %v1317_v30 = vpop.f32.mrb[2].mxu0 }
 0x127   : >> { %v993_v31 = vadd.f32 %v1318_v27, %v1445_v0  ;;  %v1320_v32 = vadd.f32 %v1317_v30, %v1277_v24  ;;  %v969_v33 = vpop.f32.mrb[3].mxu0 }
 0x128   : >> { %v991_v34 = vadd.f32 %v1319_v29, %v1445_v0  ;;  %v1321_v35 = vadd.f32 %v969_v33, %v521_v25 }
 0x129   : >> { %v997_v36 = vmax.f32 %v993_v31, 0.0  ;;  %v994_v37 = vadd.f32 %v1320_v32, %v1445_v0 }
 0x12a   : >> { %v995_v38 = vmax.f32 %v991_v34, 0.0  ;;  %v992_v39 = vadd.f32 %v1321_v35, %v1445_v0  ;;  %177 = sbr.rel (!%p175_p4) target bundleno = 18 (0x12), region = 81 }
 0x12b   : >> { %v1207_v40 = vpack.c.bf16 %v997_v36, %v997_v36  ;;  %v998_v41 = vmax.f32 %v994_v37, 0.0 }
 0x12c   : >> { %v1205_v42 = vpack.c.bf16 %v995_v38, %v995_v38  ;;  %v996_v43 = vmax.f32 %v992_v39, 0.0 }
 0x12d   : >> { %1020 = vst.msk [vmem:[%s1016_s7 + $0x8] sm:$0xf] %vm1017_vm3, %v1207_v40  ;;  %v1208_v44 = vpack.c.bf16 %v998_v41, %v998_v41 }
 0x12e   : >> { %1018 = vst.msk [vmem:[%s1016_s7] sm:$0xf] %vm1017_vm3, %v1205_v42  ;;  %v1206_v45 = vpack.c.bf16 %v996_v43, %v996_v43 }
 0x12f   : >> { %1022 = vst.msk [vmem:[%s1016_s7 + $0xc] sm:$0x3] %vm1021_vm4, %v1208_v44 }
 0x130   : >> { %1019 = vst.msk [vmem:[%s1016_s7 + $0x4] sm:$0xf] %vm1017_vm3, %v1206_v45 }
 0x131 PF: > { %s13_s12 = sadd.s32 1, %s1408_s12  }
 0x132   : > { %p10_p5 = scmp.ge.s32.totalorder %s13_s12, 4  }
 0x134   :  { %12 = sbr.rel (!%p10_p5) target bundleno = 1 (0x1), region = 92 }

// kernel: image_classifier_forward.9
= control target key start
LH: loop header
LB: loop body
LE: loop exit
PB: predicated region body
PF: predicated region fallthrough
CT: control target
= control target key end

     0   :  { %s494_s6 = smov 0   ;;  %s771_s0 = inlined_call_operand.vmem [shape: bf16[2,14,2,14,64], index: 0, kind: input, shape index: {}]   ;;  %s772_s1 = inlined_call_operand.vmem [shape: bf16[2,14,14,32], index: 1, kind: output, shape index: {}]  }
   0x1 LB: > { %s427_s7 = sadd.s32 4294967295, %s481_s6   ;;  %p431_p0 = scmp.ge.s32.totalorder %s481_s6, 1  ;;  %s481_s6 = sphi %s494_s6, %s11_s6  }
   0x2   : > { %p87_p1 = scmp.lt.s32.totalorder %s481_s6, 3 }
   0x4   : > { %p88_p2 = pnand %p431_p0, %p87_p1 }
   0x5   : > { %p107_p3 = scmp.lt.s32.totalorder (!%p88_p2), %s427_s7, 1  ;;  %s483_s12 = smov (!%p88_p2), 96   ;;  %vm342_vm0 = vcmask (!%p88_p2), 257024   ;;  %vm344_vm1 = vcmask (!%p88_p2), 256000  }
   0x6   : > { %91 = sbr.rel (%p88_p2) target bundleno = 191 (0xbf), region = 24 }
   0xd   : > { %s774_s7 = smov (!%p107_p3, %s427_s7), 1 }
   0xe   : > { %s464_s8 = smul.u32 224, %s774_s7 }
   0xf   : > { %s465_s13 = smul.u32 112, %s774_s7 }
  0x10   : > { %s508_s11 = scalar_lea.vmem %s771_s0, %s464_s8 }
  0x11   : > { %v119_v0 = vld [vmem:[%s508_s11 + $0x10] sm:$0xf]  ;;  %v436_v1 = vld [vmem:[%s508_s11 + $0x18] sm:$0xf]  ;;  %v117_v2 = vld [vmem:[%s508_s11] sm:$0xf]  ;;  %s682_s16 = scalar_lea.vmem %s772_s1, %s465_s13 }
  0x12   : > { %v513_v3 = vmax.bf16 %v436_v1, %v119_v0  ;;  %v434_v4 = vld [vmem:[%s508_s11 + $0x8] sm:$0xf]  ;;  %v120_v5 = vld [vmem:[%s508_s11 + $0x14] sm:$0x7]  ;;  %v437_v6 = vld [vmem:[%s508_s11 + $0x1c] sm:$0x7] }
  0x13   : > { %v518_v7 = vmax.bf16 %v434_v4, %v117_v2  ;;  %v118_v8 = vld [vmem:[%s508_s11 + $0x4] sm:$0x7]  ;;  %v435_v9 = vld [vmem:[%s508_s11 + $0xc] sm:$0x7]  ;;  %v524_v10 = vmax.bf16 %v437_v6, %v120_v5  ;;  %v121_v14 = vld [vmem:[%s508_s11 + $0x20] sm:$0xf] }
  0x14   : > { %234 = vrot.lane.b32.xlu1 %v513_v3, %s483_s12  ;;  %v528_v11 = vmax.bf16 %v435_v9, %v118_v8  ;;  %v122_v12 = vld [vmem:[%s508_s11 + $0x24] sm:$0x7]  ;;  %v439_v13 = vld [vmem:[%s508_s11 + $0x2c] sm:$0x7]  ;;  %v438_v15 = vld [vmem:[%s508_s11 + $0x28] sm:$0xf] }
  0x15   : > { %230 = vrot.lane.b32.xlu0 %v518_v7, %s483_s12  ;;  %v536_v16 = vmax.bf16 %v439_v13, %v122_v12  ;;  %v540_v17 = vmax.bf16 %v438_v15, %v121_v14  ;;  %v124_v18 = vld [vmem:[%s508_s11 + $0x34] sm:$0x7]  ;;  %v441_v19 = vld [vmem:[%s508_s11 + $0x3c] sm:$0x7]  ;;  %v123_v20 = vld [vmem:[%s508_s11 + $0x30] sm:$0xf] }
  0x16   : > { %v440_v21 = vld [vmem:[%s508_s11 + $0x38] sm:$0xf]  ;;  %v548_v22 = vmax.bf16 %v441_v19, %v124_v18  ;;  %v126_v24 = vld [vmem:[%s508_s11 + $0x44] sm:$0x7]  ;;  %v443_v25 = vld [vmem:[%s508_s11 + $0x4c] sm:$0x7] }
  0x17   : > { %v552_v23 = vmax.bf16 %v440_v21, %v123_v20  ;;  %v125_v26 = vld [vmem:[%s508_s11 + $0x40] sm:$0xf]  ;;  %v442_v27 = vld [vmem:[%s508_s11 + $0x48] sm:$0xf]  ;;  %v560_v28 = vmax.bf16 %v443_v25, %v126_v24  ;;  %v128_v30 = vld [vmem:[%s508_s11 + $0x54] sm:$0x7] }
  0x18   : > { %236 = vrot.lane.b32.xlu1 %v524_v10, %s483_s12  ;;  %v564_v29 = vmax.bf16 %v442_v27, %v125_v26  ;;  %v445_v31 = vld [vmem:[%s508_s11 + $0x5c] sm:$0x7]  ;;  %v127_v32 = vld [vmem:[%s508_s11 + $0x50] sm:$0xf]  ;;  %v444_v33 = vld [vmem:[%s508_s11 + $0x58] sm:$0xf] }
  0x19   : > { %232 = vrot.lane.b32.xlu0 %v528_v11, %s483_s12  ;;  %v572_v34 = vmax.bf16 %v445_v31, %v128_v30  ;;  %v576_v35 = vmax.bf16 %v444_v33, %v127_v32  ;;  %v130_v36 = vld [vmem:[%s508_s11 + $0x64] sm:$0x7]  ;;  %v447_v37 = vld [vmem:[%s508_s11 + $0x6c] sm:$0x7]  ;;  %v129_v38 = vld [vmem:[%s508_s11 + $0x60] sm:$0xf] }
  0x1a   : > { %v446_v39 = vld [vmem:[%s508_s11 + $0x68] sm:$0xf]  ;;  %v584_v40 = vmax.bf16 %v447_v37, %v130_v36  ;;  %v132_v42 = vld [vmem:[%s508_s11 + $0x74] sm:$0x7]  ;;  %v449_v43 = vld [vmem:[%s508_s11 + $0x7c] sm:$0x7] }
  0x1b   : > { %v588_v41 = vmax.bf16 %v446_v39, %v129_v38  ;;  %v131_v44 = vld [vmem:[%s508_s11 + $0x70] sm:$0xf]  ;;  %v448_v45 = vld [vmem:[%s508_s11 + $0x78] sm:$0xf]  ;;  %v596_v46 = vmax.bf16 %v449_v43, %v132_v42  ;;  %v134_v48 = vld [vmem:[%s508_s11 + $0x84] sm:$0x7] }
  0x1c   : > { %240 = vrot.lane.b32.xlu1 %v536_v16, %s483_s12  ;;  %v600_v47 = vmax.bf16 %v448_v45, %v131_v44  ;;  %v451_v49 = vld [vmem:[%s508_s11 + $0x8c] sm:$0x7]  ;;  %v133_v50 = vld [vmem:[%s508_s11 + $0x80] sm:$0xf]  ;;  %v450_v51 = vld [vmem:[%s508_s11 + $0x88] sm:$0xf] }
  0x1d   : > { %238 = vrot.lane.b32.xlu0 %v540_v17, %s483_s12  ;;  %v608_v52 = vmax.bf16 %v451_v49, %v134_v48  ;;  %v612_v53 = vmax.bf16 %v450_v51, %v133_v50  ;;  %v136_v54 = vld [vmem:[%s508_s11 + $0x94] sm:$0x7]  ;;  %v453_v55 = vld [vmem:[%s508_s11 + $0x9c] sm:$0x7]  ;;  %v135_v56 = vld [vmem:[%s508_s11 + $0x90] sm:$0xf] }
  0x1e   : > { %v452_v57 = vld [vmem:[%s508_s11 + $0x98] sm:$0xf]  ;;  %v620_v58 = vmax.bf16 %v453_v55, %v136_v54  ;;  %v138_v60 = vld [vmem:[%s508_s11 + $0xa4] sm:$0x7]  ;;  %v455_v61 = vld [vmem:[%s508_s11 + $0xac] sm:$0x7] }
  0x1f   : > { %v624_v59 = vmax.bf16 %v452_v57, %v135_v56  ;;  %v137_v62 = vld [vmem:[%s508_s11 + $0xa0] sm:$0xf]  ;;  %v454_v63 = vld [vmem:[%s508_s11 + $0xa8] sm:$0xf]  ;;  %v632_v0 = vmax.bf16 %v455_v61, %v138_v60  ;;  %v140_v2 = vld [vmem:[%s508_s11 + $0xb4] sm:$0x7] }
  0x20   : > { %244 = vrot.lane.b32.xlu1 %v548_v22, %s483_s12  ;;  %v636_v1 = vmax.bf16 %v454_v63, %v137_v62  ;;  %v457_v4 = vld [vmem:[%s508_s11 + $0xbc] sm:$0x7]  ;;  %v139_v5 = vld [vmem:[%s508_s11 + $0xb0] sm:$0xf]  ;;  %v456_v6 = vld [vmem:[%s508_s11 + $0xb8] sm:$0xf] }
  0x21   : > { %242 = vrot.lane.b32.xlu0 %v552_v23, %s483_s12  ;;  %v644_v8 = vmax.bf16 %v457_v4, %v140_v2  ;;  %v648_v9 = vmax.bf16 %v456_v6, %v139_v5  ;;  %v142_v12 = vld [vmem:[%s508_s11 + $0xc4] sm:$0x7]  ;;  %v459_v13 = vld [vmem:[%s508_s11 + $0xcc] sm:$0x7]  ;;  %v141_v14 = vld [vmem:[%s508_s11 + $0xc0] sm:$0xf] }
  0x22   : > { %v458_v15 = vld [vmem:[%s508_s11 + $0xc8] sm:$0xf]  ;;  %v656_v18 = vmax.bf16 %v459_v13, %v142_v12  ;;  %v144_v20 = vld [vmem:[%s508_s11 + $0xd4] sm:$0x7]  ;;  %v461_v21 = vld [vmem:[%s508_s11 + $0xdc] sm:$0x7] }
  0x23   : > { %v660_v19 = vmax.bf16 %v458_v15, %v141_v14  ;;  %v143_v24 = vld [vmem:[%s508_s11 + $0xd0] sm:$0xf]  ;;  %v460_v25 = vld [vmem:[%s508_s11 + $0xd8] sm:$0xf]  ;;  %v668_v26 = vmax.bf16 %v461_v21, %v144_v20 }
  0x24   : > { %248 = vrot.lane.b32.xlu1 %v560_v28, %s483_s12  ;;  %v672_v27 = vmax.bf16 %v460_v25, %v143_v24 }
  0x25   : > { %246 = vrot.lane.b32.xlu0 %v564_v29, %s483_s12 }
  0x28   : > { %252 = vrot.lane.b32.xlu1 %v572_v34, %s483_s12 }
  0x29   : > { %250 = vrot.lane.b32.xlu0 %v576_v35, %s483_s12 }
  0x2c   : > { %256 = vrot.lane.b32.xlu1 %v584_v40, %s483_s12 }
  0x2d   : > { %254 = vrot.lane.b32.xlu0 %v588_v41, %s483_s12 }
  0x30   : > { %260 = vrot.lane.b32.xlu1 %v596_v46, %s483_s12 }
  0x31   : > { %258 = vrot.lane.b32.xlu0 %v600_v47, %s483_s12 }
  0x34   : > { %264 = vrot.lane.b32.xlu1 %v608_v52, %s483_s12 }
  0x35   : > { %262 = vrot.lane.b32.xlu0 %v612_v53, %s483_s12 }
  0x38   : > { %268 = vrot.lane.b32.xlu1 %v620_v58, %s483_s12 }
  0x39   : > { %266 = vrot.lane.b32.xlu0 %v624_v59, %s483_s12 }
  0x3c   : > { %272 = vrot.lane.b32.xlu1 %v632_v0, %s483_s12 }
  0x3d   : > { %270 = vrot.lane.b32.xlu0 %v636_v1, %s483_s12 }
  0x40   : > { %276 = vrot.lane.b32.xlu1 %v644_v8, %s483_s12 }
  0x41   : > { %274 = vrot.lane.b32.xlu0 %v648_v9, %s483_s12 }
  0x44   : > { %280 = vrot.lane.b32.xlu1 %v656_v18, %s483_s12 }
  0x45   : > { %278 = vrot.lane.b32.xlu0 %v660_v19, %s483_s12 }
  0x48   : > { %284 = vrot.lane.b32.xlu1 %v668_v26, %s483_s12 }
  0x49   : > { %282 = vrot.lane.b32.xlu0 %v672_v27, %s483_s12 }
  0x86   : > { %v235_v30 = vpop.permute.xlu1 %234 }
  0x87   : > { %v316_v31 = vmax.bf16 %v235_v30, %v513_v3  ;;  %v231_v32 = vpop.permute.xlu0 %230 }
  0x88   : > { %v314_v33 = vmax.bf16 %v231_v32, %v518_v7 }
  0x89   : > { %346 = vst.msk [vmem:[%s682_s16 + $0x8] sm:$0xf] %vm342_vm0, %v316_v31 }
  0x8a   : > { %343 = vst.msk [vmem:[%s682_s16] sm:$0xf] %vm342_vm0, %v314_v33  ;;  %v237_v36 = vpop.permute.xlu1 %236 }
  0x8b   : > { %v317_v37 = vmax.bf16 %v237_v36, %v524_v10  ;;  %v233_v38 = vpop.permute.xlu0 %232 }
  0x8c   : > { %v315_v39 = vmax.bf16 %v233_v38, %v528_v11 }
  0x8d   : > { %347 = vst.msk [vmem:[%s682_s16 + $0xc] sm:$0x7] %vm344_vm1, %v317_v37 }
  0x8e   : > { %345 = vst.msk [vmem:[%s682_s16 + $0x4] sm:$0x7] %vm344_vm1, %v315_v39  ;;  %v241_v3 = vpop.permute.xlu1 %240 }
  0x8f   : > { %v319_v7 = vmax.bf16 %v241_v3, %v536_v16  ;;  %v239_v42 = vpop.permute.xlu0 %238 }
  0x90   : > { %v318_v43 = vmax.bf16 %v239_v42, %v540_v17 }
  0x91   : > { %349 = vst.msk [vmem:[%s682_s16 + $0x14] sm:$0x7] %vm344_vm1, %v319_v7 }
  0x92   : > { %348 = vst.msk [vmem:[%s682_s16 + $0x10] sm:$0xf] %vm342_vm0, %v318_v43  ;;  %v245_v10 = vpop.permute.xlu1 %244 }
  0x93   : > { %v321_v11 = vmax.bf16 %v245_v10, %v548_v22  ;;  %v243_v44 = vpop.permute.xlu0 %242 }
  0x94   : > { %v320_v45 = vmax.bf16 %v243_v44, %v552_v23 }
  0x95   : > { %351 = vst.msk [vmem:[%s682_s16 + $0x1c] sm:$0x7] %vm344_vm1, %v321_v11 }
  0x96   : > { %350 = vst.msk [vmem:[%s682_s16 + $0x18] sm:$0xf] %vm342_vm0, %v320_v45  ;;  %v249_v16 = vpop.permute.xlu1 %248 }
  0x97   : > { %v323_v17 = vmax.bf16 %v249_v16, %v560_v28  ;;  %v247_v48 = vpop.permute.xlu0 %246 }
  0x98   : > { %v322_v49 = vmax.bf16 %v247_v48, %v564_v29 }
  0x99   : > { %353 = vst.msk [vmem:[%s682_s16 + $0x24] sm:$0x7] %vm344_vm1, %v323_v17 }
  0x9a   : > { %352 = vst.msk [vmem:[%s682_s16 + $0x20] sm:$0xf] %vm342_vm0, %v322_v49  ;;  %v253_v22 = vpop.permute.xlu1 %252 }
  0x9b   : > { %v325_v23 = vmax.bf16 %v253_v22, %v572_v34  ;;  %v251_v50 = vpop.permute.xlu0 %250 }
  0x9c   : > { %v324_v51 = vmax.bf16 %v251_v50, %v576_v35 }
  0x9d   : > { %355 = vst.msk [vmem:[%s682_s16 + $0x2c] sm:$0x7] %vm344_vm1, %v325_v23 }
  0x9e   : > { %354 = vst.msk [vmem:[%s682_s16 + $0x28] sm:$0xf] %vm342_vm0, %v324_v51  ;;  %v257_v28 = vpop.permute.xlu1 %256 }
  0x9f   : > { %v327_v29 = vmax.bf16 %v257_v28, %v584_v40  ;;  %v255_v54 = vpop.permute.xlu0 %254 }
  0xa0   : > { %v326_v55 = vmax.bf16 %v255_v54, %v588_v41 }
  0xa1   : > { %357 = vst.msk [vmem:[%s682_s16 + $0x34] sm:$0x7] %vm344_vm1, %v327_v29 }
  0xa2   : > { %356 = vst.msk [vmem:[%s682_s16 + $0x30] sm:$0xf] %vm342_vm0, %v326_v55  ;;  %v261_v34 = vpop.permute.xlu1 %260 }
  0xa3   : > { %v329_v35 = vmax.bf16 %v261_v34, %v596_v46  ;;  %v259_v56 = vpop.permute.xlu0 %258 }
  0xa4   : > { %v328_v57 = vmax.bf16 %v259_v56, %v600_v47 }
  0xa5   : > { %359 = vst.msk [vmem:[%s682_s16 + $0x3c] sm:$0x7] %vm344_vm1, %v329_v35 }
  0xa6   : > { %358 = vst.msk [vmem:[%s682_s16 + $0x38] sm:$0xf] %vm342_vm0, %v328_v57  ;;  %v265_v40 = vpop.permute.xlu1 %264 }
  0xa7   : > { %v331_v41 = vmax.bf16 %v265_v40, %v608_v52  ;;  %v263_v60 = vpop.permute.xlu0 %262 }
  0xa8   : > { %v330_v61 = vmax.bf16 %v263_v60, %v612_v53 }
  0xa9   : > { %361 = vst.msk [vmem:[%s682_s16 + $0x44] sm:$0x7] %vm344_vm1, %v331_v41 }
  0xaa   : > { %360 = vst.msk [vmem:[%s682_s16 + $0x40] sm:$0xf] %vm342_vm0, %v330_v61  ;;  %v269_v46 = vpop.permute.xlu1 %268 }
  0xab   : > { %v333_v47 = vmax.bf16 %v269_v46, %v620_v58  ;;  %v267_v62 = vpop.permute.xlu0 %266 }
  0xac   : > { %v332_v63 = vmax.bf16 %v267_v62, %v624_v59 }
  0xad   : > { %363 = vst.msk [vmem:[%s682_s16 + $0x4c] sm:$0x7] %vm344_vm1, %v333_v47 }
  0xae   : > { %362 = vst.msk [vmem:[%s682_s16 + $0x48] sm:$0xf] %vm342_vm0, %v332_v63  ;;  %v273_v52 = vpop.permute.xlu1 %272 }
  0xaf   : > { %v335_v53 = vmax.bf16 %v273_v52, %v632_v0  ;;  %v271_v2 = vpop.permute.xlu0 %270 }
  0xb0   : > { %v334_v4 = vmax.bf16 %v271_v2, %v636_v1 }
  0xb1   : > { %365 = vst.msk [vmem:[%s682_s16 + $0x54] sm:$0x7] %vm344_vm1, %v335_v53 }
  0xb2   : > { %364 = vst.msk [vmem:[%s682_s16 + $0x50] sm:$0xf] %vm342_vm0, %v334_v4  ;;  %v277_v58 = vpop.permute.xlu1 %276 }
  0xb3   : > { %v337_v59 = vmax.bf16 %v277_v58, %v644_v8  ;;  %v275_v5 = vpop.permute.xlu0 %274 }
  0xb4   : > { %v336_v6 = vmax.bf16 %v275_v5, %v648_v9 }
  0xb5   : > { %367 = vst.msk [vmem:[%s682_s16 + $0x5c] sm:$0x7] %vm344_vm1, %v337_v59 }
  0xb6   : > { %366 = vst.msk [vmem:[%s682_s16 + $0x58] sm:$0xf] %vm342_vm0, %v336_v6  ;;  %v281_v0 = vpop.permute.xlu1 %280 }
  0xb7   : > { %v339_v12 = vmax.bf16 %v281_v0, %v656_v18  ;;  %v279_v1 = vpop.permute.xlu0 %278 }
  0xb8   : > { %v338_v13 = vmax.bf16 %v279_v1, %v660_v19 }
  0xb9   : > { %369 = vst.msk [vmem:[%s682_s16 + $0x64] sm:$0x7] %vm344_vm1, %v339_v12 }
  0xba   : > { %368 = vst.msk [vmem:[%s682_s16 + $0x60] sm:$0xf] %vm342_vm0, %v338_v13  ;;  %v285_v14 = vpop.permute.xlu1 %284 }
  0xbb   : > { %v341_v8 = vmax.bf16 %v285_v14, %v668_v26  ;;  %v283_v15 = vpop.permute.xlu0 %282 }
  0xbc   : > { %v340_v9 = vmax.bf16 %v283_v15, %v672_v27 }
  0xbd   : > { %371 = vst.msk [vmem:[%s682_s16 + $0x6c] sm:$0x7] %vm344_vm1, %v341_v8 }
  0xbe   : > { %370 = vst.msk [vmem:[%s682_s16 + $0x68] sm:$0xf] %vm342_vm0, %v340_v9 }
  0xbf PF: > { %s11_s6 = sadd.s32 1, %s481_s6  }
  0xc0   : > { %p8_p4 = scmp.ge.s32.totalorder %s11_s6, 4  }
  0xc2   :  { %10 = sbr.rel (!%p8_p4) target bundleno = 1 (0x1), region = 55 }

// kernel: image_classifier_forward.10
= control target key start
LH: loop header
LB: loop body
LE: loop exit
PB: predicated region body
PF: predicated region fallthrough
CT: control target
= control target key end

     0   :  { %s1197_s12 = smov 0   ;;  %s1353_s0 = inlined_call_operand.vmem [shape: bf16[2,14,14,32], index: 0, kind: input, shape index: {}]   ;;  %s1354_s1 = inlined_call_operand.vmem [shape: bf16[3,3,32,64], index: 1, kind: input, shape index: {}]   ;;  %s1355_s2 = inlined_call_operand.vmem [shape: f32[1,64], index: 2, kind: input, shape index: {}]   ;;  %s1356_s3 = inlined_call_operand.vmem [shape: bf16[2,12,12,64], index: 3, kind: output, shape index: {}]  }
   0x1 LB: > { %s916_s13 = sadd.s32 4294967295, %s1169_s12   ;;  %p920_p0 = scmp.ge.s32.totalorder %s1169_s12, 1  ;;  %s1169_s12 = sphi %s1197_s12, %s13_s12  }
   0x2   : > { %p137_p1 = scmp.lt.s32.totalorder %s1169_s12, 3 }
   0x4   : > { %p138_p2 = pnand %p920_p0, %p137_p1 }
   0x5   : > { %p161_p3 = scmp.lt.s32.totalorder (!%p138_p2), %s916_s13, 1  ;;  %v1208_v0 = vld [vmem:[%s1355_s2] ss:$0 sm:$0xff] (!%p138_p2)  ;;  %s1220_s24 = smov (!%p138_p2), 0  }
   0x6   : > { %141 = sbr.rel (%p138_p2) target bundleno = 285 (0x11d), region = 32 }
   0xd   : > { %s1358_s13 = smov (!%p161_p3, %s916_s13), 1 }
   0xe   : > { %s1112_s16 = smul.u32 112, %s1358_s13 }
   0xf   : > { %s1113_s17 = smul.u32 96, %s1358_s13 }
  0x10   : > { %s1213_s20 = scalar_lea.vmem %s1353_s0, %s1112_s16 }
  0x11   : > { %s1218_s23 = scalar_lea.vmem %s1356_s3, %s1113_s17 }
  0x12 LB: >> { %v1132_v1 = vld [vmem:[%s1354_s1 + $0x10] sm:$0xff]   ;;  %v1175_v2 = vmov 0.0   ;;  %v1133_v3 = vld [vmem:[%s1354_s1] sm:$0xff]   ;;  %v1134_v4 = vld [vmem:[%s1354_s1 + $0x18] sm:$0xff]   ;;  %vm1176_vm0 = vmmov 0   ;;  %s1009_s4 = sshll.u32 %s1173_s24, 3  ;;  %s1173_s24 = sphi %s1220_s24, %s178_s24  }
  0x13   : >> { %1040 = vmatprep.subr.bf16.mxu0 %v1175_v2  ;;  %1048 = vmatprep.subr.bf16.mxu1 %v1175_v2  ;;  %v1135_v5 = vld [vmem:[%s1354_s1 + $0x8] sm:$0xff]   ;;  %s1246_s7 = scalar_lea.vmem %s1213_s20, %s1009_s4  ;;  %vm218_vm1 = vcmask 261120   ;;  %v1139_v11 = vld [vmem:[%s1354_s1 + $0x30] sm:$0xff]   ;;  %v1138_v15 = vld [vmem:[%s1354_s1 + $0x20] sm:$0xff]   ;;  %vm842_vm2 = vcmask 519168   ;;  %vm844_vm3 = vcmask 517120  }
  0x14   : >> { %1041 = vmatpush3.bf16.msra.mxu0 %v1132_v1  ;;  %1044 = vmatprep.mubr.msk.bf16.mxu0 %vm1176_vm0, %v1175_v2  ;;  %v182_v6 = vld [vmem:[%s1246_s7] sm:$0xf]  ;;  %v188_v7 = vld [vmem:[%s1246_s7 + $0x4] sm:$0x7]  ;;  %v1141_v16 = vld [vmem:[%s1354_s1 + $0x38] sm:$0xff]   ;;  %s178_s24 = sadd.s32 1, %s1173_s24  }
  0x15   : >> { %1049 = vmatpush3.bf16.msra.mxu1 %v1133_v3  ;;  %1042 = vmatprep.subr.bf16.mxu0 %v1175_v2  ;;  %v183_v8 = vld [vmem:[%s1246_s7 + $0x4] sm:$0x3]  ;;  %v929_v9 = vcombine.low %v182_v6, %v188_v7  ;;  %v322_v17 = vld [vmem:[%s1246_s7] sm:$0xe]  ;;  %v946_v18 = vld [vmem:[%s1246_s7 + $0x8] sm:$0xf] }
  0x16   : >> { %1050 = vmatprep.subr.bf16.mxu1 %v1175_v2  ;;  %1052 = vmatprep.mubr.msk.bf16.mxu1 %vm1176_vm0, %v1175_v2  ;;  %v933_v10 = vcombine.low %v182_v6, %v183_v8  ;;  %v947_v20 = vld [vmem:[%s1246_s7 + $0xc] sm:$0x3]  ;;  %v941_v22 = vcombine.low %v322_v17, %v188_v7  ;;  %v1146_v26 = vld [vmem:[%s1354_s1 + $0x50] sm:$0xff]   ;;  %v965_v27 = vld [vmem:[%s1246_s7 + $0x8] sm:$0xe]  ;;  %p175_p4 = scmp.ge.s32.totalorder %s178_s24, 12  }
  0x17   : >> { %v200_v12 = vshrl.u32 %v929_v9, 16  ;;  %v202_v13 = vshll.u32 %v929_v9, 16  ;;  %v956_v21 = vld [vmem:[%s1246_s7 + $0xc] sm:$0x7]  ;;  %v952_v25 = vcombine.low %v946_v18, %v947_v20  ;;  %v1143_v30 = vld [vmem:[%s1354_s1 + $0x40] sm:$0xff]   ;;  %v1148_v32 = vld [vmem:[%s1354_s1 + $0x58] sm:$0xff]  }
  0x18   : >> { %1043 = vmatpush3.bf16.msra.mxu0 %v1134_v4  ;;  %v961_v23 = vcombine.low %v946_v18, %v956_v21  ;;  %v1140_v24 = vld [vmem:[%s1354_s1 + $0x28] sm:$0xff]   ;;  %v331_v28 = vrot.slane %v941_v22, 1  ;;  %v970_v31 = vcombine.low %v965_v27, %v956_v21  ;;  %v975_v33 = vld [vmem:[%s1246_s7 + $0x10] sm:$0xf]  ;;  %v985_v34 = vld [vmem:[%s1246_s7 + $0x14] sm:$0x7] }
  0x19   : >> { %1051 = vmatpush3.bf16.msra.mxu1 %v1135_v5  ;;  %1056 = vmatprep.subr.bf16.mxu0 %v1175_v2  ;;  %v204_v14 = vrot.slane %v202_v13, 1  ;;  %v990_v35 = vcombine.low %v975_v33, %v985_v34  ;;  %v1147_v38 = vld [vmem:[%s1354_s1 + $0x48] sm:$0xff]   ;;  %v1151_v41 = vld [vmem:[%s1354_s1 + $0x70] sm:$0xff]   ;;  %v1149_v43 = vld [vmem:[%s1354_s1 + $0x60] sm:$0xff]  }
  0x1a   : >> { %1064 = vmatprep.subr.bf16.mxu1 %v1175_v2  ;;  %v476_v29 = vshll.u32 %v961_v23, 16  ;;  %v474_v36 = vshrl.u32 %v961_v23, 16  ;;  %v547_v39 = vrot.slane %v970_v31, 1  ;;  %v1153_v46 = vld [vmem:[%s1354_s1 + $0x78] sm:$0xff]   ;;  %v1152_v47 = vld [vmem:[%s1354_s1 + $0x68] sm:$0xff]   ;;  %v1156_v51 = vld [vmem:[%s1354_s1 + $0x80] sm:$0xff]  }
  0x1b   : >> { %v205_v19 = vor.u32 %v204_v14, %v200_v12  ;;  %v692_v40 = vshll.u32 %v990_v35, 16  ;;  %v690_v44 = vshrl.u32 %v990_v35, 16  ;;  %v976_v48 = vld [vmem:[%s1246_s7 + $0x14] sm:$0x3]  ;;  %v994_v52 = vld [vmem:[%s1246_s7 + $0x10] sm:$0xe]  ;;  %s841_s7 = scalar_lea.vmem %s1218_s23, %s1009_s4 }
  0x1c   : >> { %1053 = vmatmul.mubr.msk.bf16.vlgmr.msra.gmra.mrb[0].mxu1 %vm218_vm1, %v933_v10  ;;  %v478_v37 = vrot.slane %v476_v29, 1  ;;  %v981_v50 = vcombine.low %v975_v33, %v976_v48  ;;  %v999_v53 = vcombine.low %v994_v52, %v985_v34  ;;  %v1157_v54 = vld [vmem:[%s1354_s1 + $0x88] sm:$0xff]  }
  0x1d   : >> { %1065 = vmatpush3.bf16.msra.mxu1 %v1139_v11  ;;  %1068 = vmatprep.mubr.msk.bf16.mxu1 %vm1176_vm0, %v1175_v2  ;;  %v694_v45 = vrot.slane %v692_v40, 1 }
  0x1e   : >> { %1066 = vmatprep.subr.bf16.mxu1 %v1175_v2  ;;  %1045 = vmatmul.mubr.msk.bf16.vlgmr.msra.gmra.mrb[0].mxu0 %vm218_vm1, %v205_v19  ;;  %v479_v42 = vor.u32 %v478_v37, %v474_v36  ;;  %v763_v55 = vrot.slane %v999_v53, 1 }
  0x1f   : >> { %1057 = vmatpush3.bf16.msra.mxu0 %v1138_v15  ;;  %1060 = vmatprep.mubr.msk.bf16.mxu0 %vm1176_vm0, %v1175_v2  ;;  %v695_v49 = vor.u32 %v694_v45, %v690_v44 }
  0x20   : >> { %1058 = vmatprep.subr.bf16.mxu0 %v1175_v2 }
  0x21   : >> { %1067 = vmatpush3.bf16.msra.mxu1 %v1141_v16 }
  0x22   : >> { %1080 = vmatprep.subr.bf16.mxu1 %v1175_v2 }
  0x23   : >> { %1059 = vmatpush3.bf16.msra.mxu0 %v1140_v24 }
  0x24   : >> { %1069 = vmatmul.mubr.msk.bf16.vlgmr.msra.gmra.mrb[4].mxu1 %vm218_vm1, %v952_v25  ;;  %1072 = vmatprep.subr.bf16.mxu0 %v1175_v2 }
  0x25   : >> { %1081 = vmatpush3.bf16.msra.mxu1 %v1146_v26  ;;  %1084 = vmatprep.mubr.msk.bf16.mxu1 %vm1176_vm0, %v1175_v2 }
  0x26   : >> { %1082 = vmatprep.subr.bf16.mxu1 %v1175_v2  ;;  %1061 = vmatmul.mubr.msk.bf16.vlgmr.msra.gmra.mrb[4].mxu0 %vm218_vm1, %v331_v28 }
  0x27   : >> { %1073 = vmatpush3.bf16.msra.mxu0 %v1143_v30  ;;  %1076 = vmatprep.mubr.msk.bf16.mxu0 %vm1176_vm0, %v1175_v2 }
  0x28   : >> { %1074 = vmatprep.subr.bf16.mxu0 %v1175_v2 }
  0x29   : >> { %1083 = vmatpush3.bf16.msra.mxu1 %v1148_v32 }
  0x2a   : >> { %1096 = vmatprep.subr.bf16.mxu1 %v1175_v2 }
  0x2b   : >> { %1075 = vmatpush3.bf16.msra.mxu0 %v1147_v38 }
  0x2c   : >> { %1085 = vmatmul.mubr.msk.bf16.vlgmr.msra.gmra.mrb[8].mxu1 %vm218_vm1, %v547_v39  ;;  %1088 = vmatprep.subr.bf16.mxu0 %v1175_v2 }
  0x2d   : >> { %1097 = vmatpush3.bf16.msra.mxu1 %v1151_v41  ;;  %1100 = vmatprep.mubr.msk.bf16.mxu1 %vm1176_vm0, %v1175_v2 }
  0x2e   : >> { %1098 = vmatprep.subr.bf16.mxu1 %v1175_v2  ;;  %1077 = vmatmul.mubr.msk.bf16.vlgmr.msra.gmra.mrb[8].mxu0 %vm218_vm1, %v479_v42 }
  0x2f   : >> { %1089 = vmatpush3.bf16.msra.mxu0 %v1149_v43  ;;  %1092 = vmatprep.mubr.msk.bf16.mxu0 %vm1176_vm0, %v1175_v2 }
  0x30   : >> { %1090 = vmatprep.subr.bf16.mxu0 %v1175_v2 }
  0x31   : >> { %1099 = vmatpush3.bf16.msra.mxu1 %v1153_v46 }
  0x33   : >> { %1091 = vmatpush3.bf16.msra.mxu0 %v1152_v47 }
  0x34   : >> { %1101 = vmatmul.mubr.msk.bf16.vlgmr.msra.gmra.mrb[12].mxu1 %vm218_vm1, %v695_v49  ;;  %1104 = vmatprep.subr.bf16.mxu0 %v1175_v2 }
  0x36   : >> { %1093 = vmatmul.mubr.msk.bf16.vlgmr.msra.gmra.mrb[12].mxu0 %vm218_vm1, %v981_v50 }
  0x37   : >> { %1105 = vmatpush3.bf16.msra.mxu0 %v1156_v51  ;;  %1108 = vmatprep.mubr.msk.bf16.mxu0 %vm1176_vm0, %v1175_v2 }
  0x38   : >> { %1106 = vmatprep.subr.bf16.mxu0 %v1175_v2 }
  0x3b   : >> { %1107 = vmatpush3.bf16.msra.mxu0 %v1157_v54 }
  0x3e   : >> { %1109 = vmatmul.mubr.msk.bf16.vlgmr.msra.gmra.mrb[16].mxu0 %vm218_vm1, %v763_v55 }
  0xef   : >> { %v315_v56 = vpop.f32.mrb[0].mxu1 }
  0xf0   : >> { %v1054_v57 = vpop.f32.mrb[1].mxu1 }
  0xf1   : >> { %v318_v58 = vpop.f32.mrb[2].mxu1  ;;  %v256_v59 = vpop.f32.mrb[0].mxu0 }
  0xf2   : >> { %v1055_v60 = vpop.f32.mrb[3].mxu1  ;;  %v316_v61 = vadd.f32 %v315_v56, %v256_v59  ;;  %v1046_v62 = vpop.f32.mrb[1].mxu0 }
  0xf3   : >> { %v259_v63 = vpop.f32.mrb[2].mxu0 }
  0xf4   : >> { %v319_v1 = vadd.f32 %v318_v58, %v259_v63  ;;  %v1047_v3 = vpop.f32.mrb[3].mxu0 }
  0xf7   : >> { %v455_v4 = vpop.f32.mrb[4].mxu1 }
  0xf8   : >> { %v1070_v5 = vpop.f32.mrb[5].mxu1 }
  0xf9   : >> { %v458_v6 = vpop.f32.mrb[6].mxu1  ;;  %v381_v7 = vpop.f32.mrb[4].mxu0 }
  0xfa   : >> { %v1071_v8 = vpop.f32.mrb[7].mxu1  ;;  %v388_v2 = vadd.f32 %v381_v7, %v316_v61  ;;  %v1062_v9 = vpop.f32.mrb[5].mxu0 }
  0xfb   : >> { %v384_v10 = vpop.f32.mrb[6].mxu0 }
  0xfc   : >> { %v389_v11 = vadd.f32 %v384_v10, %v319_v1  ;;  %v462_v12 = vadd.f32 %v455_v4, %v388_v2  ;;  %v1063_v13 = vpop.f32.mrb[7].mxu0 }
  0xfe   : >> { %v463_v14 = vadd.f32 %v458_v6, %v389_v11 }
  0xff   : >> { %v597_v15 = vpop.f32.mrb[8].mxu1 }
 0x100   : >> { %v1086_v16 = vpop.f32.mrb[9].mxu1 }
 0x101   : >> { %v600_v17 = vpop.f32.mrb[10].mxu1  ;;  %v529_v18 = vpop.f32.mrb[8].mxu0 }
 0x102   : >> { %v1087_v19 = vpop.f32.mrb[11].mxu1  ;;  %v536_v20 = vadd.f32 %v529_v18, %v462_v12  ;;  %v1078_v21 = vpop.f32.mrb[9].mxu0 }
 0x103   : >> { %v532_v22 = vpop.f32.mrb[10].mxu0 }
 0x104   : >> { %v537_v23 = vadd.f32 %v532_v22, %v463_v14  ;;  %v604_v24 = vadd.f32 %v597_v15, %v536_v20  ;;  %v1079_v25 = vpop.f32.mrb[11].mxu0 }
 0x106   : >> { %v605_v26 = vadd.f32 %v600_v17, %v537_v23 }
 0x107   : >> { %v745_v27 = vpop.f32.mrb[12].mxu1 }
 0x108   : >> { %v1102_v28 = vpop.f32.mrb[13].mxu1 }
 0x109   : >> { %v748_v29 = vpop.f32.mrb[14].mxu1  ;;  %v671_v30 = vpop.f32.mrb[12].mxu0 }
 0x10a   : >> { %v1103_v31 = vpop.f32.mrb[15].mxu1  ;;  %v678_v32 = vadd.f32 %v671_v30, %v604_v24  ;;  %v1094_v33 = vpop.f32.mrb[13].mxu0 }
 0x10b   : >> { %v674_v34 = vpop.f32.mrb[14].mxu0 }
 0x10c   : >> { %v679_v35 = vadd.f32 %v674_v34, %v605_v26  ;;  %v752_v36 = vadd.f32 %v745_v27, %v678_v32  ;;  %v1095_v37 = vpop.f32.mrb[15].mxu0 }
 0x10e   : >> { %v753_v38 = vadd.f32 %v748_v29, %v679_v35 }
 0x111   : >> { %v813_v39 = vpop.f32.mrb[16].mxu0 }
 0x112   : >> { %v820_v40 = vadd.f32 %v813_v39, %v752_v36  ;;  %v1110_v41 = vpop.f32.mrb[17].mxu0 }
 0x113   : >> { %v816_v42 = vpop.f32.mrb[18].mxu0 }
 0x114   : >> { %v828_v43 = vadd.f32 %v1208_v0, %v820_v40  ;;  %v821_v44 = vadd.f32 %v816_v42, %v753_v38  ;;  %v1111_v45 = vpop.f32.mrb[19].mxu0 }
 0x116   : >> { %v830_v46 = vmax.f32 %v828_v43, 0.0  ;;  %v829_v47 = vadd.f32 %v1208_v0, %v821_v44  ;;  %177 = sbr.rel (!%p175_p4) target bundleno = 18 (0x12), region = 81 }
 0x118   : >> { %v1010_v48 = vpack.c.bf16 %v830_v46, %v830_v46  ;;  %v831_v49 = vmax.f32 %v829_v47, 0.0 }
 0x11a   : >> { %843 = vst.msk [vmem:[%s841_s7] sm:$0xf] %vm842_vm2, %v1010_v48  ;;  %v1011_v50 = vpack.c.bf16 %v831_v49, %v831_v49 }
 0x11c   : >> { %845 = vst.msk [vmem:[%s841_s7 + $0x4] sm:$0x3] %vm844_vm3, %v1011_v50 }
 0x11d PF: > { %s13_s12 = sadd.s32 1, %s1169_s12  }
 0x11e   : > { %p10_p5 = scmp.ge.s32.totalorder %s13_s12, 4  }
 0x120   :  { %12 = sbr.rel (!%p10_p5) target bundleno = 1 (0x1), region = 92 }

// kernel: image_classifier_forward.11
= control target key start
LH: loop header
LB: loop body
LE: loop exit
PB: predicated region body
PF: predicated region fallthrough
CT: control target
= control target key end

     0   :  { %s1463_s12 = smov 0   ;;  %s1691_s0 = inlined_call_operand.vmem [shape: bf16[2,12,12,64], index: 0, kind: input, shape index: {}]   ;;  %s1692_s1 = inlined_call_operand.vmem [shape: bf16[3,3,64,64], index: 1, kind: input, shape index: {}]   ;;  %s1693_s2 = inlined_call_operand.vmem [shape: f32[1,64], index: 2, kind: input, shape index: {}]   ;;  %s1694_s3 = inlined_call_operand.vmem [shape: bf16[2,10,10,64], index: 3, kind: output, shape index: {}]  }
   0x1 LB: > { %s1060_s13 = sadd.s32 4294967295, %s1435_s12   ;;  %p1064_p0 = scmp.ge.s32.totalorder %s1435_s12, 1  ;;  %s1435_s12 = sphi %s1463_s12, %s13_s12  }
   0x2   : > { %p137_p1 = scmp.lt.s32.totalorder %s1435_s12, 3 }
   0x4   : > { %p138_p2 = pnand %p1064_p0, %p137_p1 }
   0x5   : > { %p161_p3 = scmp.lt.s32.totalorder (!%p138_p2), %s1060_s13, 1  ;;  %v1474_v0 = vld [vmem:[%s1693_s2] ss:$0 sm:$0xff] (!%p138_p2)  ;;  %s1486_s24 = smov (!%p138_p2), 0  }
   0x6   : > { %141 = sbr.rel (%p138_p2) target bundleno = 322 (0x142), region = 32 }
   0xd   : > { %s1696_s13 = smov (!%p161_p3, %s1060_s13), 1 }
   0xe   : > { %s1360_s16 = smul.u32 96, %s1696_s13 }
   0xf   : > { %s1361_s17 = smul.u32 80, %s1696_s13 }
  0x10   : > { %s1479_s20 = scalar_lea.vmem %s1691_s0, %s1360_s16 }
  0x11   : > { %s1484_s23 = scalar_lea.vmem %s1694_s3, %s1361_s17 }
  0x12 LB: >> { %v1380_v1 = vld [vmem:[%s1692_s1 + $0x20] sm:$0xff]   ;;  %v1441_v2 = vmov 0.0   ;;  %v1382_v4 = vld [vmem:[%s1692_s1 + $0x28] sm:$0xff]   ;;  %vm1442_vm0 = vmmov 0   ;;  %s1203_s4 = sshll.u32 %s1439_s24, 3  ;;  %v1384_v6 = vld [vmem:[%s1692_s1 + $0x30] sm:$0xff]   ;;  %s1439_s24 = sphi %s1486_s24, %s178_s24  }
  0x13   : >> { %1252 = vmatprep.subr.bf16.mxu0 %v1441_v2  ;;  %1264 = vmatprep.subr.bf16.mxu1 %v1441_v2  ;;  %v1381_v3 = vld [vmem:[%s1692_s1] sm:$0xff]   ;;  %v1383_v5 = vld [vmem:[%s1692_s1 + $0x8] sm:$0xff]   ;;  %s1515_s7 = scalar_lea.vmem %s1479_s20, %s1203_s4  ;;  %v1385_v7 = vld [vmem:[%s1692_s1 + $0x10] sm:$0xff]   ;;  %vm238_vm1 = vcmask 523264   ;;  %vm986_vm2 = vcmask 519168   ;;  %vm988_vm3 = vcmask 516096  }
  0x14   : >> { %1253 = vmatpush3.bf16.msra.mxu0 %v1380_v1  ;;  %1260 = vmatprep.mubr.msk.bf16.mxu0 %vm1442_vm0, %v1441_v2  ;;  %v1386_v8 = vld [vmem:[%s1692_s1 + $0x38] sm:$0xff]   ;;  %v182_v9 = vld [vmem:[%s1515_s7] sm:$0xf]  ;;  %v192_v10 = vld [vmem:[%s1515_s7 + $0x4] sm:$0x3]  ;;  %s178_s24 = sadd.s32 1, %s1439_s24  }
  0x15   : >> { %1265 = vmatpush3.bf16.msra.mxu1 %v1381_v3  ;;  %1254 = vmatprep.subr.bf16.mxu0 %v1441_v2  ;;  %v1387_v11 = vld [vmem:[%s1692_s1 + $0x18] sm:$0xff]   ;;  %v1077_v12 = vcombine.low %v182_v9, %v192_v10  ;;  %v183_v13 = vld [vmem:[%s1515_s7 + $0x4] sm:$0x1]  ;;  %v1392_v21 = vld [vmem:[%s1692_s1 + $0x48] sm:$0xff]   ;;  %p175_p4 = scmp.ge.s32.totalorder %s178_s24, 10  }
  0x16   : >> { %1266 = vmatprep.subr.bf16.mxu1 %v1441_v2  ;;  %1272 = vmatprep.mubr.msk.bf16.mxu1 %vm1442_vm0, %v1441_v2  ;;  %v1083_v17 = vcombine.low %v182_v9, %v183_v13  ;;  %v1390_v18 = vld [vmem:[%s1692_s1 + $0x40] sm:$0xff]   ;;  %v1393_v22 = vld [vmem:[%s1692_s1 + $0x68] sm:$0xff]   ;;  %v1394_v23 = vld [vmem:[%s1692_s1 + $0x50] sm:$0xff]  }
  0x17   : >> { %v208_v14 = vshrl.u32 %v1077_v12, 16  ;;  %v210_v15 = vshll.u32 %v1077_v12, 16  ;;  %v1391_v20 = vld [vmem:[%s1692_s1 + $0x60] sm:$0xff]   ;;  %v1395_v25 = vld [vmem:[%s1692_s1 + $0x70] sm:$0xff]   ;;  %v1396_v26 = vld [vmem:[%s1692_s1 + $0x58] sm:$0xff]  }
  0x18   : >> { %1255 = vmatpush3.bf16.msra.mxu0 %v1382_v4  ;;  %v354_v24 = vld [vmem:[%s1515_s7] sm:$0xe]  ;;  %v1397_v28 = vld [vmem:[%s1692_s1 + $0x78] sm:$0xff]   ;;  %v1104_v29 = vld [vmem:[%s1515_s7 + $0x8] sm:$0xf] }
  0x19   : >> { %1267 = vmatpush3.bf16.msra.mxu1 %v1383_v5  ;;  %1256 = vmatprep.subr.bf16.mxu0 %v1441_v2  ;;  %v212_v16 = vrot.slane %v210_v15, 1  ;;  %v1097_v27 = vcombine.low %v354_v24, %v192_v10  ;;  %v1105_v30 = vld [vmem:[%s1515_s7 + $0xc] sm:$0x1]  ;;  %v1399_v32 = vld [vmem:[%s1692_s1 + $0x80] sm:$0xff]   ;;  %v1405_v39 = vld [vmem:[%s1692_s1 + $0x90] sm:$0xff]  }
  0x1a   : >> { %1268 = vmatprep.subr.bf16.mxu1 %v1441_v2  ;;  %v1114_v33 = vcombine.low %v1104_v29, %v1105_v30  ;;  %v1120_v34 = vld [vmem:[%s1515_s7 + $0xc] sm:$0x3]  ;;  %v1402_v35 = vld [vmem:[%s1692_s1 + $0xa0] sm:$0xff]   ;;  %v1406_v41 = vld [vmem:[%s1692_s1 + $0xb0] sm:$0xff]  }
  0x1b   : >> { %v213_v19 = vor.u32 %v212_v16, %v208_v14  ;;  %v367_v31 = vrot.slane %v1097_v27, 1  ;;  %v1129_v36 = vcombine.low %v1104_v29, %v1120_v34  ;;  %v1403_v37 = vld [vmem:[%s1692_s1 + $0x88] sm:$0xff]   ;;  %v1407_v45 = vld [vmem:[%s1692_s1 + $0x98] sm:$0xff]   ;;  %v1409_v49 = vld [vmem:[%s1692_s1 + $0xc0] sm:$0xff]  }
  0x1c   : >> { %1257 = vmatpush3.bf16.msra.mxu0 %v1384_v6  ;;  %v1404_v38 = vld [vmem:[%s1692_s1 + $0xa8] sm:$0xff]   ;;  %v1408_v47 = vld [vmem:[%s1692_s1 + $0xb8] sm:$0xff]   ;;  %v1411_v51 = vld [vmem:[%s1692_s1 + $0xe0] sm:$0xff]  }
  0x1d   : >> { %1269 = vmatpush3.bf16.msra.mxu1 %v1385_v7  ;;  %1258 = vmatprep.subr.bf16.mxu0 %v1441_v2  ;;  %v544_v40 = vshll.u32 %v1129_v36, 16  ;;  %v1135_v42 = vld [vmem:[%s1515_s7 + $0x8] sm:$0xe]  ;;  %v542_v43 = vshrl.u32 %v1129_v36, 16  ;;  %v1151_v52 = vld [vmem:[%s1515_s7 + $0x10] sm:$0xf] }
  0x1e   : >> { %1270 = vmatprep.subr.bf16.mxu1 %v1441_v2  ;;  %v1144_v46 = vcombine.low %v1135_v42, %v1120_v34  ;;  %v1167_v53 = vld [vmem:[%s1515_s7 + $0x14] sm:$0x3]  ;;  %v1412_v54 = vld [vmem:[%s1692_s1 + $0xc8] sm:$0xff]   ;;  %v1416_v60 = vld [vmem:[%s1692_s1 + $0xd8] sm:$0xff]  }
  0x1f   : >> { %v546_v44 = vrot.slane %v544_v40, 1  ;;  %v1176_v55 = vcombine.low %v1151_v52, %v1167_v53  ;;  %v1413_v56 = vld [vmem:[%s1692_s1 + $0xe8] sm:$0xff]   ;;  %v1414_v57 = vld [vmem:[%s1692_s1 + $0xd0] sm:$0xff]   ;;  %v1417_v1 = vld [vmem:[%s1692_s1 + $0xf8] sm:$0xff]  }
  0x20   : >> { %1259 = vmatpush3.bf16.msra.mxu0 %v1386_v8  ;;  %v631_v50 = vrot.slane %v1144_v46, 1  ;;  %v1415_v59 = vld [vmem:[%s1692_s1 + $0xf0] sm:$0xff]   ;;  %v1420_v4 = vld [vmem:[%s1692_s1 + $0x100] sm:$0xff]   ;;  %v1421_v6 = vld [vmem:[%s1692_s1 + $0x108] sm:$0xff]  }
  0x21   : >> { %1271 = vmatpush3.bf16.msra.mxu1 %v1387_v11  ;;  %1276 = vmatprep.subr.bf16.mxu0 %v1441_v2  ;;  %v547_v48 = vor.u32 %v546_v44, %v542_v43  ;;  %v808_v58 = vshll.u32 %v1176_v55, 16  ;;  %v1152_v61 = vld [vmem:[%s1515_s7 + $0x14] sm:$0x1]  ;;  %v806_v62 = vshrl.u32 %v1176_v55, 16  ;;  %v1182_v8 = vld [vmem:[%s1515_s7 + $0x10] sm:$0xe]  ;;  %s985_s7 = scalar_lea.vmem %s1484_s23, %s1203_s4 }
  0x22   : >> { %1288 = vmatprep.subr.bf16.mxu1 %v1441_v2  ;;  %v1161_v3 = vcombine.low %v1151_v52, %v1152_v61  ;;  %v1422_v7 = vld [vmem:[%s1692_s1 + $0x110] sm:$0xff]   ;;  %v1191_v9 = vcombine.low %v1182_v8, %v1167_v53  ;;  %v1423_v10 = vld [vmem:[%s1692_s1 + $0x118] sm:$0xff]  }
  0x23   : >> { %1261 = vmatmul.mubr.msk.bf16.vlgmr.msra.gmra.mrb[0].mxu0 %vm238_vm1, %v213_v19  ;;  %v810_v63 = vrot.slane %v808_v58, 1 }
  0x24   : >> { %1273 = vmatmul.mubr.msk.bf16.vlgmr.msra.gmra.mrb[0].mxu1 %vm238_vm1, %v1083_v17  ;;  %1277 = vmatpush3.bf16.msra.mxu0 %v1390_v18  ;;  %v895_v11 = vrot.slane %v1191_v9, 1 }
  0x25   : >> { %1289 = vmatpush3.bf16.msra.mxu1 %v1391_v20  ;;  %1278 = vmatprep.subr.bf16.mxu0 %v1441_v2  ;;  %v811_v5 = vor.u32 %v810_v63, %v806_v62 }
  0x26   : >> { %1290 = vmatprep.subr.bf16.mxu1 %v1441_v2  ;;  %1284 = vmatprep.mubr.msk.bf16.mxu0 %vm1442_vm0, %v1441_v2 }
  0x27   : >> { %1296 = vmatprep.mubr.msk.bf16.mxu1 %vm1442_vm0, %v1441_v2 }
  0x28   : >> { %1279 = vmatpush3.bf16.msra.mxu0 %v1392_v21 }
  0x29   : >> { %1291 = vmatpush3.bf16.msra.mxu1 %v1393_v22  ;;  %1280 = vmatprep.subr.bf16.mxu0 %v1441_v2 }
  0x2a   : >> { %1292 = vmatprep.subr.bf16.mxu1 %v1441_v2 }
  0x2c   : >> { %1281 = vmatpush3.bf16.msra.mxu0 %v1394_v23 }
  0x2d   : >> { %1293 = vmatpush3.bf16.msra.mxu1 %v1395_v25  ;;  %1282 = vmatprep.subr.bf16.mxu0 %v1441_v2 }
  0x2e   : >> { %1294 = vmatprep.subr.bf16.mxu1 %v1441_v2 }
  0x30   : >> { %1283 = vmatpush3.bf16.msra.mxu0 %v1396_v26 }
  0x31   : >> { %1295 = vmatpush3.bf16.msra.mxu1 %v1397_v28  ;;  %1300 = vmatprep.subr.bf16.mxu0 %v1441_v2 }
  0x32   : >> { %1312 = vmatprep.subr.bf16.mxu1 %v1441_v2 }
  0x33   : >> { %1285 = vmatmul.mubr.msk.bf16.vlgmr.msra.gmra.mrb[4].mxu0 %vm238_vm1, %v367_v31 }
  0x34   : >> { %1301 = vmatpush3.bf16.msra.mxu0 %v1399_v32  ;;  %1297 = vmatmul.mubr.msk.bf16.vlgmr.msra.gmra.mrb[4].mxu1 %vm238_vm1, %v1114_v33 }
  0x35   : >> { %1313 = vmatpush3.bf16.msra.mxu1 %v1402_v35  ;;  %1302 = vmatprep.subr.bf16.mxu0 %v1441_v2 }
  0x36   : >> { %1314 = vmatprep.subr.bf16.mxu1 %v1441_v2  ;;  %1308 = vmatprep.mubr.msk.bf16.mxu0 %vm1442_vm0, %v1441_v2 }
  0x37   : >> { %1320 = vmatprep.mubr.msk.bf16.mxu1 %vm1442_vm0, %v1441_v2 }
  0x38   : >> { %1303 = vmatpush3.bf16.msra.mxu0 %v1403_v37 }
  0x39   : >> { %1315 = vmatpush3.bf16.msra.mxu1 %v1404_v38  ;;  %1304 = vmatprep.subr.bf16.mxu0 %v1441_v2 }
  0x3a   : >> { %1316 = vmatprep.subr.bf16.mxu1 %v1441_v2 }
  0x3c   : >> { %1305 = vmatpush3.bf16.msra.mxu0 %v1405_v39 }
  0x3d   : >> { %1317 = vmatpush3.bf16.msra.mxu1 %v1406_v41  ;;  %1306 = vmatprep.subr.bf16.mxu0 %v1441_v2 }
  0x3e   : >> { %1318 = vmatprep.subr.bf16.mxu1 %v1441_v2 }
  0x40   : >> { %1307 = vmatpush3.bf16.msra.mxu0 %v1407_v45 }
  0x41   : >> { %1319 = vmatpush3.bf16.msra.mxu1 %v1408_v47  ;;  %1324 = vmatprep.subr.bf16.mxu0 %v1441_v2 }
  0x42   : >> { %1336 = vmatprep.subr.bf16.mxu1 %v1441_v2 }
  0x43   : >> { %1309 = vmatmul.mubr.msk.bf16.vlgmr.msra.gmra.mrb[8].mxu0 %vm238_vm1, %v547_v48 }
  0x44   : >> { %1325 = vmatpush3.bf16.msra.mxu0 %v1409_v49  ;;  %1321 = vmatmul.mubr.msk.bf16.vlgmr.msra.gmra.mrb[8].mxu1 %vm238_vm1, %v631_v50 }
  0x45   : >> { %1337 = vmatpush3.bf16.msra.mxu1 %v1411_v51  ;;  %1326 = vmatprep.subr.bf16.mxu0 %v1441_v2 }
  0x46   : >> { %1338 = vmatprep.subr.bf16.mxu1 %v1441_v2  ;;  %1332 = vmatprep.mubr.msk.bf16.mxu0 %vm1442_vm0, %v1441_v2 }
  0x47   : >> { %1344 = vmatprep.mubr.msk.bf16.mxu1 %vm1442_vm0, %v1441_v2 }
  0x48   : >> { %1327 = vmatpush3.bf16.msra.mxu0 %v1412_v54 }
  0x49   : >> { %1339 = vmatpush3.bf16.msra.mxu1 %v1413_v56  ;;  %1328 = vmatprep.subr.bf16.mxu0 %v1441_v2 }
  0x4a   : >> { %1340 = vmatprep.subr.bf16.mxu1 %v1441_v2 }
  0x4c   : >> { %1329 = vmatpush3.bf16.msra.mxu0 %v1414_v57 }
  0x4d   : >> { %1341 = vmatpush3.bf16.msra.mxu1 %v1415_v59  ;;  %1330 = vmatprep.subr.bf16.mxu0 %v1441_v2 }
  0x4e   : >> { %1342 = vmatprep.subr.bf16.mxu1 %v1441_v2 }
  0x50   : >> { %1331 = vmatpush3.bf16.msra.mxu0 %v1416_v60 }
  0x51   : >> { %1343 = vmatpush3.bf16.msra.mxu1 %v1417_v1  ;;  %1348 = vmatprep.subr.bf16.mxu0 %v1441_v2 }
  0x53   : >> { %1333 = vmatmul.mubr.msk.bf16.vlgmr.msra.gmra.mrb[12].mxu0 %vm238_vm1, %v1161_v3 }
  0x54   : >> { %1349 = vmatpush3.bf16.msra.mxu0 %v1420_v4  ;;  %1345 = vmatmul.mubr.msk.bf16.vlgmr.msra.gmra.mrb[12].mxu1 %vm238_vm1, %v811_v5 }
  0x55   : >> { %1350 = vmatprep.subr.bf16.mxu0 %v1441_v2  ;;  %1356 = vmatprep.mubr.msk.bf16.mxu0 %vm1442_vm0, %v1441_v2 }
  0x58   : >> { %1351 = vmatpush3.bf16.msra.mxu0 %v1421_v6 }
  0x59   : >> { %1352 = vmatprep.subr.bf16.mxu0 %v1441_v2 }
  0x5c   : >> { %1353 = vmatpush3.bf16.msra.mxu0 %v1422_v7 }
  0x5d   : >> { %1354 = vmatprep.subr.bf16.mxu0 %v1441_v2 }
  0x60   : >> { %1355 = vmatpush3.bf16.msra.mxu0 %v1423_v10 }
  0x63   : >> { %1357 = vmatmul.mubr.msk.bf16.vlgmr.msra.gmra.mrb[16].mxu0 %vm238_vm1, %v895_v11 }
  0xf6   : >> { %v276_v12 = vpop.f32.mrb[0].mxu0 }
  0xf7   : >> { %v347_v13 = vpop.f32.mrb[0].mxu1  ;;  %v1262_v14 = vpop.f32.mrb[1].mxu0 }
  0xf8   : >> { %v348_v15 = vadd.f32 %v347_v13, %v276_v12  ;;  %v1274_v16 = vpop.f32.mrb[1].mxu1  ;;  %v279_v17 = vpop.f32.mrb[2].mxu0 }
  0xf9   : >> { %v350_v18 = vpop.f32.mrb[2].mxu1  ;;  %v1263_v19 = vpop.f32.mrb[3].mxu0 }
  0xfa   : >> { %v351_v20 = vadd.f32 %v350_v18, %v279_v17  ;;  %v1275_v21 = vpop.f32.mrb[3].mxu1 }
 0x106   : >> { %v429_v22 = vpop.f32.mrb[4].mxu0 }
 0x107   : >> { %v436_v23 = vadd.f32 %v429_v22, %v348_v15  ;;  %v1286_v24 = vpop.f32.mrb[5].mxu0  ;;  %v519_v25 = vpop.f32.mrb[4].mxu1 }
 0x108   : >> { %v432_v26 = vpop.f32.mrb[6].mxu0  ;;  %v1298_v2 = vpop.f32.mrb[5].mxu1 }
 0x109   : >> { %v437_v27 = vadd.f32 %v432_v26, %v351_v20  ;;  %v526_v28 = vadd.f32 %v519_v25, %v436_v23  ;;  %v1287_v29 = vpop.f32.mrb[7].mxu0  ;;  %v522_v30 = vpop.f32.mrb[6].mxu1 }
 0x10a   : >> { %v1299_v31 = vpop.f32.mrb[7].mxu1 }
 0x10b   : >> { %v527_v32 = vadd.f32 %v522_v30, %v437_v27 }
 0x116   : >> { %v609_v33 = vpop.f32.mrb[8].mxu0 }
 0x117   : >> { %v616_v34 = vadd.f32 %v609_v33, %v526_v28  ;;  %v1310_v35 = vpop.f32.mrb[9].mxu0  ;;  %v693_v36 = vpop.f32.mrb[8].mxu1 }
 0x118   : >> { %v612_v37 = vpop.f32.mrb[10].mxu0  ;;  %v1322_v38 = vpop.f32.mrb[9].mxu1 }
 0x119   : >> { %v617_v39 = vadd.f32 %v612_v37, %v527_v32  ;;  %v700_v40 = vadd.f32 %v693_v36, %v616_v34  ;;  %v1311_v41 = vpop.f32.mrb[11].mxu0  ;;  %v696_v42 = vpop.f32.mrb[10].mxu1 }
 0x11a   : >> { %v1323_v43 = vpop.f32.mrb[11].mxu1 }
 0x11b   : >> { %v701_v44 = vadd.f32 %v696_v42, %v617_v39 }
 0x126   : >> { %v783_v45 = vpop.f32.mrb[12].mxu0 }
 0x127   : >> { %v790_v46 = vadd.f32 %v783_v45, %v700_v40  ;;  %v1334_v47 = vpop.f32.mrb[13].mxu0  ;;  %v873_v48 = vpop.f32.mrb[12].mxu1 }
 0x128   : >> { %v786_v49 = vpop.f32.mrb[14].mxu0  ;;  %v1346_v50 = vpop.f32.mrb[13].mxu1 }
 0x129   : >> { %v791_v51 = vadd.f32 %v786_v49, %v701_v44  ;;  %v880_v52 = vadd.f32 %v873_v48, %v790_v46  ;;  %v1335_v53 = vpop.f32.mrb[15].mxu0  ;;  %v876_v54 = vpop.f32.mrb[14].mxu1 }
 0x12a   : >> { %v1347_v55 = vpop.f32.mrb[15].mxu1 }
 0x12b   : >> { %v881_v56 = vadd.f32 %v876_v54, %v791_v51 }
 0x136   : >> { %v957_v57 = vpop.f32.mrb[16].mxu0 }
 0x137   : >> { %v964_v58 = vadd.f32 %v957_v57, %v880_v52  ;;  %v1358_v59 = vpop.f32.mrb[17].mxu0 }
 0x138   : >> { %v960_v60 = vpop.f32.mrb[18].mxu0 }
 0x139   : >> { %v972_v61 = vadd.f32 %v1474_v0, %v964_v58  ;;  %v965_v62 = vadd.f32 %v960_v60, %v881_v56  ;;  %v1359_v63 = vpop.f32.mrb[19].mxu0 }
 0x13b   : >> { %v974_v1 = vmax.f32 %v972_v61, 0.0  ;;  %v973_v3 = vadd.f32 %v1474_v0, %v965_v62  ;;  %177 = sbr.rel (!%p175_p4) target bundleno = 18 (0x12), region = 81 }
 0x13d   : >> { %v1204_v4 = vpack.c.bf16 %v974_v1, %v974_v1  ;;  %v975_v5 = vmax.f32 %v973_v3, 0.0 }
 0x13f   : >> { %987 = vst.msk [vmem:[%s985_s7] sm:$0xf] %vm986_vm2, %v1204_v4  ;;  %v1205_v6 = vpack.c.bf16 %v975_v5, %v975_v5 }
 0x141   : >> { %989 = vst.msk [vmem:[%s985_s7 + $0x4] sm:$0x1] %vm988_vm3, %v1205_v6 }
 0x142 PF: > { %s13_s12 = sadd.s32 1, %s1435_s12  }
 0x143   : > { %p10_p5 = scmp.ge.s32.totalorder %s13_s12, 4  }
 0x145   :  { %12 = sbr.rel (!%p10_p5) target bundleno = 1 (0x1), region = 92 }

// kernel: image_classifier_forward.12
= control target key start
LH: loop header
LB: loop body
LE: loop exit
PB: predicated region body
PF: predicated region fallthrough
CT: control target
= control target key end

     0   :  { %s275_s6 = smov 0   ;;  %s306_s0 = inlined_call_operand.vmem [shape: bf16[2,5,2,5,128], index: 0, kind: input, shape index: {}]   ;;  %s307_s1 = inlined_call_operand.vmem [shape: bf16[2,5,5,64], index: 1, kind: output, shape index: {}]  }
   0x1 LB: > { %s231_s7 = sadd.s32 4294967295, %s262_s6   ;;  %p235_p0 = scmp.ge.s32.totalorder %s262_s6, 1  ;;  %s262_s6 = sphi %s275_s6, %s11_s6  }
   0x2   : > { %p87_p1 = scmp.lt.s32.totalorder %s262_s6, 3 }
   0x4   : > { %p88_p2 = pnand %p235_p0, %p87_p1 }
   0x5   : > { %p107_p3 = scmp.lt.s32.totalorder (!%p88_p2), %s231_s7, 1  ;;  %s264_s12 = smov (!%p88_p2), 64   ;;  %vm158_vm0 = vcmask (!%p88_p2), 518144   ;;  %vm159_vm1 = vsmask.f32 (!%p88_p2), 2304 }
   0x6   : > { %91 = sbr.rel (%p88_p2) target bundleno = 147 (0x93), region = 24  ;;  %vm289_vm2 = vmand (!%p88_p2), %vm158_vm0, %vm159_vm1 }
   0xd   : > { %s311_s7 = smov (!%p107_p3, %s231_s7), 1 }
   0xe   : > { %s245_s8 = smul.u32 40, %s311_s7 }
   0xf   : > { %s246_s13 = smul.u32 20, %s311_s7 }
  0x10   : > { %s111_s11 = scalar_lea.vmem %s306_s0, %s245_s8 }
  0x11   : > { %v117_v0 = vld [vmem:[%s111_s11] sm:$0x7]  ;;  %v238_v1 = vld [vmem:[%s111_s11 + $0x4] sm:$0x7]  ;;  %v119_v2 = vld [vmem:[%s111_s11 + $0x10] sm:$0x7]  ;;  %s116_s16 = scalar_lea.vmem %s307_s1, %s246_s13 }
  0x12   : > { %v128_v3 = vmax.bf16 %v238_v1, %v117_v0  ;;  %v240_v4 = vld [vmem:[%s111_s11 + $0x14] sm:$0x7]  ;;  %v118_v5 = vld [vmem:[%s111_s11 + $0x8] sm:$0x7]  ;;  %v239_v6 = vld [vmem:[%s111_s11 + $0xc] sm:$0x7] }
  0x13   : > { %v130_v7 = vmax.bf16 %v240_v4, %v119_v2  ;;  %v120_v8 = vld [vmem:[%s111_s11 + $0x18] sm:$0x7]  ;;  %v241_v9 = vld [vmem:[%s111_s11 + $0x1c] sm:$0x7]  ;;  %v129_v10 = vmax.bf16 %v239_v6, %v118_v5  ;;  %v121_v12 = vld [vmem:[%s111_s11 + $0x20] sm:$0x7] }
  0x14   : > { %138 = vrot.lane.b32.xlu0 %v128_v3, %s264_s12  ;;  %v131_v11 = vmax.bf16 %v241_v9, %v120_v8  ;;  %v242_v13 = vld [vmem:[%s111_s11 + $0x24] sm:$0x7]  ;;  %v161_v16 = vld [vmem:[%s116_s16] sm:$0x7]  ;;  %v167_v19 = vld [vmem:[%s116_s16 + $0x8] sm:$0x7] }
  0x15   : > { %142 = vrot.lane.b32.xlu1 %v130_v7, %s264_s12  ;;  %v132_v14 = vmax.bf16 %v242_v13, %v121_v12  ;;  %v164_v24 = vld [vmem:[%s116_s16 + $0x4] sm:$0x7]  ;;  %v170_v27 = vld [vmem:[%s116_s16 + $0xc] sm:$0x7]  ;;  %v173_v32 = vld [vmem:[%s116_s16 + $0x10] sm:$0x7] }
  0x18   : > { %140 = vrot.lane.b32.xlu0 %v129_v10, %s264_s12 }
  0x19   : > { %144 = vrot.lane.b32.xlu1 %v131_v11, %s264_s12 }
  0x1c   : > { %146 = vrot.lane.b32.xlu0 %v132_v14, %s264_s12 }
  0x86   : > { %v139_v17 = vpop.permute.xlu0 %138 }
  0x87   : > { %v153_v18 = vmax.bf16 %v139_v17, %v128_v3  ;;  %v143_v20 = vpop.permute.xlu1 %142 }
  0x88   : > { %v155_v21 = vmax.bf16 %v143_v20, %v130_v7 }
  0x89   : > { %v162_v22 = vsel %vm289_vm2, %v153_v18, %v161_v16 }
  0x8a   : > { %163 = vst [vmem:[%s116_s16] sm:$0x7] %v162_v22  ;;  %v168_v23 = vsel %vm289_vm2, %v155_v21, %v167_v19  ;;  %v141_v25 = vpop.permute.xlu0 %140 }
  0x8b   : > { %169 = vst [vmem:[%s116_s16 + $0x8] sm:$0x7] %v168_v23  ;;  %v154_v26 = vmax.bf16 %v141_v25, %v129_v10  ;;  %v145_v28 = vpop.permute.xlu1 %144 }
  0x8c   : > { %v156_v29 = vmax.bf16 %v145_v28, %v131_v11 }
  0x8d   : > { %v165_v30 = vsel %vm289_vm2, %v154_v26, %v164_v24 }
  0x8e   : > { %166 = vst [vmem:[%s116_s16 + $0x4] sm:$0x7] %v165_v30  ;;  %v171_v31 = vsel %vm289_vm2, %v156_v29, %v170_v27  ;;  %v147_v33 = vpop.permute.xlu0 %146 }
  0x8f   : > { %172 = vst [vmem:[%s116_s16 + $0xc] sm:$0x7] %v171_v31  ;;  %v157_v34 = vmax.bf16 %v147_v33, %v132_v14 }
  0x91   : > { %v174_v35 = vsel %vm289_vm2, %v157_v34, %v173_v32 }
  0x92   : > { %175 = vst [vmem:[%s116_s16 + $0x10] sm:$0x7] %v174_v35 }
  0x93 PF: > { %s11_s6 = sadd.s32 1, %s262_s6  }
  0x94   : > { %p8_p4 = scmp.ge.s32.totalorder %s11_s6, 4  }
  0x96   :  { %10 = sbr.rel (!%p8_p4) target bundleno = 1 (0x1), region = 55 }

// kernel: image_classifier_forward.13
= control target key start
LH: loop header
LB: loop body
LE: loop exit
PB: predicated region body
PF: predicated region fallthrough
CT: control target
= control target key end

     0   :  { %v426_v36 = vlaneseq  ;;  %v4685_v37 = vmov 1966171168   ;;  %s6108_s0 = inlined_call_operand.vmem [shape: bf16[2,1600], index: 0, kind: input, shape index: {}]   ;;  %s6109_s1 = inlined_call_operand.vmem [shape: bf16[1600,512], index: 1, kind: input, shape index: {}]   ;;  %s6110_s2 = inlined_call_operand.vmem [shape: f32[1,512], index: 2, kind: input, shape index: {}]   ;;  %s6111_s3 = inlined_call_operand.vmem [shape: bf16[512,10], index: 3, kind: input, shape index: {}]   ;;  %s6112_s4 = inlined_call_operand.vmem [shape: f32[1,10], index: 4, kind: input, shape index: {}]   ;;  %s6113_s5 = inlined_call_operand.hbm [shape: f32[2,10], index: 5, kind: output, shape index: {}]  }
   0x1   :  { %v4027_v0 = vld [vmem:[%s6109_s1 + $0x4] ss:$16 sps:$4 sm:$0xff]   ;;  %v4029_v1 = vld [vmem:[%s6109_s1 + $0xc] ss:$16 sps:$4 sm:$0xff]   ;;  %v4031_v2 = vld [vmem:[%s6109_s1] ss:$16 sps:$4 sm:$0xff]   ;;  %v450_v38 = vunpack.c.l.s4 %v4685_v37 }
   0x2   :  { %2552 = vmatprep.subr.bf16.mxu0 %v4027_v0  ;;  %v4032_v3 = vld [vmem:[%s6109_s1 + $0x8] ss:$16 sps:$4 sm:$0xff]   ;;  %2839 = vmatprep.subr.bf16.mxu1 %v4029_v1  ;;  %v4033_v4 = vld [vmem:[%s6109_s1 + $0x24] ss:$16 sps:$4 sm:$0xff]   ;;  %v4035_v5 = vld [vmem:[%s6109_s1 + $0x2c] ss:$16 sps:$4 sm:$0xff]  }
   0x3   :  { %2553 = vmatpush1.bf16.msra.mxu0 %v4031_v2  ;;  %2840 = vmatpush1.bf16.msra.mxu1 %v4032_v3  ;;  %v4037_v6 = vld [vmem:[%s6109_s1 + $0x20] ss:$16 sps:$4 sm:$0xff]   ;;  %v4038_v7 = vld [vmem:[%s6109_s1 + $0x28] ss:$16 sps:$4 sm:$0xff]   ;;  %v4039_v8 = vld [vmem:[%s6109_s1 + $0x44] ss:$16 sps:$4 sm:$0xff]   ;;  %v451_v43 = vunpack.c.0.s8 %v450_v38 }
   0x4   :  { %2554 = vmatprep.subr.bf16.mxu0 %v4033_v4  ;;  %2841 = vmatprep.subr.bf16.mxu1 %v4035_v5  ;;  %v4041_v9 = vld [vmem:[%s6109_s1 + $0x4c] ss:$16 sps:$4 sm:$0xff]   ;;  %v4043_v10 = vld [vmem:[%s6109_s1 + $0x40] ss:$16 sps:$4 sm:$0xff]   ;;  %v4044_v11 = vld [vmem:[%s6109_s1 + $0x48] ss:$16 sps:$4 sm:$0xff]  }
   0x5   :  { %v4045_v12 = vld [vmem:[%s6109_s1 + $0x64] ss:$16 sps:$4 sm:$0xff]   ;;  %v4047_v13 = vld [vmem:[%s6109_s1 + $0x6c] ss:$16 sps:$4 sm:$0xff]   ;;  %v4049_v14 = vld [vmem:[%s6109_s1 + $0x60] ss:$16 sps:$4 sm:$0xff]  }
   0x6   :  { %v4050_v15 = vld [vmem:[%s6109_s1 + $0x68] ss:$16 sps:$4 sm:$0xff]   ;;  %v4051_v16 = vld [vmem:[%s6109_s1 + $0x84] ss:$16 sps:$4 sm:$0xff]   ;;  %v4053_v17 = vld [vmem:[%s6109_s1 + $0x8c] ss:$16 sps:$4 sm:$0xff]  }
   0x7   :  { %2555 = vmatpush1.bf16.msra.mxu0 %v4037_v6  ;;  %2842 = vmatpush1.bf16.msra.mxu1 %v4038_v7  ;;  %v4055_v18 = vld [vmem:[%s6109_s1 + $0x80] ss:$16 sps:$4 sm:$0xff]   ;;  %v4056_v19 = vld [vmem:[%s6109_s1 + $0x88] ss:$16 sps:$4 sm:$0xff]   ;;  %v4057_v20 = vld [vmem:[%s6109_s1 + $0xa4] ss:$16 sps:$4 sm:$0xff]  }
   0x8   :  { %2556 = vmatprep.subr.bf16.mxu0 %v4039_v8  ;;  %2843 = vmatprep.subr.bf16.mxu1 %v4041_v9  ;;  %v4059_v21 = vld [vmem:[%s6109_s1 + $0xac] ss:$16 sps:$4 sm:$0xff]   ;;  %v4061_v22 = vld [vmem:[%s6109_s1 + $0xa0] ss:$16 sps:$4 sm:$0xff]   ;;  %v4062_v23 = vld [vmem:[%s6109_s1 + $0xa8] ss:$16 sps:$4 sm:$0xff]  }
   0x9   :  { %v4063_v24 = vld [vmem:[%s6109_s1 + $0xc4] ss:$16 sps:$4 sm:$0xff]   ;;  %v4065_v25 = vld [vmem:[%s6109_s1 + $0xcc] ss:$16 sps:$4 sm:$0xff]   ;;  %v4067_v26 = vld [vmem:[%s6109_s1 + $0xc0] ss:$16 sps:$4 sm:$0xff]  }
   0xa   :  { %v4068_v27 = vld [vmem:[%s6109_s1 + $0xc8] ss:$16 sps:$4 sm:$0xff]   ;;  %v4069_v28 = vld [vmem:[%s6109_s1 + $0xe4] ss:$16 sps:$4 sm:$0xff]   ;;  %v4071_v29 = vld [vmem:[%s6109_s1 + $0xec] ss:$16 sps:$4 sm:$0xff]  }
   0xb   :  { %2557 = vmatpush1.bf16.msra.mxu0 %v4043_v10  ;;  %2844 = vmatpush1.bf16.msra.mxu1 %v4044_v11  ;;  %v4073_v30 = vld [vmem:[%s6109_s1 + $0xe0] ss:$16 sps:$4 sm:$0xff]   ;;  %v4074_v31 = vld [vmem:[%s6109_s1 + $0xe8] ss:$16 sps:$4 sm:$0xff]   ;;  %v4075_v32 = vld [vmem:[%s6109_s1 + $0x104] ss:$16 sps:$4 sm:$0xff]  }
   0xc   :  { %2558 = vmatprep.subr.bf16.mxu0 %v4045_v12  ;;  %2845 = vmatprep.subr.bf16.mxu1 %v4047_v13  ;;  %v4077_v33 = vld [vmem:[%s6109_s1 + $0x10c] ss:$16 sps:$4 sm:$0xff]   ;;  %v4079_v34 = vld [vmem:[%s6109_s1 + $0x100] ss:$16 sps:$4 sm:$0xff]   ;;  %v4080_v35 = vld [vmem:[%s6109_s1 + $0x108] ss:$16 sps:$4 sm:$0xff]  }
   0xd   :  { %v4081_v39 = vld [vmem:[%s6109_s1 + $0x124] ss:$16 sps:$4 sm:$0xff]   ;;  %v4083_v40 = vld [vmem:[%s6109_s1 + $0x12c] ss:$16 sps:$4 sm:$0xff]   ;;  %v4085_v41 = vld [vmem:[%s6109_s1 + $0x120] ss:$16 sps:$4 sm:$0xff]  }
   0xe   :  { %v4835_v42 = vshrl.u32 %v426_v36, 7  ;;  %v4086_v44 = vld [vmem:[%s6109_s1 + $0x128] ss:$16 sps:$4 sm:$0xff]   ;;  %v4087_v45 = vld [vmem:[%s6109_s1 + $0x144] ss:$16 sps:$4 sm:$0xff]  }
   0xf   :  { %2559 = vmatpush1.bf16.msra.mxu0 %v4049_v14  ;;  %2846 = vmatpush1.bf16.msra.mxu1 %v4050_v15  ;;  %v4089_v46 = vld [vmem:[%s6109_s1 + $0x14c] ss:$16 sps:$4 sm:$0xff]   ;;  %v4091_v47 = vld [vmem:[%s6109_s1 + $0x140] ss:$16 sps:$4 sm:$0xff]   ;;  %v4092_v48 = vld [vmem:[%s6109_s1 + $0x148] ss:$16 sps:$4 sm:$0xff]  }
  0x10   :  { %2560 = vmatprep.subr.bf16.mxu0 %v4051_v16  ;;  %2847 = vmatprep.subr.bf16.mxu1 %v4053_v17  ;;  %v4853_v49 = vsub.s32 %v451_v43, %v4835_v42  ;;  %v4093_v50 = vld [vmem:[%s6109_s1 + $0x164] ss:$16 sps:$4 sm:$0xff]   ;;  %v4095_v51 = vld [vmem:[%s6109_s1 + $0x16c] ss:$16 sps:$4 sm:$0xff]   ;;  %v4097_v53 = vld [vmem:[%s6109_s1 + $0x160] ss:$16 sps:$4 sm:$0xff]  }
  0x11   :  { %v4864_v52 = vld [vmem:[%s6108_s0] sm:$0xff]  ;;  %v4098_v55 = vld [vmem:[%s6109_s1 + $0x168] ss:$16 sps:$4 sm:$0xff]   ;;  %v4101_v57 = vld [vmem:[%s6109_s1 + $0x18c] ss:$16 sps:$4 sm:$0xff]  }
  0x12   :  { %v455_v54 = vrot.slane %v4864_v52, %v4853_v49  ;;  %v4099_v56 = vld [vmem:[%s6109_s1 + $0x184] ss:$16 sps:$4 sm:$0xff]   ;;  %v4103_v59 = vld [vmem:[%s6109_s1 + $0x180] ss:$16 sps:$4 sm:$0xff]   ;;  %v4104_v61 = vld [vmem:[%s6109_s1 + $0x188] ss:$16 sps:$4 sm:$0xff]  }
  0x13   :  { %2561 = vmatpush1.bf16.msra.mxu0 %v4055_v18  ;;  %2848 = vmatpush1.bf16.msra.mxu1 %v4056_v19  ;;  %v4105_v62 = vld [vmem:[%s6109_s1 + $0x1a4] ss:$16 sps:$4 sm:$0xff]   ;;  %v4107_v63 = vld [vmem:[%s6109_s1 + $0x1ac] ss:$16 sps:$4 sm:$0xff]   ;;  %v4109_v0 = vld [vmem:[%s6109_s1 + $0x1a0] ss:$16 sps:$4 sm:$0xff]  }
  0x14   :  { %2562 = vmatprep.subr.bf16.mxu0 %v4057_v20  ;;  %2849 = vmatprep.subr.bf16.mxu1 %v4059_v21  ;;  %v463_v58 = vcombine.high %v455_v54, %v455_v54  ;;  %v4110_v1 = vld [vmem:[%s6109_s1 + $0x1a8] ss:$16 sps:$4 sm:$0xff]   ;;  %v4111_v2 = vld [vmem:[%s6109_s1 + $0x1c4] ss:$16 sps:$4 sm:$0xff]   ;;  %v4113_v3 = vld [vmem:[%s6109_s1 + $0x1cc] ss:$16 sps:$4 sm:$0xff]   ;;  %v4933_v13 = vrot.slane %v455_v54, %v4853_v49 }
  0x15   :  { %v4115_v4 = vld [vmem:[%s6109_s1 + $0x1c0] ss:$16 sps:$4 sm:$0xff]   ;;  %v4116_v5 = vld [vmem:[%s6109_s1 + $0x1c8] ss:$16 sps:$4 sm:$0xff]   ;;  %v4117_v6 = vld [vmem:[%s6109_s1 + $0x1e4] ss:$16 sps:$4 sm:$0xff]  }
  0x16   :  { %v485_v60 = vrot.slane %v463_v58, %v4853_v49  ;;  %v4119_v7 = vld [vmem:[%s6109_s1 + $0x1ec] ss:$16 sps:$4 sm:$0xff]   ;;  %v4121_v8 = vld [vmem:[%s6109_s1 + $0x1e0] ss:$16 sps:$4 sm:$0xff]   ;;  %v4122_v9 = vld [vmem:[%s6109_s1 + $0x1e8] ss:$16 sps:$4 sm:$0xff]  }
  0x17   :  { %2563 = vmatpush1.bf16.msra.mxu0 %v4061_v22  ;;  %2850 = vmatpush1.bf16.msra.mxu1 %v4062_v23  ;;  %v4125_v10 = vld [vmem:[%s6109_s1 + $0x204] ss:$16 sps:$4 sm:$0xff]   ;;  %v4128_v11 = vld [vmem:[%s6109_s1 + $0x20c] ss:$16 sps:$4 sm:$0xff]   ;;  %v4123_v12 = vld [vmem:[%s6109_s1 + $0x200] ss:$16 sps:$4 sm:$0xff]  }
  0x18   :  { %2564 = vmatprep.subr.bf16.mxu0 %v4063_v24  ;;  %2851 = vmatprep.subr.bf16.mxu1 %v4065_v25  ;;  %v4126_v14 = vld [vmem:[%s6109_s1 + $0x208] ss:$16 sps:$4 sm:$0xff]   ;;  %v4131_v15 = vld [vmem:[%s6109_s1 + $0x224] ss:$16 sps:$4 sm:$0xff]   ;;  %v4134_v16 = vld [vmem:[%s6109_s1 + $0x22c] ss:$16 sps:$4 sm:$0xff]   ;;  %v495_v17 = vcombine.high %v485_v60, %v485_v60 }
  0x19   :  { %2584 = vmatprep.mubr.bf16.mxu0 %v485_v60  ;;  %2871 = vmatprep.mubr.bf16.mxu1 %v485_v60  ;;  %v4129_v18 = vld [vmem:[%s6109_s1 + $0x220] ss:$16 sps:$4 sm:$0xff]   ;;  %v4132_v19 = vld [vmem:[%s6109_s1 + $0x228] ss:$16 sps:$4 sm:$0xff]   ;;  %v4137_v20 = vld [vmem:[%s6109_s1 + $0x244] ss:$16 sps:$4 sm:$0xff]  }
  0x1a   :  { %v4140_v21 = vld [vmem:[%s6109_s1 + $0x24c] ss:$16 sps:$4 sm:$0xff]   ;;  %v4135_v22 = vld [vmem:[%s6109_s1 + $0x240] ss:$16 sps:$4 sm:$0xff]   ;;  %v4138_v23 = vld [vmem:[%s6109_s1 + $0x248] ss:$16 sps:$4 sm:$0xff]  }
  0x1b   :  { %2565 = vmatpush1.bf16.msra.mxu0 %v4067_v26  ;;  %2852 = vmatpush1.bf16.msra.mxu1 %v4068_v27  ;;  %v4143_v24 = vld [vmem:[%s6109_s1 + $0x264] ss:$16 sps:$4 sm:$0xff]   ;;  %v4146_v25 = vld [vmem:[%s6109_s1 + $0x26c] ss:$16 sps:$4 sm:$0xff]   ;;  %v4141_v26 = vld [vmem:[%s6109_s1 + $0x260] ss:$16 sps:$4 sm:$0xff]  }
  0x1c   :  { %2566 = vmatprep.subr.bf16.mxu0 %v4069_v28  ;;  %2853 = vmatprep.subr.bf16.mxu1 %v4071_v29  ;;  %v4144_v27 = vld [vmem:[%s6109_s1 + $0x268] ss:$16 sps:$4 sm:$0xff]   ;;  %v4149_v28 = vld [vmem:[%s6109_s1 + $0x284] ss:$16 sps:$4 sm:$0xff]   ;;  %v4152_v29 = vld [vmem:[%s6109_s1 + $0x28c] ss:$16 sps:$4 sm:$0xff]  }
  0x1d   :  { %v4161_v36 = vld [vmem:[%s6109_s1 + $0x2c4] ss:$16 sps:$4 sm:$0xff]   ;;  %v4164_v37 = vld [vmem:[%s6109_s1 + $0x2cc] ss:$16 sps:$4 sm:$0xff]   ;;  %v4159_v38 = vld [vmem:[%s6109_s1 + $0x2c0] ss:$16 sps:$4 sm:$0xff]  }
  0x1e   :  { %v4165_v43 = vld [vmem:[%s6109_s1 + $0x2e0] ss:$16 sps:$4 sm:$0xff]   ;;  %v4180_v54 = vld [vmem:[%s6109_s1 + $0x328] ss:$16 sps:$4 sm:$0xff]   ;;  %v4194_v60 = vld [vmem:[%s6109_s1 + $0x36c] ss:$16 sps:$4 sm:$0xff]  }
  0x1f   :  { %2567 = vmatpush1.bf16.msra.mxu0 %v4073_v30  ;;  %2854 = vmatpush1.bf16.msra.mxu1 %v4074_v31  ;;  %v4147_v30 = vld [vmem:[%s6109_s1 + $0x280] ss:$16 sps:$4 sm:$0xff]   ;;  %v4150_v31 = vld [vmem:[%s6109_s1 + $0x288] ss:$16 sps:$4 sm:$0xff]  }
  0x20   :  { %2568 = vmatprep.subr.bf16.mxu0 %v4075_v32  ;;  %2855 = vmatprep.subr.bf16.mxu1 %v4077_v33  ;;  %v4155_v32 = vld [vmem:[%s6109_s1 + $0x2a4] ss:$16 sps:$4 sm:$0xff]   ;;  %v4158_v33 = vld [vmem:[%s6109_s1 + $0x2ac] ss:$16 sps:$4 sm:$0xff]   ;;  %v4186_v58 = vld [vmem:[%s6109_s1 + $0x348] ss:$16 sps:$4 sm:$0xff]  }
  0x23   :  { %2569 = vmatpush1.bf16.msra.mxu0 %v4079_v34  ;;  %2856 = vmatpush1.bf16.msra.mxu1 %v4080_v35  ;;  %v4153_v34 = vld [vmem:[%s6109_s1 + $0x2a0] ss:$16 sps:$4 sm:$0xff]   ;;  %v4156_v35 = vld [vmem:[%s6109_s1 + $0x2a8] ss:$16 sps:$4 sm:$0xff]  }
  0x24   :  { %2570 = vmatprep.subr.bf16.mxu0 %v4081_v39  ;;  %2857 = vmatprep.subr.bf16.mxu1 %v4083_v40  ;;  %v4162_v39 = vld [vmem:[%s6109_s1 + $0x2c8] ss:$16 sps:$4 sm:$0xff]   ;;  %v4167_v40 = vld [vmem:[%s6109_s1 + $0x2e4] ss:$16 sps:$4 sm:$0xff]  }
  0x27   :  { %2571 = vmatpush1.bf16.msra.mxu0 %v4085_v41  ;;  %2858 = vmatpush1.bf16.msra.mxu1 %v4086_v44  ;;  %v4170_v41 = vld [vmem:[%s6109_s1 + $0x2ec] ss:$16 sps:$4 sm:$0xff]   ;;  %v4168_v44 = vld [vmem:[%s6109_s1 + $0x2e8] ss:$16 sps:$4 sm:$0xff]  }
  0x28   :  { %2572 = vmatprep.subr.bf16.mxu0 %v4087_v45  ;;  %2859 = vmatprep.subr.bf16.mxu1 %v4089_v46  ;;  %v4173_v45 = vld [vmem:[%s6109_s1 + $0x304] ss:$16 sps:$4 sm:$0xff]   ;;  %v4176_v46 = vld [vmem:[%s6109_s1 + $0x30c] ss:$16 sps:$4 sm:$0xff]  }
  0x2b   :  { %2573 = vmatpush1.bf16.msra.mxu0 %v4091_v47  ;;  %2860 = vmatpush1.bf16.msra.mxu1 %v4092_v48  ;;  %v4171_v47 = vld [vmem:[%s6109_s1 + $0x300] ss:$16 sps:$4 sm:$0xff]   ;;  %v4174_v48 = vld [vmem:[%s6109_s1 + $0x308] ss:$16 sps:$4 sm:$0xff]  }
  0x2c   :  { %2574 = vmatprep.subr.bf16.mxu0 %v4093_v50  ;;  %2861 = vmatprep.subr.bf16.mxu1 %v4095_v51  ;;  %v4179_v50 = vld [vmem:[%s6109_s1 + $0x324] ss:$16 sps:$4 sm:$0xff]   ;;  %v4182_v51 = vld [vmem:[%s6109_s1 + $0x32c] ss:$16 sps:$4 sm:$0xff]  }
  0x2f   :  { %2575 = vmatpush1.bf16.msra.mxu0 %v4097_v53  ;;  %2862 = vmatpush1.bf16.msra.mxu1 %v4098_v55  ;;  %v4177_v53 = vld [vmem:[%s6109_s1 + $0x320] ss:$16 sps:$4 sm:$0xff]   ;;  %v4185_v55 = vld [vmem:[%s6109_s1 + $0x344] ss:$16 sps:$4 sm:$0xff]  }
  0x30   :  { %2576 = vmatprep.subr.bf16.mxu0 %v4099_v56  ;;  %2863 = vmatprep.subr.bf16.mxu1 %v4101_v57  ;;  %v4188_v56 = vld [vmem:[%s6109_s1 + $0x34c] ss:$16 sps:$4 sm:$0xff]   ;;  %v4183_v57 = vld [vmem:[%s6109_s1 + $0x340] ss:$16 sps:$4 sm:$0xff]  }
  0x33   :  { %2577 = vmatpush1.bf16.msra.mxu0 %v4103_v59  ;;  %2864 = vmatpush1.bf16.msra.mxu1 %v4104_v61  ;;  %v4191_v59 = vld [vmem:[%s6109_s1 + $0x364] ss:$16 sps:$4 sm:$0xff]   ;;  %v4189_v61 = vld [vmem:[%s6109_s1 + $0x360] ss:$16 sps:$4 sm:$0xff]  }
  0x34   :  { %2578 = vmatprep.subr.bf16.mxu0 %v4105_v62  ;;  %2865 = vmatprep.subr.bf16.mxu1 %v4107_v63  ;;  %v4192_v62 = vld [vmem:[%s6109_s1 + $0x368] ss:$16 sps:$4 sm:$0xff]   ;;  %v4197_v63 = vld [vmem:[%s6109_s1 + $0x384] ss:$16 sps:$4 sm:$0xff]  }
  0x37   :  { %2579 = vmatpush1.bf16.msra.mxu0 %v4109_v0  ;;  %2866 = vmatpush1.bf16.msra.mxu1 %v4110_v1  ;;  %v4200_v0 = vld [vmem:[%s6109_s1 + $0x38c] ss:$16 sps:$4 sm:$0xff]   ;;  %v4195_v1 = vld [vmem:[%s6109_s1 + $0x380] ss:$16 sps:$4 sm:$0xff]  }
  0x38   :  { %2580 = vmatprep.subr.bf16.mxu0 %v4111_v2  ;;  %2867 = vmatprep.subr.bf16.mxu1 %v4113_v3  ;;  %v4198_v2 = vld [vmem:[%s6109_s1 + $0x388] ss:$16 sps:$4 sm:$0xff]   ;;  %v4203_v3 = vld [vmem:[%s6109_s1 + $0x3a4] ss:$16 sps:$4 sm:$0xff]  }
  0x3b   :  { %2581 = vmatpush1.bf16.msra.mxu0 %v4115_v4  ;;  %2868 = vmatpush1.bf16.msra.mxu1 %v4116_v5  ;;  %v4206_v4 = vld [vmem:[%s6109_s1 + $0x3ac] ss:$16 sps:$4 sm:$0xff]   ;;  %v4201_v5 = vld [vmem:[%s6109_s1 + $0x3a0] ss:$16 sps:$4 sm:$0xff]  }
  0x3c   :  { %2582 = vmatprep.subr.bf16.mxu0 %v4117_v6  ;;  %2869 = vmatprep.subr.bf16.mxu1 %v4119_v7  ;;  %v4204_v6 = vld [vmem:[%s6109_s1 + $0x3a8] ss:$16 sps:$4 sm:$0xff]   ;;  %v4209_v7 = vld [vmem:[%s6109_s1 + $0x3c4] ss:$16 sps:$4 sm:$0xff]  }
  0x3f   :  { %2583 = vmatpush1.bf16.msra.mxu0 %v4121_v8  ;;  %2870 = vmatpush1.bf16.msra.mxu1 %v4122_v9  ;;  %v4212_v8 = vld [vmem:[%s6109_s1 + $0x3cc] ss:$16 sps:$4 sm:$0xff]   ;;  %v448_v9 = vcombine.high %v4864_v52, %v4864_v52 }
  0x40   :  { %2593 = vmatprep.subr.bf16.mxu0 %v4125_v10  ;;  %2880 = vmatprep.subr.bf16.mxu1 %v4128_v11  ;;  %v4207_v10 = vld [vmem:[%s6109_s1 + $0x3c0] ss:$16 sps:$4 sm:$0xff]   ;;  %v4210_v11 = vld [vmem:[%s6109_s1 + $0x3c8] ss:$16 sps:$4 sm:$0xff]   ;;  %v4218_v52 = vld [vmem:[%s6109_s1 + $0x3ec] ss:$16 sps:$4 sm:$0xff]  }
  0x42   :  { %2585 = vmatmul.mubr.bf16.vlgmr.msra.gmra.mrb[0].mxu0 %v4933_v13  ;;  %2872 = vmatmul.mubr.bf16.vlgmr.msra.gmra.mrb[0].mxu1 %v4933_v13 }
  0x43   :  { %2594 = vmatpush1.bf16.msra.mxu0 %v4123_v12  ;;  %2881 = vmatpush1.bf16.msra.mxu1 %v4126_v14  ;;  %v4215_v12 = vld [vmem:[%s6109_s1 + $0x3e4] ss:$16 sps:$4 sm:$0xff]   ;;  %v5117_v14 = vrot.slane %v448_v9, %v4853_v49  ;;  %v4294_v9 = vld [vmem:[%s6109_s1 + $0x588] ss:$16 sps:$4 sm:$0xff]  }
  0x44   :  { %2595 = vmatprep.subr.bf16.mxu0 %v4131_v15  ;;  %2882 = vmatprep.subr.bf16.mxu1 %v4134_v16  ;;  %v4213_v15 = vld [vmem:[%s6109_s1 + $0x3e0] ss:$16 sps:$4 sm:$0xff]   ;;  %v4216_v16 = vld [vmem:[%s6109_s1 + $0x3e8] ss:$16 sps:$4 sm:$0xff]  }
  0x45   :  { %2625 = vmatprep.mubr.bf16.mxu0 %v495_v17  ;;  %2912 = vmatprep.mubr.bf16.mxu1 %v495_v17  ;;  %v4221_v17 = vld [vmem:[%s6109_s1 + $0x404] ss:$16 sps:$4 sm:$0xff]  }
  0x47   :  { %2596 = vmatpush1.bf16.msra.mxu0 %v4129_v18  ;;  %2883 = vmatpush1.bf16.msra.mxu1 %v4132_v19  ;;  %v4224_v18 = vld [vmem:[%s6109_s1 + $0x40c] ss:$16 sps:$4 sm:$0xff]   ;;  %v464_v19 = vcombine.high %v5117_v14, %v5117_v14 }
  0x48   :  { %2597 = vmatprep.subr.bf16.mxu0 %v4137_v20  ;;  %2884 = vmatprep.subr.bf16.mxu1 %v4140_v21  ;;  %v4219_v20 = vld [vmem:[%s6109_s1 + $0x400] ss:$16 sps:$4 sm:$0xff]   ;;  %v493_v21 = vcombine.high %v4933_v13, %v4933_v13 }
  0x49   :  { %v4225_v13 = vld [vmem:[%s6109_s1 + $0x420] ss:$16 sps:$4 sm:$0xff]  }
  0x4b   :  { %2598 = vmatpush1.bf16.msra.mxu0 %v4135_v22  ;;  %2885 = vmatpush1.bf16.msra.mxu1 %v4138_v23  ;;  %v4222_v22 = vld [vmem:[%s6109_s1 + $0x408] ss:$16 sps:$4 sm:$0xff]   ;;  %v4227_v23 = vld [vmem:[%s6109_s1 + $0x424] ss:$16 sps:$4 sm:$0xff]  }
  0x4c   :  { %2599 = vmatprep.subr.bf16.mxu0 %v4143_v24  ;;  %2886 = vmatprep.subr.bf16.mxu1 %v4146_v25  ;;  %v4230_v24 = vld [vmem:[%s6109_s1 + $0x42c] ss:$16 sps:$4 sm:$0xff]   ;;  %v5148_v25 = vrot.slane %v464_v19, %v4853_v49  ;;  %v4311_v19 = vld [vmem:[%s6109_s1 + $0x5e4] ss:$16 sps:$4 sm:$0xff]  }
  0x4f   :  { %2600 = vmatpush1.bf16.msra.mxu0 %v4141_v26  ;;  %2887 = vmatpush1.bf16.msra.mxu1 %v4144_v27  ;;  %v4228_v26 = vld [vmem:[%s6109_s1 + $0x428] ss:$16 sps:$4 sm:$0xff]   ;;  %v4233_v27 = vld [vmem:[%s6109_s1 + $0x444] ss:$16 sps:$4 sm:$0xff]  }
  0x50   :  { %2601 = vmatprep.subr.bf16.mxu0 %v4149_v28  ;;  %2888 = vmatprep.subr.bf16.mxu1 %v4152_v29  ;;  %v4236_v28 = vld [vmem:[%s6109_s1 + $0x44c] ss:$16 sps:$4 sm:$0xff]   ;;  %v4231_v29 = vld [vmem:[%s6109_s1 + $0x440] ss:$16 sps:$4 sm:$0xff]  }
  0x53   :  { %2602 = vmatpush1.bf16.msra.mxu0 %v4147_v30  ;;  %2889 = vmatpush1.bf16.msra.mxu1 %v4150_v31  ;;  %v4234_v30 = vld [vmem:[%s6109_s1 + $0x448] ss:$16 sps:$4 sm:$0xff]   ;;  %v4239_v31 = vld [vmem:[%s6109_s1 + $0x464] ss:$16 sps:$4 sm:$0xff]  }
  0x54   :  { %2603 = vmatprep.subr.bf16.mxu0 %v4155_v32  ;;  %2890 = vmatprep.subr.bf16.mxu1 %v4158_v33  ;;  %v4242_v32 = vld [vmem:[%s6109_s1 + $0x46c] ss:$16 sps:$4 sm:$0xff]   ;;  %v4237_v33 = vld [vmem:[%s6109_s1 + $0x460] ss:$16 sps:$4 sm:$0xff]  }
  0x57   :  { %2604 = vmatpush1.bf16.msra.mxu0 %v4153_v34  ;;  %2891 = vmatpush1.bf16.msra.mxu1 %v4156_v35  ;;  %v4240_v34 = vld [vmem:[%s6109_s1 + $0x468] ss:$16 sps:$4 sm:$0xff]   ;;  %v4245_v35 = vld [vmem:[%s6109_s1 + $0x484] ss:$16 sps:$4 sm:$0xff]  }
  0x58   :  { %2605 = vmatprep.subr.bf16.mxu0 %v4161_v36  ;;  %2892 = vmatprep.subr.bf16.mxu1 %v4164_v37  ;;  %v4248_v36 = vld [vmem:[%s6109_s1 + $0x48c] ss:$16 sps:$4 sm:$0xff]   ;;  %v4243_v37 = vld [vmem:[%s6109_s1 + $0x480] ss:$16 sps:$4 sm:$0xff]  }
  0x5b   :  { %2606 = vmatpush1.bf16.msra.mxu0 %v4159_v38  ;;  %2893 = vmatpush1.bf16.msra.mxu1 %v4162_v39  ;;  %v4246_v38 = vld [vmem:[%s6109_s1 + $0x488] ss:$16 sps:$4 sm:$0xff]   ;;  %v4251_v39 = vld [vmem:[%s6109_s1 + $0x4a4] ss:$16 sps:$4 sm:$0xff]  }
  0x5c   :  { %2607 = vmatprep.subr.bf16.mxu0 %v4167_v40  ;;  %2894 = vmatprep.subr.bf16.mxu1 %v4170_v41  ;;  %v4254_v40 = vld [vmem:[%s6109_s1 + $0x4ac] ss:$16 sps:$4 sm:$0xff]   ;;  %v4249_v41 = vld [vmem:[%s6109_s1 + $0x4a0] ss:$16 sps:$4 sm:$0xff]  }
  0x5f   :  { %2608 = vmatpush1.bf16.msra.mxu0 %v4165_v43  ;;  %2895 = vmatpush1.bf16.msra.mxu1 %v4168_v44  ;;  %v4252_v43 = vld [vmem:[%s6109_s1 + $0x4a8] ss:$16 sps:$4 sm:$0xff]   ;;  %v4257_v44 = vld [vmem:[%s6109_s1 + $0x4c4] ss:$16 sps:$4 sm:$0xff]  }
  0x60   :  { %2609 = vmatprep.subr.bf16.mxu0 %v4173_v45  ;;  %2896 = vmatprep.subr.bf16.mxu1 %v4176_v46  ;;  %v4260_v45 = vld [vmem:[%s6109_s1 + $0x4cc] ss:$16 sps:$4 sm:$0xff]   ;;  %v4255_v46 = vld [vmem:[%s6109_s1 + $0x4c0] ss:$16 sps:$4 sm:$0xff]  }
  0x63   :  { %2610 = vmatpush1.bf16.msra.mxu0 %v4171_v47  ;;  %2897 = vmatpush1.bf16.msra.mxu1 %v4174_v48  ;;  %v4258_v47 = vld [vmem:[%s6109_s1 + $0x4c8] ss:$16 sps:$4 sm:$0xff]   ;;  %v4263_v48 = vld [vmem:[%s6109_s1 + $0x4e4] ss:$16 sps:$4 sm:$0xff]  }
  0x64   :  { %2611 = vmatprep.subr.bf16.mxu0 %v4179_v50  ;;  %2898 = vmatprep.subr.bf16.mxu1 %v4182_v51  ;;  %v4266_v50 = vld [vmem:[%s6109_s1 + $0x4ec] ss:$16 sps:$4 sm:$0xff]   ;;  %v4261_v51 = vld [vmem:[%s6109_s1 + $0x4e0] ss:$16 sps:$4 sm:$0xff]  }
  0x67   :  { %2612 = vmatpush1.bf16.msra.mxu0 %v4177_v53  ;;  %2899 = vmatpush1.bf16.msra.mxu1 %v4180_v54  ;;  %v4264_v53 = vld [vmem:[%s6109_s1 + $0x4e8] ss:$16 sps:$4 sm:$0xff]   ;;  %v4269_v54 = vld [vmem:[%s6109_s1 + $0x504] ss:$16 sps:$4 sm:$0xff]  }
  0x68   :  { %2613 = vmatprep.subr.bf16.mxu0 %v4185_v55  ;;  %2900 = vmatprep.subr.bf16.mxu1 %v4188_v56  ;;  %v4272_v55 = vld [vmem:[%s6109_s1 + $0x50c] ss:$16 sps:$4 sm:$0xff]   ;;  %v4267_v56 = vld [vmem:[%s6109_s1 + $0x500] ss:$16 sps:$4 sm:$0xff]  }
  0x6b   :  { %2614 = vmatpush1.bf16.msra.mxu0 %v4183_v57  ;;  %2901 = vmatpush1.bf16.msra.mxu1 %v4186_v58  ;;  %v4270_v57 = vld [vmem:[%s6109_s1 + $0x508] ss:$16 sps:$4 sm:$0xff]   ;;  %v4275_v58 = vld [vmem:[%s6109_s1 + $0x524] ss:$16 sps:$4 sm:$0xff]  }
  0x6c   :  { %2615 = vmatprep.subr.bf16.mxu0 %v4191_v59  ;;  %2902 = vmatprep.subr.bf16.mxu1 %v4194_v60  ;;  %v4278_v59 = vld [vmem:[%s6109_s1 + $0x52c] ss:$16 sps:$4 sm:$0xff]   ;;  %v4273_v60 = vld [vmem:[%s6109_s1 + $0x520] ss:$16 sps:$4 sm:$0xff]  }
  0x6f   :  { %2616 = vmatpush1.bf16.msra.mxu0 %v4189_v61  ;;  %2903 = vmatpush1.bf16.msra.mxu1 %v4192_v62  ;;  %v4276_v61 = vld [vmem:[%s6109_s1 + $0x528] ss:$16 sps:$4 sm:$0xff]   ;;  %v4281_v62 = vld [vmem:[%s6109_s1 + $0x544] ss:$16 sps:$4 sm:$0xff]  }
  0x70   :  { %2617 = vmatprep.subr.bf16.mxu0 %v4197_v63  ;;  %2904 = vmatprep.subr.bf16.mxu1 %v4200_v0  ;;  %v4284_v63 = vld [vmem:[%s6109_s1 + $0x54c] ss:$16 sps:$4 sm:$0xff]   ;;  %v4279_v0 = vld [vmem:[%s6109_s1 + $0x540] ss:$16 sps:$4 sm:$0xff]  }
  0x73   :  { %2618 = vmatpush1.bf16.msra.mxu0 %v4195_v1  ;;  %2905 = vmatpush1.bf16.msra.mxu1 %v4198_v2  ;;  %v4282_v1 = vld [vmem:[%s6109_s1 + $0x548] ss:$16 sps:$4 sm:$0xff]   ;;  %v4287_v2 = vld [vmem:[%s6109_s1 + $0x564] ss:$16 sps:$4 sm:$0xff]  }
  0x74   :  { %2619 = vmatprep.subr.bf16.mxu0 %v4203_v3  ;;  %2906 = vmatprep.subr.bf16.mxu1 %v4206_v4  ;;  %v4290_v3 = vld [vmem:[%s6109_s1 + $0x56c] ss:$16 sps:$4 sm:$0xff]   ;;  %v4285_v4 = vld [vmem:[%s6109_s1 + $0x560] ss:$16 sps:$4 sm:$0xff]  }
  0x77   :  { %2620 = vmatpush1.bf16.msra.mxu0 %v4201_v5  ;;  %2907 = vmatpush1.bf16.msra.mxu1 %v4204_v6  ;;  %v4288_v5 = vld [vmem:[%s6109_s1 + $0x568] ss:$16 sps:$4 sm:$0xff]   ;;  %v4293_v6 = vld [vmem:[%s6109_s1 + $0x584] ss:$16 sps:$4 sm:$0xff]  }
  0x78   :  { %2621 = vmatprep.subr.bf16.mxu0 %v4209_v7  ;;  %2908 = vmatprep.subr.bf16.mxu1 %v4212_v8  ;;  %v4296_v7 = vld [vmem:[%s6109_s1 + $0x58c] ss:$16 sps:$4 sm:$0xff]   ;;  %v4291_v8 = vld [vmem:[%s6109_s1 + $0x580] ss:$16 sps:$4 sm:$0xff]  }
  0x7b   :  { %2622 = vmatpush1.bf16.msra.mxu0 %v4207_v10  ;;  %2909 = vmatpush1.bf16.msra.mxu1 %v4210_v11  ;;  %v4299_v10 = vld [vmem:[%s6109_s1 + $0x5a4] ss:$16 sps:$4 sm:$0xff]   ;;  %v4302_v11 = vld [vmem:[%s6109_s1 + $0x5ac] ss:$16 sps:$4 sm:$0xff]  }
  0x7c   :  { %2623 = vmatprep.subr.bf16.mxu0 %v4215_v12  ;;  %2910 = vmatprep.subr.bf16.mxu1 %v4218_v52  ;;  %v4297_v12 = vld [vmem:[%s6109_s1 + $0x5a0] ss:$16 sps:$4 sm:$0xff]   ;;  %v4300_v52 = vld [vmem:[%s6109_s1 + $0x5a8] ss:$16 sps:$4 sm:$0xff]  }
  0x7f   :  { %2624 = vmatpush1.bf16.msra.mxu0 %v4213_v15  ;;  %2911 = vmatpush1.bf16.msra.mxu1 %v4216_v16  ;;  %v4305_v15 = vld [vmem:[%s6109_s1 + $0x5c4] ss:$16 sps:$4 sm:$0xff]   ;;  %v4308_v16 = vld [vmem:[%s6109_s1 + $0x5cc] ss:$16 sps:$4 sm:$0xff]  }
  0x80   :  { %2634 = vmatprep.subr.bf16.mxu0 %v4221_v17  ;;  %2921 = vmatprep.subr.bf16.mxu1 %v4224_v18  ;;  %v4303_v17 = vld [vmem:[%s6109_s1 + $0x5c0] ss:$16 sps:$4 sm:$0xff]   ;;  %v4306_v18 = vld [vmem:[%s6109_s1 + $0x5c8] ss:$16 sps:$4 sm:$0xff]  }
  0x82   :  { %2626 = vmatmul.mubr.bf16.vlgmr.msra.gmra.mrb[0].mxu0 %v493_v21  ;;  %2913 = vmatmul.mubr.bf16.vlgmr.msra.gmra.mrb[0].mxu1 %v493_v21  ;;  %v4309_v21 = vld [vmem:[%s6109_s1 + $0x5e0] ss:$16 sps:$4 sm:$0xff]  }
  0x83   :  { %2635 = vmatpush1.bf16.msra.mxu0 %v4219_v20  ;;  %2922 = vmatpush1.bf16.msra.mxu1 %v4222_v22  ;;  %v4314_v20 = vld [vmem:[%s6109_s1 + $0x5ec] ss:$16 sps:$4 sm:$0xff]   ;;  %v4312_v22 = vld [vmem:[%s6109_s1 + $0x5e8] ss:$16 sps:$4 sm:$0xff]  }
  0x84   :  { %2636 = vmatprep.subr.bf16.mxu0 %v4227_v23  ;;  %2923 = vmatprep.subr.bf16.mxu1 %v4230_v24  ;;  %v4318_v23 = vld [vmem:[%s6109_s1 + $0x604] ss:$16 sps:$4 sm:$0xff]   ;;  %v4321_v24 = vld [vmem:[%s6109_s1 + $0x60c] ss:$16 sps:$4 sm:$0xff]  }
  0x85   :  { %2666 = vmatprep.mubr.bf16.mxu0 %v5148_v25  ;;  %2953 = vmatprep.mubr.bf16.mxu1 %v5148_v25 }
  0x87   :  { %2637 = vmatpush1.bf16.msra.mxu0 %v4225_v13  ;;  %2924 = vmatpush1.bf16.msra.mxu1 %v4228_v26  ;;  %v4316_v13 = vld [vmem:[%s6109_s1 + $0x600] ss:$16 sps:$4 sm:$0xff]   ;;  %v5337_v26 = vrot.slane %v5117_v14, %v4853_v49  ;;  %v496_v14 = vcombine.high %v5148_v25, %v5148_v25  ;;  %v4330_v25 = vld [vmem:[%s6109_s1 + $0x644] ss:$16 sps:$4 sm:$0xff]  }
  0x88   :  { %2638 = vmatprep.subr.bf16.mxu0 %v4233_v27  ;;  %2925 = vmatprep.subr.bf16.mxu1 %v4236_v28  ;;  %v4319_v27 = vld [vmem:[%s6109_s1 + $0x608] ss:$16 sps:$4 sm:$0xff]   ;;  %v4324_v28 = vld [vmem:[%s6109_s1 + $0x624] ss:$16 sps:$4 sm:$0xff]  }
  0x8b   :  { %2639 = vmatpush1.bf16.msra.mxu0 %v4231_v29  ;;  %2926 = vmatpush1.bf16.msra.mxu1 %v4234_v30  ;;  %v4327_v29 = vld [vmem:[%s6109_s1 + $0x62c] ss:$16 sps:$4 sm:$0xff]   ;;  %v4322_v30 = vld [vmem:[%s6109_s1 + $0x620] ss:$16 sps:$4 sm:$0xff]  }
  0x8c   :  { %2640 = vmatprep.subr.bf16.mxu0 %v4239_v31  ;;  %2927 = vmatprep.subr.bf16.mxu1 %v4242_v32  ;;  %v4325_v31 = vld [vmem:[%s6109_s1 + $0x628] ss:$16 sps:$4 sm:$0xff]   ;;  %v4333_v32 = vld [vmem:[%s6109_s1 + $0x64c] ss:$16 sps:$4 sm:$0xff]  }
  0x8f   :  { %2641 = vmatpush1.bf16.msra.mxu0 %v4237_v33  ;;  %2928 = vmatpush1.bf16.msra.mxu1 %v4240_v34  ;;  %v4328_v33 = vld [vmem:[%s6109_s1 + $0x640] ss:$16 sps:$4 sm:$0xff]   ;;  %v4331_v34 = vld [vmem:[%s6109_s1 + $0x648] ss:$16 sps:$4 sm:$0xff]  }
  0x90   :  { %2642 = vmatprep.subr.bf16.mxu0 %v4245_v35  ;;  %2929 = vmatprep.subr.bf16.mxu1 %v4248_v36  ;;  %v4336_v35 = vld [vmem:[%s6109_s1 + $0x664] ss:$16 sps:$4 sm:$0xff]   ;;  %v4339_v36 = vld [vmem:[%s6109_s1 + $0x66c] ss:$16 sps:$4 sm:$0xff]  }
  0x93   :  { %2643 = vmatpush1.bf16.msra.mxu0 %v4243_v37  ;;  %2930 = vmatpush1.bf16.msra.mxu1 %v4246_v38  ;;  %v4334_v37 = vld [vmem:[%s6109_s1 + $0x660] ss:$16 sps:$4 sm:$0xff]   ;;  %v4337_v38 = vld [vmem:[%s6109_s1 + $0x668] ss:$16 sps:$4 sm:$0xff]  }
  0x94   :  { %2644 = vmatprep.subr.bf16.mxu0 %v4251_v39  ;;  %2931 = vmatprep.subr.bf16.mxu1 %v4254_v40  ;;  %v4342_v39 = vld [vmem:[%s6109_s1 + $0x684] ss:$16 sps:$4 sm:$0xff]   ;;  %v4345_v40 = vld [vmem:[%s6109_s1 + $0x68c] ss:$16 sps:$4 sm:$0xff]  }
  0x97   :  { %2645 = vmatpush1.bf16.msra.mxu0 %v4249_v41  ;;  %2932 = vmatpush1.bf16.msra.mxu1 %v4252_v43  ;;  %v4340_v41 = vld [vmem:[%s6109_s1 + $0x680] ss:$16 sps:$4 sm:$0xff]   ;;  %v4343_v43 = vld [vmem:[%s6109_s1 + $0x688] ss:$16 sps:$4 sm:$0xff]  }
  0x98   :  { %2646 = vmatprep.subr.bf16.mxu0 %v4257_v44  ;;  %2933 = vmatprep.subr.bf16.mxu1 %v4260_v45  ;;  %v4348_v44 = vld [vmem:[%s6109_s1 + $0x6a4] ss:$16 sps:$4 sm:$0xff]   ;;  %v4351_v45 = vld [vmem:[%s6109_s1 + $0x6ac] ss:$16 sps:$4 sm:$0xff]  }
  0x9b   :  { %2647 = vmatpush1.bf16.msra.mxu0 %v4255_v46  ;;  %2934 = vmatpush1.bf16.msra.mxu1 %v4258_v47  ;;  %v4346_v46 = vld [vmem:[%s6109_s1 + $0x6a0] ss:$16 sps:$4 sm:$0xff]   ;;  %v4349_v47 = vld [vmem:[%s6109_s1 + $0x6a8] ss:$16 sps:$4 sm:$0xff]  }
  0x9c   :  { %2648 = vmatprep.subr.bf16.mxu0 %v4263_v48  ;;  %2935 = vmatprep.subr.bf16.mxu1 %v4266_v50  ;;  %v4354_v48 = vld [vmem:[%s6109_s1 + $0x6c4] ss:$16 sps:$4 sm:$0xff]   ;;  %v4357_v50 = vld [vmem:[%s6109_s1 + $0x6cc] ss:$16 sps:$4 sm:$0xff]  }
  0x9f   :  { %2649 = vmatpush1.bf16.msra.mxu0 %v4261_v51  ;;  %2936 = vmatpush1.bf16.msra.mxu1 %v4264_v53  ;;  %v4352_v51 = vld [vmem:[%s6109_s1 + $0x6c0] ss:$16 sps:$4 sm:$0xff]   ;;  %v4355_v53 = vld [vmem:[%s6109_s1 + $0x6c8] ss:$16 sps:$4 sm:$0xff]  }
  0xa0   :  { %2650 = vmatprep.subr.bf16.mxu0 %v4269_v54  ;;  %2937 = vmatprep.subr.bf16.mxu1 %v4272_v55  ;;  %v4360_v54 = vld [vmem:[%s6109_s1 + $0x6e4] ss:$16 sps:$4 sm:$0xff]   ;;  %v4363_v55 = vld [vmem:[%s6109_s1 + $0x6ec] ss:$16 sps:$4 sm:$0xff]  }
  0xa3   :  { %2651 = vmatpush1.bf16.msra.mxu0 %v4267_v56  ;;  %2938 = vmatpush1.bf16.msra.mxu1 %v4270_v57  ;;  %v4358_v56 = vld [vmem:[%s6109_s1 + $0x6e0] ss:$16 sps:$4 sm:$0xff]   ;;  %v4361_v57 = vld [vmem:[%s6109_s1 + $0x6e8] ss:$16 sps:$4 sm:$0xff]  }
  0xa4   :  { %2652 = vmatprep.subr.bf16.mxu0 %v4275_v58  ;;  %2939 = vmatprep.subr.bf16.mxu1 %v4278_v59  ;;  %v4366_v58 = vld [vmem:[%s6109_s1 + $0x704] ss:$16 sps:$4 sm:$0xff]   ;;  %v4369_v59 = vld [vmem:[%s6109_s1 + $0x70c] ss:$16 sps:$4 sm:$0xff]  }
  0xa7   :  { %2653 = vmatpush1.bf16.msra.mxu0 %v4273_v60  ;;  %2940 = vmatpush1.bf16.msra.mxu1 %v4276_v61  ;;  %v4364_v60 = vld [vmem:[%s6109_s1 + $0x700] ss:$16 sps:$4 sm:$0xff]   ;;  %v4367_v61 = vld [vmem:[%s6109_s1 + $0x708] ss:$16 sps:$4 sm:$0xff]  }
  0xa8   :  { %2654 = vmatprep.subr.bf16.mxu0 %v4281_v62  ;;  %2941 = vmatprep.subr.bf16.mxu1 %v4284_v63  ;;  %v4372_v62 = vld [vmem:[%s6109_s1 + $0x724] ss:$16 sps:$4 sm:$0xff]   ;;  %v4375_v63 = vld [vmem:[%s6109_s1 + $0x72c] ss:$16 sps:$4 sm:$0xff]  }
  0xab   :  { %2655 = vmatpush1.bf16.msra.mxu0 %v4279_v0  ;;  %2942 = vmatpush1.bf16.msra.mxu1 %v4282_v1  ;;  %v4370_v0 = vld [vmem:[%s6109_s1 + $0x720] ss:$16 sps:$4 sm:$0xff]   ;;  %v4373_v1 = vld [vmem:[%s6109_s1 + $0x728] ss:$16 sps:$4 sm:$0xff]  }
  0xac   :  { %2656 = vmatprep.subr.bf16.mxu0 %v4287_v2  ;;  %2943 = vmatprep.subr.bf16.mxu1 %v4290_v3  ;;  %v4378_v2 = vld [vmem:[%s6109_s1 + $0x744] ss:$16 sps:$4 sm:$0xff]   ;;  %v4381_v3 = vld [vmem:[%s6109_s1 + $0x74c] ss:$16 sps:$4 sm:$0xff]  }
  0xaf   :  { %2657 = vmatpush1.bf16.msra.mxu0 %v4285_v4  ;;  %2944 = vmatpush1.bf16.msra.mxu1 %v4288_v5  ;;  %v4376_v4 = vld [vmem:[%s6109_s1 + $0x740] ss:$16 sps:$4 sm:$0xff]   ;;  %v4379_v5 = vld [vmem:[%s6109_s1 + $0x748] ss:$16 sps:$4 sm:$0xff]  }
  0xb0   :  { %2658 = vmatprep.subr.bf16.mxu0 %v4293_v6  ;;  %2945 = vmatprep.subr.bf16.mxu1 %v4296_v7  ;;  %v4384_v6 = vld [vmem:[%s6109_s1 + $0x764] ss:$16 sps:$4 sm:$0xff]   ;;  %v4387_v7 = vld [vmem:[%s6109_s1 + $0x76c] ss:$16 sps:$4 sm:$0xff]  }
  0xb3   :  { %2659 = vmatpush1.bf16.msra.mxu0 %v4291_v8  ;;  %2946 = vmatpush1.bf16.msra.mxu1 %v4294_v9  ;;  %v4382_v8 = vld [vmem:[%s6109_s1 + $0x760] ss:$16 sps:$4 sm:$0xff]   ;;  %v4385_v9 = vld [vmem:[%s6109_s1 + $0x768] ss:$16 sps:$4 sm:$0xff]  }
  0xb4   :  { %2660 = vmatprep.subr.bf16.mxu0 %v4299_v10  ;;  %2947 = vmatprep.subr.bf16.mxu1 %v4302_v11  ;;  %v4390_v10 = vld [vmem:[%s6109_s1 + $0x784] ss:$16 sps:$4 sm:$0xff]   ;;  %v4393_v11 = vld [vmem:[%s6109_s1 + $0x78c] ss:$16 sps:$4 sm:$0xff]  }
  0xb7   :  { %2661 = vmatpush1.bf16.msra.mxu0 %v4297_v12  ;;  %2948 = vmatpush1.bf16.msra.mxu1 %v4300_v52  ;;  %v4388_v12 = vld [vmem:[%s6109_s1 + $0x780] ss:$16 sps:$4 sm:$0xff]   ;;  %v4391_v52 = vld [vmem:[%s6109_s1 + $0x788] ss:$16 sps:$4 sm:$0xff]  }
  0xb8   :  { %2662 = vmatprep.subr.bf16.mxu0 %v4305_v15  ;;  %2949 = vmatprep.subr.bf16.mxu1 %v4308_v16  ;;  %v4396_v15 = vld [vmem:[%s6109_s1 + $0x7a4] ss:$16 sps:$4 sm:$0xff]   ;;  %v4399_v16 = vld [vmem:[%s6109_s1 + $0x7ac] ss:$16 sps:$4 sm:$0xff]  }
  0xbb   :  { %2663 = vmatpush1.bf16.msra.mxu0 %v4303_v17  ;;  %2950 = vmatpush1.bf16.msra.mxu1 %v4306_v18  ;;  %v4394_v17 = vld [vmem:[%s6109_s1 + $0x7a0] ss:$16 sps:$4 sm:$0xff]   ;;  %v4397_v18 = vld [vmem:[%s6109_s1 + $0x7a8] ss:$16 sps:$4 sm:$0xff]  }
  0xbc   :  { %2664 = vmatprep.subr.bf16.mxu0 %v4311_v19  ;;  %2951 = vmatprep.subr.bf16.mxu1 %v4314_v20  ;;  %v4402_v19 = vld [vmem:[%s6109_s1 + $0x7c4] ss:$16 sps:$4 sm:$0xff]   ;;  %v4405_v20 = vld [vmem:[%s6109_s1 + $0x7cc] ss:$16 sps:$4 sm:$0xff]  }
  0xbf   :  { %2665 = vmatpush1.bf16.msra.mxu0 %v4309_v21  ;;  %2952 = vmatpush1.bf16.msra.mxu1 %v4312_v22  ;;  %v5511_v21 = vld [vmem:[%s6108_s0 + $0x8] sm:$0x1f]  ;;  %v4400_v22 = vld [vmem:[%s6109_s1 + $0x7c0] ss:$16 sps:$4 sm:$0xff]  }
  0xc0   :  { %2675 = vmatprep.subr.bf16.mxu0 %v4318_v23  ;;  %2962 = vmatprep.subr.bf16.mxu1 %v4321_v24  ;;  %v4403_v23 = vld [vmem:[%s6109_s1 + $0x7c8] ss:$16 sps:$4 sm:$0xff]   ;;  %v4408_v24 = vld [vmem:[%s6109_s1 + $0x7e4] ss:$16 sps:$4 sm:$0xff]  }
  0xc2   :  { %2667 = vmatmul.mubr.bf16.vlgmr.msra.gmra.mrb[0].mxu0 %v5337_v26  ;;  %2954 = vmatmul.mubr.bf16.vlgmr.msra.gmra.mrb[0].mxu1 %v5337_v26 }
  0xc3   :  { %2676 = vmatpush1.bf16.msra.mxu0 %v4316_v13  ;;  %2963 = vmatpush1.bf16.msra.mxu1 %v4319_v27  ;;  %v4411_v13 = vld [vmem:[%s6109_s1 + $0x7ec] ss:$16 sps:$4 sm:$0xff]   ;;  %v5527_v27 = vrot.slane %v5511_v21, %v4853_v49 }
  0xc4   :  { %2677 = vmatprep.subr.bf16.mxu0 %v4324_v28  ;;  %2964 = vmatprep.subr.bf16.mxu1 %v4327_v29  ;;  %v4406_v28 = vld [vmem:[%s6109_s1 + $0x7e0] ss:$16 sps:$4 sm:$0xff]   ;;  %v4409_v29 = vld [vmem:[%s6109_s1 + $0x7e8] ss:$16 sps:$4 sm:$0xff]  }
  0xc5   :  { %2707 = vmatprep.mubr.bf16.mxu0 %v496_v14  ;;  %2994 = vmatprep.mubr.bf16.mxu1 %v496_v14  ;;  %v4414_v14 = vld [vmem:[%s6109_s1 + $0x804] ss:$16 sps:$4 sm:$0xff]  }
  0xc7   :  { %2678 = vmatpush1.bf16.msra.mxu0 %v4322_v30  ;;  %2965 = vmatpush1.bf16.msra.mxu1 %v4325_v31  ;;  %v4417_v30 = vld [vmem:[%s6109_s1 + $0x80c] ss:$16 sps:$4 sm:$0xff]   ;;  %v512_v31 = vcombine.high %v5527_v27, %v5527_v27 }
  0xc8   :  { %2679 = vmatprep.subr.bf16.mxu0 %v4330_v25  ;;  %2966 = vmatprep.subr.bf16.mxu1 %v4333_v32  ;;  %v494_v25 = vcombine.high %v5337_v26, %v5337_v26  ;;  %v4412_v32 = vld [vmem:[%s6109_s1 + $0x800] ss:$16 sps:$4 sm:$0xff]   ;;  %v4423_v26 = vld [vmem:[%s6109_s1 + $0x82c] ss:$16 sps:$4 sm:$0xff]  }
  0xcb   :  { %2680 = vmatpush1.bf16.msra.mxu0 %v4328_v33  ;;  %2967 = vmatpush1.bf16.msra.mxu1 %v4331_v34  ;;  %v4415_v33 = vld [vmem:[%s6109_s1 + $0x808] ss:$16 sps:$4 sm:$0xff]   ;;  %v4420_v34 = vld [vmem:[%s6109_s1 + $0x824] ss:$16 sps:$4 sm:$0xff]  }
  0xcc   :  { %2681 = vmatprep.subr.bf16.mxu0 %v4336_v35  ;;  %2968 = vmatprep.subr.bf16.mxu1 %v4339_v36  ;;  %v5558_v35 = vrot.slane %v512_v31, %v4853_v49  ;;  %v4418_v36 = vld [vmem:[%s6109_s1 + $0x820] ss:$16 sps:$4 sm:$0xff]  }
  0xcf   :  { %2682 = vmatpush1.bf16.msra.mxu0 %v4334_v37  ;;  %2969 = vmatpush1.bf16.msra.mxu1 %v4337_v38  ;;  %v4421_v37 = vld [vmem:[%s6109_s1 + $0x828] ss:$16 sps:$4 sm:$0xff]   ;;  %v4426_v38 = vld [vmem:[%s6109_s1 + $0x844] ss:$16 sps:$4 sm:$0xff]  }
  0xd0   :  { %2683 = vmatprep.subr.bf16.mxu0 %v4342_v39  ;;  %2970 = vmatprep.subr.bf16.mxu1 %v4345_v40  ;;  %v4429_v39 = vld [vmem:[%s6109_s1 + $0x84c] ss:$16 sps:$4 sm:$0xff]   ;;  %v4424_v40 = vld [vmem:[%s6109_s1 + $0x840] ss:$16 sps:$4 sm:$0xff]  }
  0xd3   :  { %2684 = vmatpush1.bf16.msra.mxu0 %v4340_v41  ;;  %2971 = vmatpush1.bf16.msra.mxu1 %v4343_v43  ;;  %v4427_v41 = vld [vmem:[%s6109_s1 + $0x848] ss:$16 sps:$4 sm:$0xff]   ;;  %v4432_v43 = vld [vmem:[%s6109_s1 + $0x864] ss:$16 sps:$4 sm:$0xff]  }
  0xd4   :  { %2685 = vmatprep.subr.bf16.mxu0 %v4348_v44  ;;  %2972 = vmatprep.subr.bf16.mxu1 %v4351_v45  ;;  %v4435_v44 = vld [vmem:[%s6109_s1 + $0x86c] ss:$16 sps:$4 sm:$0xff]   ;;  %v4430_v45 = vld [vmem:[%s6109_s1 + $0x860] ss:$16 sps:$4 sm:$0xff]  }
  0xd7   :  { %2686 = vmatpush1.bf16.msra.mxu0 %v4346_v46  ;;  %2973 = vmatpush1.bf16.msra.mxu1 %v4349_v47  ;;  %v4433_v46 = vld [vmem:[%s6109_s1 + $0x868] ss:$16 sps:$4 sm:$0xff]   ;;  %v4438_v47 = vld [vmem:[%s6109_s1 + $0x884] ss:$16 sps:$4 sm:$0xff]  }
  0xd8   :  { %2687 = vmatprep.subr.bf16.mxu0 %v4354_v48  ;;  %2974 = vmatprep.subr.bf16.mxu1 %v4357_v50  ;;  %v4441_v48 = vld [vmem:[%s6109_s1 + $0x88c] ss:$16 sps:$4 sm:$0xff]   ;;  %v4436_v50 = vld [vmem:[%s6109_s1 + $0x880] ss:$16 sps:$4 sm:$0xff]  }
  0xdb   :  { %2688 = vmatpush1.bf16.msra.mxu0 %v4352_v51  ;;  %2975 = vmatpush1.bf16.msra.mxu1 %v4355_v53  ;;  %v4439_v51 = vld [vmem:[%s6109_s1 + $0x888] ss:$16 sps:$4 sm:$0xff]   ;;  %v4444_v53 = vld [vmem:[%s6109_s1 + $0x8a4] ss:$16 sps:$4 sm:$0xff]  }
  0xdc   :  { %2689 = vmatprep.subr.bf16.mxu0 %v4360_v54  ;;  %2976 = vmatprep.subr.bf16.mxu1 %v4363_v55  ;;  %v4447_v54 = vld [vmem:[%s6109_s1 + $0x8ac] ss:$16 sps:$4 sm:$0xff]   ;;  %v4442_v55 = vld [vmem:[%s6109_s1 + $0x8a0] ss:$16 sps:$4 sm:$0xff]  }
  0xdf   :  { %2690 = vmatpush1.bf16.msra.mxu0 %v4358_v56  ;;  %2977 = vmatpush1.bf16.msra.mxu1 %v4361_v57  ;;  %v4445_v56 = vld [vmem:[%s6109_s1 + $0x8a8] ss:$16 sps:$4 sm:$0xff]   ;;  %v4450_v57 = vld [vmem:[%s6109_s1 + $0x8c4] ss:$16 sps:$4 sm:$0xff]  }
  0xe0   :  { %2691 = vmatprep.subr.bf16.mxu0 %v4366_v58  ;;  %2978 = vmatprep.subr.bf16.mxu1 %v4369_v59  ;;  %v4453_v58 = vld [vmem:[%s6109_s1 + $0x8cc] ss:$16 sps:$4 sm:$0xff]   ;;  %v4448_v59 = vld [vmem:[%s6109_s1 + $0x8c0] ss:$16 sps:$4 sm:$0xff]  }
  0xe3   :  { %2692 = vmatpush1.bf16.msra.mxu0 %v4364_v60  ;;  %2979 = vmatpush1.bf16.msra.mxu1 %v4367_v61  ;;  %v4451_v60 = vld [vmem:[%s6109_s1 + $0x8c8] ss:$16 sps:$4 sm:$0xff]   ;;  %v4456_v61 = vld [vmem:[%s6109_s1 + $0x8e4] ss:$16 sps:$4 sm:$0xff]  }
  0xe4   :  { %2693 = vmatprep.subr.bf16.mxu0 %v4372_v62  ;;  %2980 = vmatprep.subr.bf16.mxu1 %v4375_v63  ;;  %v4459_v62 = vld [vmem:[%s6109_s1 + $0x8ec] ss:$16 sps:$4 sm:$0xff]   ;;  %v4454_v63 = vld [vmem:[%s6109_s1 + $0x8e0] ss:$16 sps:$4 sm:$0xff]  }
  0xe7   :  { %2694 = vmatpush1.bf16.msra.mxu0 %v4370_v0  ;;  %2981 = vmatpush1.bf16.msra.mxu1 %v4373_v1  ;;  %v4457_v0 = vld [vmem:[%s6109_s1 + $0x8e8] ss:$16 sps:$4 sm:$0xff]   ;;  %v4462_v1 = vld [vmem:[%s6109_s1 + $0x904] ss:$16 sps:$4 sm:$0xff]  }
  0xe8   :  { %2695 = vmatprep.subr.bf16.mxu0 %v4378_v2  ;;  %2982 = vmatprep.subr.bf16.mxu1 %v4381_v3  ;;  %v4465_v2 = vld [vmem:[%s6109_s1 + $0x90c] ss:$16 sps:$4 sm:$0xff]   ;;  %v4460_v3 = vld [vmem:[%s6109_s1 + $0x900] ss:$16 sps:$4 sm:$0xff]  }
  0xeb   :  { %2696 = vmatpush1.bf16.msra.mxu0 %v4376_v4  ;;  %2983 = vmatpush1.bf16.msra.mxu1 %v4379_v5  ;;  %v4463_v4 = vld [vmem:[%s6109_s1 + $0x908] ss:$16 sps:$4 sm:$0xff]   ;;  %v4468_v5 = vld [vmem:[%s6109_s1 + $0x924] ss:$16 sps:$4 sm:$0xff]  }
  0xec   :  { %2697 = vmatprep.subr.bf16.mxu0 %v4384_v6  ;;  %2984 = vmatprep.subr.bf16.mxu1 %v4387_v7  ;;  %v4471_v6 = vld [vmem:[%s6109_s1 + $0x92c] ss:$16 sps:$4 sm:$0xff]   ;;  %v4466_v7 = vld [vmem:[%s6109_s1 + $0x920] ss:$16 sps:$4 sm:$0xff]  }
  0xef   :  { %2698 = vmatpush1.bf16.msra.mxu0 %v4382_v8  ;;  %2985 = vmatpush1.bf16.msra.mxu1 %v4385_v9  ;;  %v4469_v8 = vld [vmem:[%s6109_s1 + $0x928] ss:$16 sps:$4 sm:$0xff]   ;;  %v4474_v9 = vld [vmem:[%s6109_s1 + $0x944] ss:$16 sps:$4 sm:$0xff]  }
  0xf0   :  { %2699 = vmatprep.subr.bf16.mxu0 %v4390_v10  ;;  %2986 = vmatprep.subr.bf16.mxu1 %v4393_v11  ;;  %v4477_v10 = vld [vmem:[%s6109_s1 + $0x94c] ss:$16 sps:$4 sm:$0xff]   ;;  %v4472_v11 = vld [vmem:[%s6109_s1 + $0x940] ss:$16 sps:$4 sm:$0xff]  }
  0xf3   :  { %2700 = vmatpush1.bf16.msra.mxu0 %v4388_v12  ;;  %2987 = vmatpush1.bf16.msra.mxu1 %v4391_v52  ;;  %v4475_v12 = vld [vmem:[%s6109_s1 + $0x948] ss:$16 sps:$4 sm:$0xff]   ;;  %v4480_v52 = vld [vmem:[%s6109_s1 + $0x964] ss:$16 sps:$4 sm:$0xff]  }
  0xf4   :  { %2701 = vmatprep.subr.bf16.mxu0 %v4396_v15  ;;  %2988 = vmatprep.subr.bf16.mxu1 %v4399_v16  ;;  %v4483_v15 = vld [vmem:[%s6109_s1 + $0x96c] ss:$16 sps:$4 sm:$0xff]  }
  0xf7   :  { %2702 = vmatpush1.bf16.msra.mxu0 %v4394_v17  ;;  %2989 = vmatpush1.bf16.msra.mxu1 %v4397_v18 }
  0xf8   :  { %2703 = vmatprep.subr.bf16.mxu0 %v4402_v19  ;;  %2990 = vmatprep.subr.bf16.mxu1 %v4405_v20 }
  0xfb   :  { %2704 = vmatpush1.bf16.msra.mxu0 %v4400_v22  ;;  %2991 = vmatpush1.bf16.msra.mxu1 %v4403_v23 }
  0xfc   :  { %2705 = vmatprep.subr.bf16.mxu0 %v4408_v24  ;;  %2992 = vmatprep.subr.bf16.mxu1 %v4411_v13 }
  0xff   :  { %2706 = vmatpush1.bf16.msra.mxu0 %v4406_v28  ;;  %2993 = vmatpush1.bf16.msra.mxu1 %v4409_v29 }
 0x100   :  { %2716 = vmatprep.subr.bf16.mxu0 %v4414_v14  ;;  %3003 = vmatprep.subr.bf16.mxu1 %v4417_v30 }
 0x102   :  { %2708 = vmatmul.mubr.bf16.vlgmr.msra.gmra.mrb[0].mxu0 %v494_v25  ;;  %2995 = vmatmul.mubr.bf16.vlgmr.msra.gmra.mrb[0].mxu1 %v494_v25 }
 0x103   :  { %2717 = vmatpush1.bf16.msra.mxu0 %v4412_v32  ;;  %3004 = vmatpush1.bf16.msra.mxu1 %v4415_v33 }
 0x104   :  { %2718 = vmatprep.subr.bf16.mxu0 %v4420_v34  ;;  %3005 = vmatprep.subr.bf16.mxu1 %v4423_v26 }
 0x105   :  { %2748 = vmatprep.mubr.bf16.mxu0 %v5558_v35  ;;  %3035 = vmatprep.mubr.bf16.mxu1 %v5558_v35 }
 0x107   :  { %2719 = vmatpush1.bf16.msra.mxu0 %v4418_v36  ;;  %3006 = vmatpush1.bf16.msra.mxu1 %v4421_v37 }
 0x108   :  { %2720 = vmatprep.subr.bf16.mxu0 %v4426_v38  ;;  %3007 = vmatprep.subr.bf16.mxu1 %v4429_v39 }
 0x10b   :  { %2721 = vmatpush1.bf16.msra.mxu0 %v4424_v40  ;;  %3008 = vmatpush1.bf16.msra.mxu1 %v4427_v41 }
 0x10c   :  { %2722 = vmatprep.subr.bf16.mxu0 %v4432_v43  ;;  %3009 = vmatprep.subr.bf16.mxu1 %v4435_v44 }
 0x10f   :  { %2723 = vmatpush1.bf16.msra.mxu0 %v4430_v45  ;;  %3010 = vmatpush1.bf16.msra.mxu1 %v4433_v46 }
 0x110   :  { %2724 = vmatprep.subr.bf16.mxu0 %v4438_v47  ;;  %3011 = vmatprep.subr.bf16.mxu1 %v4441_v48 }
 0x113   :  { %2725 = vmatpush1.bf16.msra.mxu0 %v4436_v50  ;;  %3012 = vmatpush1.bf16.msra.mxu1 %v4439_v51 }
 0x114   :  { %2726 = vmatprep.subr.bf16.mxu0 %v4444_v53  ;;  %3013 = vmatprep.subr.bf16.mxu1 %v4447_v54 }
 0x117   :  { %2727 = vmatpush1.bf16.msra.mxu0 %v4442_v55  ;;  %3014 = vmatpush1.bf16.msra.mxu1 %v4445_v56 }
 0x118   :  { %2728 = vmatprep.subr.bf16.mxu0 %v4450_v57  ;;  %3015 = vmatprep.subr.bf16.mxu1 %v4453_v58 }
 0x11b   :  { %2729 = vmatpush1.bf16.msra.mxu0 %v4448_v59  ;;  %3016 = vmatpush1.bf16.msra.mxu1 %v4451_v60 }
 0x11c   :  { %2730 = vmatprep.subr.bf16.mxu0 %v4456_v61  ;;  %3017 = vmatprep.subr.bf16.mxu1 %v4459_v62 }
 0x11f   :  { %2731 = vmatpush1.bf16.msra.mxu0 %v4454_v63  ;;  %3018 = vmatpush1.bf16.msra.mxu1 %v4457_v0 }
 0x120   :  { %2732 = vmatprep.subr.bf16.mxu0 %v4462_v1  ;;  %3019 = vmatprep.subr.bf16.mxu1 %v4465_v2 }
 0x123   :  { %2733 = vmatpush1.bf16.msra.mxu0 %v4460_v3  ;;  %3020 = vmatpush1.bf16.msra.mxu1 %v4463_v4 }
 0x124   :  { %2734 = vmatprep.subr.bf16.mxu0 %v4468_v5  ;;  %3021 = vmatprep.subr.bf16.mxu1 %v4471_v6 }
 0x127   :  { %2735 = vmatpush1.bf16.msra.mxu0 %v4466_v7  ;;  %3022 = vmatpush1.bf16.msra.mxu1 %v4469_v8 }
 0x128   :  { %2736 = vmatprep.subr.bf16.mxu0 %v4474_v9  ;;  %3023 = vmatprep.subr.bf16.mxu1 %v4477_v10 }
 0x129   :  { %10 = vsyncpa [#allocation3], 0  ;;  %v4478_v16 = vld [vmem:[%s6109_s1 + $0x960] ss:$16 sps:$4 sm:$0xff]   ;;  %v4481_v17 = vld [vmem:[%s6109_s1 + $0x968] ss:$16 sps:$4 sm:$0xff]   ;;  %v5744_v37 = vrot.slane %v5527_v27, %v4853_v49  ;;  %v535_v41 = vcombine.high %v5558_v35, %v5558_v35 }
 0x12a   :  { %v4486_v18 = vld [vmem:[%s6109_s1 + $0x984] ss:$16 sps:$4 sm:$0xff]   ;;  %v4489_v19 = vld [vmem:[%s6109_s1 + $0x98c] ss:$16 sps:$4 sm:$0xff]   ;;  %v4484_v20 = vld [vmem:[%s6109_s1 + $0x980] ss:$16 sps:$4 sm:$0xff]  }
 0x12b   :  { %2737 = vmatpush1.bf16.msra.mxu0 %v4472_v11  ;;  %3024 = vmatpush1.bf16.msra.mxu1 %v4475_v12  ;;  %v4487_v22 = vld [vmem:[%s6109_s1 + $0x988] ss:$16 sps:$4 sm:$0xff]   ;;  %v4492_v23 = vld [vmem:[%s6109_s1 + $0x9a4] ss:$16 sps:$4 sm:$0xff]   ;;  %v4495_v24 = vld [vmem:[%s6109_s1 + $0x9ac] ss:$16 sps:$4 sm:$0xff]  }
 0x12c   :  { %2738 = vmatprep.subr.bf16.mxu0 %v4480_v52  ;;  %3025 = vmatprep.subr.bf16.mxu1 %v4483_v15  ;;  %v4490_v13 = vld [vmem:[%s6109_s1 + $0x9a0] ss:$16 sps:$4 sm:$0xff]   ;;  %v4493_v28 = vld [vmem:[%s6109_s1 + $0x9a8] ss:$16 sps:$4 sm:$0xff]   ;;  %v4498_v29 = vld [vmem:[%s6109_s1 + $0x9c4] ss:$16 sps:$4 sm:$0xff]  }
 0x12d   :  { %v4501_v14 = vld [vmem:[%s6109_s1 + $0x9cc] ss:$16 sps:$4 sm:$0xff]   ;;  %v4496_v30 = vld [vmem:[%s6109_s1 + $0x9c0] ss:$16 sps:$4 sm:$0xff]   ;;  %v4499_v31 = vld [vmem:[%s6109_s1 + $0x9c8] ss:$16 sps:$4 sm:$0xff]  }
 0x12e   :  { %v4504_v25 = vld [vmem:[%s6109_s1 + $0x9e4] ss:$16 sps:$4 sm:$0xff]   ;;  %v4507_v32 = vld [vmem:[%s6109_s1 + $0x9ec] ss:$16 sps:$4 sm:$0xff]   ;;  %v4502_v33 = vld [vmem:[%s6109_s1 + $0x9e0] ss:$16 sps:$4 sm:$0xff]  }
 0x12f   :  { %2739 = vmatpush1.bf16.msra.mxu0 %v4478_v16  ;;  %3026 = vmatpush1.bf16.msra.mxu1 %v4481_v17  ;;  %v4505_v34 = vld [vmem:[%s6109_s1 + $0x9e8] ss:$16 sps:$4 sm:$0xff]   ;;  %v4511_v26 = vld [vmem:[%s6109_s1 + $0xa04] ss:$16 sps:$4 sm:$0xff]   ;;  %v4514_v36 = vld [vmem:[%s6109_s1 + $0xa0c] ss:$16 sps:$4 sm:$0xff]  }
 0x130   :  { %2740 = vmatprep.subr.bf16.mxu0 %v4486_v18  ;;  %3027 = vmatprep.subr.bf16.mxu1 %v4489_v19  ;;  %v4509_v38 = vld [vmem:[%s6109_s1 + $0xa00] ss:$16 sps:$4 sm:$0xff]   ;;  %v4512_v39 = vld [vmem:[%s6109_s1 + $0xa08] ss:$16 sps:$4 sm:$0xff]   ;;  %v4517_v40 = vld [vmem:[%s6109_s1 + $0xa24] ss:$16 sps:$4 sm:$0xff]  }
 0x131   :  { %v4520_v27 = vld [vmem:[%s6109_s1 + $0xa2c] ss:$16 sps:$4 sm:$0xff]   ;;  %v4515_v43 = vld [vmem:[%s6109_s1 + $0xa20] ss:$16 sps:$4 sm:$0xff]   ;;  %v4518_v44 = vld [vmem:[%s6109_s1 + $0xa28] ss:$16 sps:$4 sm:$0xff]  }
 0x132   :  { %v4523_v35 = vld [vmem:[%s6109_s1 + $0xa44] ss:$16 sps:$4 sm:$0xff]   ;;  %v4526_v45 = vld [vmem:[%s6109_s1 + $0xa4c] ss:$16 sps:$4 sm:$0xff]   ;;  %v4521_v46 = vld [vmem:[%s6109_s1 + $0xa40] ss:$16 sps:$4 sm:$0xff]  }
 0x133   :  { %2741 = vmatpush1.bf16.msra.mxu0 %v4484_v20  ;;  %3028 = vmatpush1.bf16.msra.mxu1 %v4487_v22  ;;  %v4524_v47 = vld [vmem:[%s6109_s1 + $0xa48] ss:$16 sps:$4 sm:$0xff]   ;;  %v4529_v48 = vld [vmem:[%s6109_s1 + $0xa64] ss:$16 sps:$4 sm:$0xff]   ;;  %v4532_v50 = vld [vmem:[%s6109_s1 + $0xa6c] ss:$16 sps:$4 sm:$0xff]  }
 0x134   :  { %2742 = vmatprep.subr.bf16.mxu0 %v4492_v23  ;;  %3029 = vmatprep.subr.bf16.mxu1 %v4495_v24  ;;  %v4527_v51 = vld [vmem:[%s6109_s1 + $0xa60] ss:$16 sps:$4 sm:$0xff]   ;;  %v4530_v53 = vld [vmem:[%s6109_s1 + $0xa68] ss:$16 sps:$4 sm:$0xff]   ;;  %v4535_v54 = vld [vmem:[%s6109_s1 + $0xa84] ss:$16 sps:$4 sm:$0xff]  }
 0x135   :  { %v4538_v55 = vld [vmem:[%s6109_s1 + $0xa8c] ss:$16 sps:$4 sm:$0xff]   ;;  %v4533_v56 = vld [vmem:[%s6109_s1 + $0xa80] ss:$16 sps:$4 sm:$0xff]   ;;  %v4536_v57 = vld [vmem:[%s6109_s1 + $0xa88] ss:$16 sps:$4 sm:$0xff]  }
 0x136   :  { %v4541_v58 = vld [vmem:[%s6109_s1 + $0xaa4] ss:$16 sps:$4 sm:$0xff]   ;;  %v4544_v59 = vld [vmem:[%s6109_s1 + $0xaac] ss:$16 sps:$4 sm:$0xff]   ;;  %v4539_v60 = vld [vmem:[%s6109_s1 + $0xaa0] ss:$16 sps:$4 sm:$0xff]  }
 0x137   :  { %2743 = vmatpush1.bf16.msra.mxu0 %v4490_v13  ;;  %3030 = vmatpush1.bf16.msra.mxu1 %v4493_v28  ;;  %v4542_v61 = vld [vmem:[%s6109_s1 + $0xaa8] ss:$16 sps:$4 sm:$0xff]   ;;  %v4547_v62 = vld [vmem:[%s6109_s1 + $0xac4] ss:$16 sps:$4 sm:$0xff]   ;;  %v4550_v63 = vld [vmem:[%s6109_s1 + $0xacc] ss:$16 sps:$4 sm:$0xff]  }
 0x138   :  { %2744 = vmatprep.subr.bf16.mxu0 %v4498_v29  ;;  %3031 = vmatprep.subr.bf16.mxu1 %v4501_v14  ;;  %v4545_v0 = vld [vmem:[%s6109_s1 + $0xac0] ss:$16 sps:$4 sm:$0xff]   ;;  %v4548_v1 = vld [vmem:[%s6109_s1 + $0xac8] ss:$16 sps:$4 sm:$0xff]   ;;  %v4553_v2 = vld [vmem:[%s6109_s1 + $0xae4] ss:$16 sps:$4 sm:$0xff]  }
 0x139   :  { %v4556_v3 = vld [vmem:[%s6109_s1 + $0xaec] ss:$16 sps:$4 sm:$0xff]   ;;  %v4551_v4 = vld [vmem:[%s6109_s1 + $0xae0] ss:$16 sps:$4 sm:$0xff]   ;;  %v4554_v5 = vld [vmem:[%s6109_s1 + $0xae8] ss:$16 sps:$4 sm:$0xff]  }
 0x13a   :  { %v4559_v6 = vld [vmem:[%s6109_s1 + $0xb04] ss:$16 sps:$4 sm:$0xff]   ;;  %v4562_v7 = vld [vmem:[%s6109_s1 + $0xb0c] ss:$16 sps:$4 sm:$0xff]   ;;  %v4557_v8 = vld [vmem:[%s6109_s1 + $0xb00] ss:$16 sps:$4 sm:$0xff]  }
 0x13b   :  { %2745 = vmatpush1.bf16.msra.mxu0 %v4496_v30  ;;  %3032 = vmatpush1.bf16.msra.mxu1 %v4499_v31  ;;  %v4560_v9 = vld [vmem:[%s6109_s1 + $0xb08] ss:$16 sps:$4 sm:$0xff]   ;;  %v4565_v10 = vld [vmem:[%s6109_s1 + $0xb24] ss:$16 sps:$4 sm:$0xff]   ;;  %v4568_v11 = vld [vmem:[%s6109_s1 + $0xb2c] ss:$16 sps:$4 sm:$0xff]  }
 0x13c   :  { %2746 = vmatprep.subr.bf16.mxu0 %v4504_v25  ;;  %3033 = vmatprep.subr.bf16.mxu1 %v4507_v32  ;;  %v4563_v12 = vld [vmem:[%s6109_s1 + $0xb20] ss:$16 sps:$4 sm:$0xff]   ;;  %v4566_v52 = vld [vmem:[%s6109_s1 + $0xb28] ss:$16 sps:$4 sm:$0xff]   ;;  %v4571_v15 = vld [vmem:[%s6109_s1 + $0xb44] ss:$16 sps:$4 sm:$0xff]  }
 0x13d   :  { %v4574_v16 = vld [vmem:[%s6109_s1 + $0xb4c] ss:$16 sps:$4 sm:$0xff]   ;;  %v4569_v17 = vld [vmem:[%s6109_s1 + $0xb40] ss:$16 sps:$4 sm:$0xff]   ;;  %v4572_v18 = vld [vmem:[%s6109_s1 + $0xb48] ss:$16 sps:$4 sm:$0xff]  }
 0x13e   :  { %v4577_v19 = vld [vmem:[%s6109_s1 + $0xb64] ss:$16 sps:$4 sm:$0xff]   ;;  %v4580_v20 = vld [vmem:[%s6109_s1 + $0xb6c] ss:$16 sps:$4 sm:$0xff]   ;;  %v4575_v22 = vld [vmem:[%s6109_s1 + $0xb60] ss:$16 sps:$4 sm:$0xff]  }
 0x13f   :  { %2747 = vmatpush1.bf16.msra.mxu0 %v4502_v33  ;;  %3034 = vmatpush1.bf16.msra.mxu1 %v4505_v34  ;;  %v4578_v23 = vld [vmem:[%s6109_s1 + $0xb68] ss:$16 sps:$4 sm:$0xff]   ;;  %v4583_v24 = vld [vmem:[%s6109_s1 + $0xb84] ss:$16 sps:$4 sm:$0xff]   ;;  %v4586_v13 = vld [vmem:[%s6109_s1 + $0xb8c] ss:$16 sps:$4 sm:$0xff]  }
 0x140   :  { %2757 = vmatprep.subr.bf16.mxu0 %v4511_v26  ;;  %3044 = vmatprep.subr.bf16.mxu1 %v4514_v36  ;;  %v4581_v28 = vld [vmem:[%s6109_s1 + $0xb80] ss:$16 sps:$4 sm:$0xff]   ;;  %v4584_v29 = vld [vmem:[%s6109_s1 + $0xb88] ss:$16 sps:$4 sm:$0xff]   ;;  %v4589_v14 = vld [vmem:[%s6109_s1 + $0xba4] ss:$16 sps:$4 sm:$0xff]  }
 0x141   :  { %v4592_v30 = vld [vmem:[%s6109_s1 + $0xbac] ss:$16 sps:$4 sm:$0xff]   ;;  %v4587_v31 = vld [vmem:[%s6109_s1 + $0xba0] ss:$16 sps:$4 sm:$0xff]   ;;  %v4590_v25 = vld [vmem:[%s6109_s1 + $0xba8] ss:$16 sps:$4 sm:$0xff]  }
 0x142   :  { %2749 = vmatmul.mubr.bf16.vlgmr.msra.gmra.mrb[0].mxu0 %v5744_v37  ;;  %3036 = vmatmul.mubr.bf16.vlgmr.msra.gmra.mrb[0].mxu1 %v5744_v37  ;;  %v4595_v32 = vld [vmem:[%s6109_s1 + $0xbc4] ss:$16 sps:$4 sm:$0xff]   ;;  %v4598_v33 = vld [vmem:[%s6109_s1 + $0xbcc] ss:$16 sps:$4 sm:$0xff]   ;;  %v4593_v34 = vld [vmem:[%s6109_s1 + $0xbc0] ss:$16 sps:$4 sm:$0xff]  }
 0x143   :  { %2758 = vmatpush1.bf16.msra.mxu0 %v4509_v38  ;;  %3045 = vmatpush1.bf16.msra.mxu1 %v4512_v39  ;;  %v4596_v26 = vld [vmem:[%s6109_s1 + $0xbc8] ss:$16 sps:$4 sm:$0xff]   ;;  %v4601_v36 = vld [vmem:[%s6109_s1 + $0xbe4] ss:$16 sps:$4 sm:$0xff]   ;;  %v4604_v38 = vld [vmem:[%s6109_s1 + $0xbec] ss:$16 sps:$4 sm:$0xff]  }
 0x144   :  { %2759 = vmatprep.subr.bf16.mxu0 %v4517_v40  ;;  %3046 = vmatprep.subr.bf16.mxu1 %v4520_v27  ;;  %v4599_v39 = vld [vmem:[%s6109_s1 + $0xbe0] ss:$16 sps:$4 sm:$0xff]   ;;  %v4602_v40 = vld [vmem:[%s6109_s1 + $0xbe8] ss:$16 sps:$4 sm:$0xff]   ;;  %v4607_v27 = vld [vmem:[%s6109_s1 + $0xc04] ss:$16 sps:$4 sm:$0xff]  }
 0x145   :  { %2789 = vmatprep.mubr.bf16.mxu0 %v535_v41  ;;  %3076 = vmatprep.mubr.bf16.mxu1 %v535_v41  ;;  %v4610_v41 = vld [vmem:[%s6109_s1 + $0xc0c] ss:$16 sps:$4 sm:$0xff]   ;;  %vm2548_vm0 = vcmask 523264   ;;  %s4687_s21 = smov [#allocation2]   ;;  %vm3477_vm1 = vcmask 74752  }
 0x146   :  { %s3485_s22 = sshll.u32 %s4687_s21, 4  ;;  %s3486_s22 = int_to_ptr.vmem [resolvable:$true] %s3485_s22 }
 0x147   :  { %2760 = vmatpush1.bf16.msra.mxu0 %v4515_v43  ;;  %3047 = vmatpush1.bf16.msra.mxu1 %v4518_v44  ;;  %v534_v43 = vcombine.high %v5744_v37, %v5744_v37  ;;  %v4605_v44 = vld [vmem:[%s6109_s1 + $0xc00] ss:$16 sps:$4 sm:$0xff]   ;;  %v4616_v37 = vld [vmem:[%s6109_s1 + $0xc2c] ss:$16 sps:$4 sm:$0xff]   ;;  %s4661_s23 = scalar_lea.vmem %s3486_s22, 32  ;;  %p4666_p1 = scmp.lt.s32.totalorder %s3486_s22, %s3486_s22 }
 0x148   :  { %2761 = vmatprep.subr.bf16.mxu0 %v4523_v35  ;;  %3048 = vmatprep.subr.bf16.mxu1 %v4526_v45  ;;  %v4608_v35 = vld [vmem:[%s6109_s1 + $0xc08] ss:$16 sps:$4 sm:$0xff]   ;;  %v4613_v45 = vld [vmem:[%s6109_s1 + $0xc24] ss:$16 sps:$4 sm:$0xff]   ;;  %p4662_p0 = scmp.ne.s32.totalorder %s3486_s22, %s4661_s23  ;;  %p4667_p2 = scmp.lt.s32.totalorder %s4661_s23, %s4661_s23 }
 0x14a   :  { %p4668_p3 = por %p4667_p2, %p4666_p1 }
 0x14b   :  { %2762 = vmatpush1.bf16.msra.mxu0 %v4521_v46  ;;  %3049 = vmatpush1.bf16.msra.mxu1 %v4524_v47  ;;  %v4611_v46 = vld [vmem:[%s6109_s1 + $0xc20] ss:$16 sps:$4 sm:$0xff]   ;;  %v4614_v47 = vld [vmem:[%s6109_s1 + $0xc28] ss:$16 sps:$4 sm:$0xff]  }
 0x14c   :  { %2763 = vmatprep.subr.bf16.mxu0 %v4529_v48  ;;  %3050 = vmatprep.subr.bf16.mxu1 %v4532_v50  ;;  %v4619_v48 = vld [vmem:[%s6109_s1 + $0xc44] ss:$16 sps:$4 sm:$0xff]   ;;  %v4622_v50 = vld [vmem:[%s6109_s1 + $0xc4c] ss:$16 sps:$4 sm:$0xff]   ;;  %p4669_p4 = pnand %p4668_p3, %p4662_p0 }
 0x14f   :  { %2764 = vmatpush1.bf16.msra.mxu0 %v4527_v51  ;;  %3051 = vmatpush1.bf16.msra.mxu1 %v4530_v53  ;;  %v4686_v51 = vmov 0   ;;  %v497_v53 = vcombine.high %v5511_v21, %v5511_v21  ;;  %v4628_v21 = vld [vmem:[%s6109_s1 + $0xc6c] ss:$16 sps:$4 sm:$0xff]  }
 0x150   :  { %2765 = vmatprep.subr.bf16.mxu0 %v4535_v54  ;;  %3052 = vmatprep.subr.bf16.mxu1 %v4538_v55  ;;  %v4617_v54 = vld [vmem:[%s6109_s1 + $0xc40] ss:$16 sps:$4 sm:$0xff]   ;;  %v4620_v55 = vld [vmem:[%s6109_s1 + $0xc48] ss:$16 sps:$4 sm:$0xff]  }
 0x153   :  { %2766 = vmatpush1.bf16.msra.mxu0 %v4533_v56  ;;  %3053 = vmatpush1.bf16.msra.mxu1 %v4536_v57  ;;  %v4625_v56 = vld [vmem:[%s6109_s1 + $0xc64] ss:$16 sps:$4 sm:$0xff]   ;;  %v511_v57 = vrot.slane %v497_v53, %v4853_v49 }
 0x154   :  { %2767 = vmatprep.subr.bf16.mxu0 %v4541_v58  ;;  %3054 = vmatprep.subr.bf16.mxu1 %v4544_v59  ;;  %v4623_v58 = vld [vmem:[%s6109_s1 + $0xc60] ss:$16 sps:$4 sm:$0xff]   ;;  %v4626_v59 = vld [vmem:[%s6109_s1 + $0xc68] ss:$16 sps:$4 sm:$0xff]  }
 0x157   :  { %2768 = vmatpush1.bf16.msra.mxu0 %v4539_v60  ;;  %3055 = vmatpush1.bf16.msra.mxu1 %v4542_v61  ;;  %v4629_v60 = vld [vmem:[%s6111_s3 + $0x40] sm:$0xff]  }
 0x158   :  { %2769 = vmatprep.subr.bf16.mxu0 %v4547_v62  ;;  %3056 = vmatprep.subr.bf16.mxu1 %v4550_v63  ;;  %v4630_v61 = vld [vmem:[%s6111_s3 + $0xc0] sm:$0xff]   ;;  %v526_v62 = vrot.slane %v511_v57, %v4853_v49  ;;  %v4634_v49 = vld [vmem:[%s6111_s3 + $0xc8] sm:$0xff]  }
 0x159   :  { %v4631_v63 = vld [vmem:[%s6111_s3] sm:$0xff]  }
 0x15b   :  { %2770 = vmatpush1.bf16.msra.mxu0 %v4545_v0  ;;  %3057 = vmatpush1.bf16.msra.mxu1 %v4548_v1  ;;  %v4632_v0 = vld [vmem:[%s6111_s3 + $0x80] sm:$0xff]   ;;  %v4633_v1 = vld [vmem:[%s6111_s3 + $0x48] sm:$0xff]  }
 0x15c   :  { %2771 = vmatprep.subr.bf16.mxu0 %v4553_v2  ;;  %3058 = vmatprep.subr.bf16.mxu1 %v4556_v3  ;;  %v4635_v2 = vld [vmem:[%s6111_s3 + $0x8] sm:$0xff]  }
 0x15d   :  { %v4636_v3 = vld [vmem:[%s6111_s3 + $0x88] sm:$0xff]  }
 0x15f   :  { %2772 = vmatpush1.bf16.msra.mxu0 %v4551_v4  ;;  %3059 = vmatpush1.bf16.msra.mxu1 %v4554_v5  ;;  %v4637_v4 = vld [vmem:[%s6111_s3 + $0x50] sm:$0xff]  }
 0x160   :  { %2773 = vmatprep.subr.bf16.mxu0 %v4559_v6  ;;  %3060 = vmatprep.subr.bf16.mxu1 %v4562_v7  ;;  %v4638_v5 = vld [vmem:[%s6111_s3 + $0xd0] sm:$0xff]  }
 0x161   :  { %v4639_v6 = vld [vmem:[%s6111_s3 + $0x10] sm:$0xff]  }
 0x162   :  { %v4640_v7 = vld [vmem:[%s6111_s3 + $0x90] sm:$0xff]  }
 0x163   :  { %2774 = vmatpush1.bf16.msra.mxu0 %v4557_v8  ;;  %3061 = vmatpush1.bf16.msra.mxu1 %v4560_v9  ;;  %v4641_v8 = vld [vmem:[%s6111_s3 + $0x58] sm:$0xff]  }
 0x164   :  { %2775 = vmatprep.subr.bf16.mxu0 %v4565_v10  ;;  %3062 = vmatprep.subr.bf16.mxu1 %v4568_v11  ;;  %v4642_v9 = vld [vmem:[%s6111_s3 + $0xd8] sm:$0xff]  }
 0x165   :  { %v4643_v10 = vld [vmem:[%s6111_s3 + $0x18] sm:$0xff]  }
 0x166   :  { %v4644_v11 = vld [vmem:[%s6111_s3 + $0x98] sm:$0xff]  }
 0x167   :  { %2776 = vmatpush1.bf16.msra.mxu0 %v4563_v12  ;;  %3063 = vmatpush1.bf16.msra.mxu1 %v4566_v52  ;;  %v4645_v12 = vld [vmem:[%s6111_s3 + $0x60] sm:$0xff]  }
 0x168   :  { %2777 = vmatprep.subr.bf16.mxu0 %v4571_v15  ;;  %3064 = vmatprep.subr.bf16.mxu1 %v4574_v16  ;;  %v4646_v52 = vld [vmem:[%s6111_s3 + $0xe0] sm:$0xff]  }
 0x169   :  { %v4647_v15 = vld [vmem:[%s6111_s3 + $0x20] sm:$0xff]  }
 0x16a   :  { %v4648_v16 = vld [vmem:[%s6111_s3 + $0xa0] sm:$0xff]  }
 0x16b   :  { %2778 = vmatpush1.bf16.msra.mxu0 %v4569_v17  ;;  %3065 = vmatpush1.bf16.msra.mxu1 %v4572_v18  ;;  %v4649_v17 = vld [vmem:[%s6111_s3 + $0x68] sm:$0xff]  }
 0x16c   :  { %2779 = vmatprep.subr.bf16.mxu0 %v4577_v19  ;;  %3066 = vmatprep.subr.bf16.mxu1 %v4580_v20  ;;  %v4650_v18 = vld [vmem:[%s6111_s3 + $0xe8] sm:$0xff]  }
 0x16d   :  { %v4651_v19 = vld [vmem:[%s6111_s3 + $0x28] sm:$0xff]  }
 0x16e   :  { %v4652_v20 = vld [vmem:[%s6111_s3 + $0xa8] sm:$0xff]  }
 0x16f   :  { %2780 = vmatpush1.bf16.msra.mxu0 %v4575_v22  ;;  %3067 = vmatpush1.bf16.msra.mxu1 %v4578_v23  ;;  %v4653_v22 = vld [vmem:[%s6111_s3 + $0x70] sm:$0xff]  }
 0x170   :  { %2781 = vmatprep.subr.bf16.mxu0 %v4583_v24  ;;  %3068 = vmatprep.subr.bf16.mxu1 %v4586_v13  ;;  %v4654_v23 = vld [vmem:[%s6111_s3 + $0xf0] sm:$0xff]  }
 0x171   :  { %v4655_v24 = vld [vmem:[%s6111_s3 + $0x30] sm:$0xff]  }
 0x172   :  { %v4656_v13 = vld [vmem:[%s6111_s3 + $0xb0] sm:$0xff]  }
 0x173   :  { %2782 = vmatpush1.bf16.msra.mxu0 %v4581_v28  ;;  %3069 = vmatpush1.bf16.msra.mxu1 %v4584_v29  ;;  %v4657_v28 = vld [vmem:[%s6111_s3 + $0x78] sm:$0xff]  }
 0x174   :  { %2783 = vmatprep.subr.bf16.mxu0 %v4589_v14  ;;  %3070 = vmatprep.subr.bf16.mxu1 %v4592_v30  ;;  %v4658_v29 = vld [vmem:[%s6111_s3 + $0xf8] sm:$0xff]  }
 0x175   :  { %v4659_v14 = vld [vmem:[%s6111_s3 + $0x38] sm:$0xff]  }
 0x176   :  { %v4660_v30 = vld [vmem:[%s6111_s3 + $0xb8] sm:$0xff]  }
 0x177   :  { %2784 = vmatpush1.bf16.msra.mxu0 %v4587_v31  ;;  %3071 = vmatpush1.bf16.msra.mxu1 %v4590_v25  ;;  %v428_v31 = vsub.s32 0, %v4835_v42  ;;  %v436_v25 = vsub.s32 2, %v4835_v42 }
 0x178   :  { %2785 = vmatprep.subr.bf16.mxu0 %v4595_v32  ;;  %3072 = vmatprep.subr.bf16.mxu1 %v4598_v33  ;;  %v424_v32 = vld [vmem:[%s6110_s2] sm:$0xf]  ;;  %v432_v33 = vsub.s32 1, %v4835_v42 }
 0x17b   :  { %2786 = vmatpush1.bf16.msra.mxu0 %v4593_v34  ;;  %3073 = vmatpush1.bf16.msra.mxu1 %v4596_v26  ;;  %v440_v34 = vsub.s32 3, %v4835_v42  ;;  %v429_v26 = vrot.slane %v424_v32, %v428_v31 }
 0x17c   :  { %2787 = vmatprep.subr.bf16.mxu0 %v4601_v36  ;;  %3074 = vmatprep.subr.bf16.mxu1 %v4604_v38  ;;  %v437_v36 = vrot.slane %v424_v32, %v436_v25  ;;  %v433_v38 = vrot.slane %v424_v32, %v432_v33 }
 0x17f   :  { %2788 = vmatpush1.bf16.msra.mxu0 %v4599_v39  ;;  %3075 = vmatpush1.bf16.msra.mxu1 %v4602_v40  ;;  %v441_v39 = vrot.slane %v424_v32, %v440_v34 }
 0x180   :  { %2798 = vmatprep.subr.bf16.mxu0 %v4607_v27  ;;  %3085 = vmatprep.subr.bf16.mxu1 %v4610_v41 }
 0x182   :  { %2790 = vmatmul.mubr.bf16.vlgmr.msra.gmra.mrb[0].mxu0 %v534_v43  ;;  %3077 = vmatmul.mubr.bf16.vlgmr.msra.gmra.mrb[0].mxu1 %v534_v43 }
 0x183   :  { %2799 = vmatpush1.bf16.msra.mxu0 %v4605_v44  ;;  %3086 = vmatpush1.bf16.msra.mxu1 %v4608_v35 }
 0x184   :  { %2800 = vmatprep.subr.bf16.mxu0 %v4613_v45  ;;  %3087 = vmatprep.subr.bf16.mxu1 %v4616_v37 }
 0x185   :  { %2830 = vmatprep.mubr.bf16.mxu0 %v4686_v51  ;;  %3117 = vmatprep.mubr.bf16.mxu1 %v4686_v51 }
 0x187   :  { %2801 = vmatpush1.bf16.msra.mxu0 %v4611_v46  ;;  %3088 = vmatpush1.bf16.msra.mxu1 %v4614_v47 }
 0x188   :  { %2802 = vmatprep.subr.bf16.mxu0 %v4619_v48  ;;  %3089 = vmatprep.subr.bf16.mxu1 %v4622_v50 }
 0x18b   :  { %2803 = vmatpush1.bf16.msra.mxu0 %v4617_v54  ;;  %3090 = vmatpush1.bf16.msra.mxu1 %v4620_v55 }
 0x18c   :  { %2804 = vmatprep.subr.bf16.mxu0 %v4625_v56  ;;  %3091 = vmatprep.subr.bf16.mxu1 %v4628_v21 }
 0x18f   :  { %2805 = vmatpush1.bf16.msra.mxu0 %v4623_v58  ;;  %3092 = vmatpush1.bf16.msra.mxu1 %v4626_v59 }
 0x190   :  { %3928 = vmatprep.subr.bf16.mxu0 %v4629_v60  ;;  %3950 = vmatprep.subr.bf16.mxu1 %v4630_v61  ;;  %v3895_v60 = vld [vmem:[%s6112_s4] ss:$0 sm:$0xff] }
 0x192   :  { %3893 = vmatmul.mubr.msk.bf16.vlgmr.msra.gmra.mrb[0].mxu0 %vm2548_vm0, %v526_v62  ;;  %3894 = vmatmul.mubr.msk.bf16.vlgmr.msra.gmra.mrb[0].mxu1 %vm2548_vm0, %v526_v62 }
 0x193   :  { %3929 = vmatpush3.bf16.msra.mxu0 %v4631_v63  ;;  %3951 = vmatpush3.bf16.msra.mxu1 %v4632_v0 }
 0x194   :  { %3930 = vmatprep.subr.bf16.mxu0 %v4633_v1  ;;  %3952 = vmatprep.subr.bf16.mxu1 %v4634_v49 }
 0x197   :  { %3931 = vmatpush3.bf16.msra.mxu0 %v4635_v2  ;;  %3953 = vmatpush3.bf16.msra.mxu1 %v4636_v3 }
 0x198   :  { %3932 = vmatprep.subr.bf16.mxu0 %v4637_v4  ;;  %3954 = vmatprep.subr.bf16.mxu1 %v4638_v5 }
 0x19b   :  { %3933 = vmatpush3.bf16.msra.mxu0 %v4639_v6  ;;  %3955 = vmatpush3.bf16.msra.mxu1 %v4640_v7 }
 0x19c   :  { %3934 = vmatprep.subr.bf16.mxu0 %v4641_v8  ;;  %3956 = vmatprep.subr.bf16.mxu1 %v4642_v9 }
 0x19f   :  { %3935 = vmatpush3.bf16.msra.mxu0 %v4643_v10  ;;  %3957 = vmatpush3.bf16.msra.mxu1 %v4644_v11 }
 0x1a0   :  { %3936 = vmatprep.subr.bf16.mxu0 %v4645_v12  ;;  %3958 = vmatprep.subr.bf16.mxu1 %v4646_v52 }
 0x1a3   :  { %3937 = vmatpush3.bf16.msra.mxu0 %v4647_v15  ;;  %3959 = vmatpush3.bf16.msra.mxu1 %v4648_v16 }
 0x1a4   :  { %3938 = vmatprep.subr.bf16.mxu0 %v4649_v17  ;;  %3960 = vmatprep.subr.bf16.mxu1 %v4650_v18 }
 0x1a7   :  { %3939 = vmatpush3.bf16.msra.mxu0 %v4651_v19  ;;  %3961 = vmatpush3.bf16.msra.mxu1 %v4652_v20 }
 0x1a8   :  { %3940 = vmatprep.subr.bf16.mxu0 %v4653_v22  ;;  %3962 = vmatprep.subr.bf16.mxu1 %v4654_v23 }
 0x1ab   :  { %3941 = vmatpush3.bf16.msra.mxu0 %v4655_v24  ;;  %3963 = vmatpush3.bf16.msra.mxu1 %v4656_v13 }
 0x1ac   :  { %3942 = vmatprep.subr.bf16.mxu0 %v4657_v28  ;;  %3964 = vmatprep.subr.bf16.mxu1 %v4658_v29 }
 0x1af   :  { %3943 = vmatpush3.bf16.msra.mxu0 %v4659_v14  ;;  %3965 = vmatpush3.bf16.msra.mxu1 %v4660_v30 }
 0x265   :  { %v2832_v40 = vpop.f32.mrb[0].mxu0  ;;  %v3119_v27 = vpop.f32.mrb[0].mxu1 }
 0x266   :  { %v3972_v41 = vadd.f32 %v2832_v40, %v429_v26  ;;  %v3974_v43 = vadd.f32 %v3119_v27, %v437_v36  ;;  %v2834_v44 = vpop.f32.mrb[1].mxu0  ;;  %v3121_v35 = vpop.f32.mrb[1].mxu1 }
 0x267   :  { %v3973_v45 = vadd.f32 %v2834_v44, %v433_v38  ;;  %v3975_v37 = vadd.f32 %v3121_v35, %v441_v39  ;;  %v2836_v46 = vpop.f32.mrb[2].mxu0  ;;  %v3123_v47 = vpop.f32.mrb[2].mxu1 }
 0x268   :  { %v3126_v48 = vmax.f32 %v3972_v41, 0.0  ;;  %v3128_v50 = vmax.f32 %v3974_v43, 0.0  ;;  %v2837_v51 = vpop.f32.mrb[3].mxu0  ;;  %v3124_v53 = vpop.f32.mrb[3].mxu1 }
 0x269   :  { %v3127_v54 = vmax.f32 %v3973_v45, 0.0  ;;  %v3129_v42 = vmax.f32 %v3975_v37, 0.0 }
 0x26a   :  { %v3130_v21 = vpack.c.bf16 %v3126_v48, %v3126_v48  ;;  %v3132_v57 = vpack.c.bf16 %v3128_v50, %v3128_v50 }
 0x26b   :  { %v3131_v55 = vpack.c.bf16 %v3127_v54, %v3127_v54  ;;  %v3133_v56 = vpack.c.bf16 %v3129_v42, %v3129_v42 }
 0x26d   :  { %3429 = vmatprep.mubr.bf16.mxu0 %v3131_v55  ;;  %3469 = vmatprep.mubr.bf16.mxu1 %v3133_v56 }
 0x26e   :  { %3430 = vmatmul.mubr.bf16.vlgmr.msra.gmra.mrb[4].mxu0 %v3130_v21  ;;  %3470 = vmatmul.mubr.bf16.vlgmr.msra.gmra.mrb[4].mxu1 %v3132_v57 }
 0x341   :  { %v3944_v58 = vpop.f32.mrb[4].mxu0  ;;  %v3966_v59 = vpop.f32.mrb[4].mxu1 }
 0x342   :  { %v3945_v61 = vpop.f32.mrb[5].mxu0  ;;  %v3967_v62 = vpop.f32.mrb[5].mxu1 }
 0x343   :  { %v3946_v63 = vadd.f32 %v3945_v61, %v3944_v58  ;;  %v3968_v0 = vadd.f32 %v3967_v62, %v3966_v59  ;;  %v3947_v1 = vpop.f32.mrb[6].mxu0  ;;  %v3969_v49 = vpop.f32.mrb[6].mxu1 }
 0x344   :  { %v3948_v2 = vpop.f32.mrb[7].mxu0  ;;  %v3970_v3 = vpop.f32.mrb[7].mxu1 }
 0x345   :  { %v3432_v4 = vadd.f32 %v3946_v63, %v3895_v60 }
 0x347   :  { %v3472_v5 = vadd.f32 %v3968_v0, %v3432_v4 }
 0x349   :  { %3478 = vst.msk [vmem:[#allocation2] sm:$0x3] %vm3477_vm1, %v3472_v5 }
 0x34a   :  { %4672 = shalt.err (!%p4669_p4)
}
 0x34b   :  { %s4673_s25 = scalar_lea.hbm %s6113_s5, 32 }
 0x34c   :  { %p4674_p5 = scmp.ne.s32.totalorder %s6113_s5, %s4673_s25  ;;  %p4677_p6 = scmp.lt.u32.totalorder %s4673_s25, %s6113_s5 }
 0x34e   :  { %p4679_p7 = pnand %p4677_p6, %p4674_p5 }
 0x350   :  { %4682 = shalt.err (!%p4679_p7)
}
 0x351   :  { %3488 = dma.vmem_to_hbm [thread:$0]  %s3486_s22, 32, %s6113_s5, [#allocation3]  }
 0x352   :  { %4683 = dma.done.wait [#allocation3], 32  }
 0x353   :  { %4684 = vsyncadd [#allocation3], 4294967264 }
 0x354   :  { %3492 = vsyncpa [#allocation3], 1 }

</bundles_post_ra>
